<compile_context>
chip_gen: v6e
topology: v6e:2x2x1
jax: 0.10.0
libtpu: 0.0.40
codegen_flags: <defaults>
</compile_context>

<pallas_src>
import functools

import jax
import jax.numpy as jnp
from jax import lax
from jax.experimental import pallas as pl
from jax.experimental.pallas import tpu as pltpu


def encoder_conv_kernel(x_ref, wt_ref, b_ref, gamma_ref, beta_ref, sg_ref, sgt_ref,
                        out_ref, xp_ref, acc_ref, *, H, W, Cin, Cout, G, eps):
    # x_ref   : (D, H*W*Cin)            one batch element, channels-minor, unpadded
    # wt_ref  : (3, (H+2)*(W+2)*Cin, L) Toeplitz-expanded conv weight (per kd), L = H*W*Cout
    # b_ref, gamma_ref, beta_ref : (1, L)  per-lane bias / GN affine (f32)
    # sg_ref  : (L, G)  lane -> group one-hot;  sgt_ref : (G, L)  its transpose
    # out_ref : (D, L)                  lane-dense output
    # xp_ref  : (D+2, (H+2)*(W+2)*Cin)  VMEM scratch: zero-padded input (matmul dtype)
    # acc_ref : (D, L) f32              VMEM scratch: conv accumulator
    D, L = out_ref.shape
    WCin = W * Cin
    WpCin = (W + 2) * Cin
    n_per_group = jnp.float32(D * H * W * (Cout // G))

    # ---- build the zero-padded input in VMEM (no host-side jnp.pad) ----------------
    xp_ref[...] = jnp.zeros_like(xp_ref)
    for h in range(H):                       # interior: depth rows 1..D, line h -> padded line h+1
        dst = (h + 1) * WpCin + Cin
        xp_ref[1:D + 1, dst:dst + WCin] = x_ref[:, h * WCin:(h + 1) * WCin].astype(xp_ref.dtype)

    # ---- Conv3d: 3 lane-dense MXU matmuls (one per kd), K = (H+2)*(W+2)*Cin ---------
    acc_ref[...] = jnp.dot(xp_ref[0:D, :], wt_ref[0],
                           preferred_element_type=jnp.float32)
    acc_ref[...] += jnp.dot(xp_ref[1:D + 1, :], wt_ref[1],
                            preferred_element_type=jnp.float32)
    acc_ref[...] += jnp.dot(xp_ref[2:D + 2, :], wt_ref[2],
                            preferred_element_type=jnp.float32)
    acc_ref[...] += b_ref[...]               # broadcast (1, L), f32

    # ---- GroupNorm statistics (f32): cheap sublane reduce + tiny selector matmuls ---
    a = acc_ref[...]
    lane_sum = jnp.sum(a, axis=0, keepdims=True)            # (1, L)
    lane_sq = jnp.sum(a * a, axis=0, keepdims=True)         # (1, L)
    g_sum = jnp.dot(lane_sum, sg_ref[...], preferred_element_type=jnp.float32)   # (1, G)
    g_sq = jnp.dot(lane_sq, sg_ref[...], preferred_element_type=jnp.float32)     # (1, G)
    g_mean = g_sum / n_per_group
    g_var = g_sq / n_per_group - g_mean * g_mean
    g_inv = lax.rsqrt(g_var + eps)
    mean_l = jnp.dot(g_mean, sgt_ref[...], preferred_element_type=jnp.float32)   # (1, L)
    inv_l = jnp.dot(g_inv, sgt_ref[...], preferred_element_type=jnp.float32)     # (1, L)

    # ---- normalize + affine + ReLU, fully lane-dense, f32 ---------------------------
    scale = inv_l * gamma_ref[...]
    shift = beta_ref[...] - mean_l * scale
    y = jnp.maximum(a * scale + shift, 0.0)
    out_ref[...] = y.astype(out_ref.dtype)


def _toeplitz_weight(conv_w, H, W):
    """(Cout, Cin, 3, 3, 3) -> (3, (H+2)*(W+2)*Cin, H*W*Cout), Toeplitz-expanded over (kh, kw)."""
    Cout, Cin = conv_w.shape[:2]
    Hp, Wp = H + 2, W + 2
    wk = jnp.transpose(conv_w, (2, 3, 4, 1, 0))                 # (kd, kh, kw, Cin, Cout)
    dh = jnp.arange(Hp)[:, None] - jnp.arange(H)[None, :]       # (Hp, H) == kh where valid
    dw = jnp.arange(Wp)[:, None] - jnp.arange(W)[None, :]       # (Wp, W) == kw where valid
    valid = (((dh >= 0) & (dh < 3))[:, :, None, None]
             & ((dw >= 0) & (dw < 3))[None, None, :, :])        # (Hp, H, Wp, W)
    wt = wk[:, jnp.clip(dh, 0, 2)[:, :, None, None],
            jnp.clip(dw, 0, 2)[None, None, :, :], :, :]         # (3, Hp, H, Wp, W, Cin, Cout)
    wt = wt * valid[None, :, :, :, :, None, None].astype(wt.dtype)
    wt = jnp.transpose(wt, (0, 1, 3, 5, 2, 4, 6))               # (3, Hp, Wp, Cin, H, W, Cout)
    return wt.reshape(3, Hp * Wp * Cin, H * W * Cout)


def encoder_conv(x, conv_w, conv_b, gn_gamma, gn_beta, num_groups, *,
                 matmul_dtype=jnp.float32, eps=1e-5):
    """x: (N, Cin, D, H, W) float32 (PyTorch NCDHW).  Returns (N, Cout, D, H, W) float32."""
    N, Cin, D, H, W = x.shape
    Cout = conv_w.shape[0]
    G = num_groups
    Hp, Wp = H + 2, W + 2
    HWCin = H * W * Cin
    L = H * W * Cout                 # lane-dense output width (multiple of 128 for Cout>=2)
    Kc = Hp * Wp * Cin               # contraction length per kd matmul

    # NCDHW -> (N, D, H*W*Cin); channels minor; NO host-side spatial padding.
    x_flat = jnp.transpose(x, (0, 2, 3, 4, 1)).reshape(N, D, HWCin).astype(matmul_dtype)

    # Toeplitz-expanded conv weight (constant per model; in a real net precompute once).
    wt = _toeplitz_weight(conv_w, H, W).astype(matmul_dtype)

    # Per-lane bias / affine params and group-selector matrices (kept f32).
    b_lane = jnp.tile(conv_b, H * W).reshape(1, L).astype(jnp.float32)
    gamma_lane = jnp.tile(gn_gamma, H * W).reshape(1, L).astype(jnp.float32)
    beta_lane = jnp.tile(gn_beta, H * W).reshape(1, L).astype(jnp.float32)
    group_of_lane = jnp.tile(jnp.arange(Cout) // (Cout // G), H * W)        # (L,)
    sg = (group_of_lane[:, None] == jnp.arange(G)[None, :]).astype(jnp.float32)  # (L, G)
    sgt = sg.T                                                                    # (G, L)

    kernel = functools.partial(encoder_conv_kernel, H=H, W=W, Cin=Cin, Cout=Cout,
                               G=G, eps=eps)

    # TODO(synk): for large D/H/W/C add a D-tiled grid axis (halo) + two-pass GroupNorm
    # so realistic encoder shapes fit v7x's 64 MiB VMEM; unnecessary at these tile sizes.
    out = pl.pallas_call(
        kernel,
        out_shape=jax.ShapeDtypeStruct((N, D, L), jnp.float32),
        grid_spec=pltpu.PrefetchScalarGridSpec(
            num_scalar_prefetch=0,
            grid=(N,),
            in_specs=[
                pl.BlockSpec((None, D, HWCin), lambda n: (n, 0, 0)),   # x (batch squeezed)
                pl.BlockSpec((3, Kc, L), lambda n: (0, 0, 0)),          # Toeplitz weight
                pl.BlockSpec((1, L), lambda n: (0, 0)),                 # bias
                pl.BlockSpec((1, L), lambda n: (0, 0)),                 # gamma
                pl.BlockSpec((1, L), lambda n: (0, 0)),                 # beta
                pl.BlockSpec((L, G), lambda n: (0, 0)),                 # group selector
                pl.BlockSpec((G, L), lambda n: (0, 0)),                 # selector^T
            ],
            out_specs=pl.BlockSpec((None, D, L), lambda n: (n, 0, 0)),
            scratch_shapes=[
                pltpu.VMEM((D + 2, Hp * Wp * Cin), matmul_dtype),  # zero-padded input
                pltpu.VMEM((D, L), jnp.float32),                   # conv accumulator (f32)
            ],
        ),
        compiler_params=pltpu.CompilerParams(
            dimension_semantics=("parallel",),
            vmem_limit_bytes=32 * 1024 * 1024,
        ),
    )(x_flat, wt, b_lane, gamma_lane, beta_lane, sg, sgt)

    # (N, D, H*W*Cout) -> (N, Cout, D, H, W)
    return jnp.transpose(out.reshape(N, D, H, W, Cout), (0, 4, 1, 2, 3))


def reference(x, conv_w, conv_b, gn_gamma, gn_beta, num_groups, eps=1e-5):
    """Pure-JAX reference mirroring the PyTorch module semantics."""
    y = lax.conv_general_dilated(
        x, conv_w, window_strides=(1, 1, 1), padding="SAME",
        dimension_numbers=("NCDHW", "OIDHW", "NCDHW"))
    y = y + conv_b[None, :, None, None, None]
    N, C, D, H, W = y.shape
    G = num_groups
    yg = y.reshape(N, G, C // G, D, H, W)
    mean = yg.mean(axis=(2, 3, 4, 5), keepdims=True)
    var = yg.var(axis=(2, 3, 4, 5), keepdims=True)
    yn = ((yg - mean) / jnp.sqrt(var + eps)).reshape(N, C, D, H, W)
    yn = yn * gn_gamma[None, :, None, None, None] + gn_beta[None, :, None, None, None]
    return jnp.maximum(yn, 0.0)


if __name__ == "__main__":
    key = jax.random.PRNGKey(0)
    k_x, k_w, k_b, k_g, k_bt = jax.random.split(key, 5)

    N, in_ch, out_ch = 2, 4, 8
    D = H = W = 8
    num_groups = out_ch // 4  # GroupNorm(out_ch // 4, out_ch)

    x = jax.random.normal(k_x, (N, in_ch, D, H, W), dtype=jnp.float32)
    conv_w = 0.1 * jax.random.normal(k_w, (out_ch, in_ch, 3, 3, 3), dtype=jnp.float32)
    conv_b = 0.1 * jax.random.normal(k_b, (out_ch,), dtype=jnp.float32)
    gn_gamma = 1.0 + 0.1 * jax.random.normal(k_g, (out_ch,), dtype=jnp.float32)
    gn_beta = 0.1 * jax.random.normal(k_bt, (out_ch,), dtype=jnp.float32)

    ref = reference(x, conv_w, conv_b, gn_gamma, gn_beta, num_groups)

    # f32 MXU operands (exact path)
    out = encoder_conv(x, conv_w, conv_b, gn_gamma, gn_beta, num_groups)
    out = jax.block_until_ready(out)
    assert out.shape == (N, out_ch, D, H, W)
    assert jnp.allclose(out, ref, atol=2e-3, rtol=2e-3), (
        float(jnp.max(jnp.abs(out - ref))))

    # bf16 MXU operands (v6e/v7x fast path); GN stats / epilogue remain f32.
    out_bf16 = encoder_conv(x, conv_w, conv_b, gn_gamma, gn_beta, num_groups,
                            matmul_dtype=jnp.bfloat16)
    out_bf16 = jax.block_until_ready(out_bf16)
    assert jnp.allclose(out_bf16, ref, atol=2e-2, rtol=2e-2), (
        float(jnp.max(jnp.abs(out_bf16 - ref))))

    print("KERNEL_OK")
</pallas_src>

<mosaic_0001>
module attributes {stable_mosaic.version = 11 : i64} {
  func.func @encoder_conv_kernel(%arg0: i32, %arg1: memref<1x8x256xf32, #tpu.memory_space<vmem>>, %arg2: memref<3x400x512xf32, #tpu.memory_space<vmem>>, %arg3: memref<1x512xf32, #tpu.memory_space<vmem>>, %arg4: memref<1x512xf32, #tpu.memory_space<vmem>>, %arg5: memref<1x512xf32, #tpu.memory_space<vmem>>, %arg6: memref<512x2xf32, #tpu.memory_space<vmem>>, %arg7: memref<2x512xf32, #tpu.memory_space<vmem>>, %arg8: memref<1x8x512xf32, #tpu.memory_space<vmem>>, %arg9: memref<10x400xf32, #tpu.memory_space<vmem>>, %arg10: memref<8x512xf32, #tpu.memory_space<vmem>>) attributes {dimension_semantics = [#tpu.dimension_semantics<parallel>], iteration_bounds = array<i64: 2>, scalar_prefetch = 0 : i64, scratch_operands = 2 : i64, tpu.core_type = #tpu.core_type<tc>, window_params = [{transform_indices = @transform_0, window_bounds = array<i64: 1, 8, 256>}, {pipeline_mode = #tpu.pipeline_mode<synchronous>, transform_indices = @transform_1, window_bounds = array<i64: 3, 400, 512>}, {pipeline_mode = #tpu.pipeline_mode<synchronous>, transform_indices = @transform_2, window_bounds = array<i64: 1, 512>}, {pipeline_mode = #tpu.pipeline_mode<synchronous>, transform_indices = @transform_3, window_bounds = array<i64: 1, 512>}, {pipeline_mode = #tpu.pipeline_mode<synchronous>, transform_indices = @transform_4, window_bounds = array<i64: 1, 512>}, {pipeline_mode = #tpu.pipeline_mode<synchronous>, transform_indices = @transform_5, window_bounds = array<i64: 512, 2>}, {pipeline_mode = #tpu.pipeline_mode<synchronous>, transform_indices = @transform_6, window_bounds = array<i64: 2, 512>}, {transform_indices = @transform_7, window_bounds = array<i64: 1, 8, 512>}]} {
    %cst = arith.constant 0.000000e+00 : f32
    %0 = vector.broadcast %cst : f32 to vector<10x400xf32>
    %c0 = arith.constant 0 : index
    %c0_0 = arith.constant 0 : index
    %1 = vector.load %arg9[%c0, %c0_0] : memref<10x400xf32, #tpu.memory_space<vmem>>, vector<10x400xf32>
    tpu.vector_store %arg9[%c0, %c0_0], %0 {strides = array<i32>} : memref<10x400xf32, #tpu.memory_space<vmem>>, vector<10x400xf32>,
    %c0_1 = arith.constant 0 : index
    %c0_2 = arith.constant 0 : index
    %c0_3 = arith.constant 0 : index
    %2 = vector.load %arg1[%c0_1, %c0_2, %c0_3] : memref<1x8x256xf32, #tpu.memory_space<vmem>>, vector<1x8x32xf32>
    %3 = vector.shape_cast %2 : vector<1x8x32xf32> to vector<8x32xf32>
    %c1 = arith.constant 1 : index
    %c44 = arith.constant 44 : index
    %4 = vector.load %arg9[%c1, %c44] : memref<10x400xf32, #tpu.memory_space<vmem>>, vector<8x32xf32>
    tpu.vector_store %arg9[%c1, %c44], %3 {strides = array<i32>} : memref<10x400xf32, #tpu.memory_space<vmem>>, vector<8x32xf32>,
    %c0_4 = arith.constant 0 : index
    %c0_5 = arith.constant 0 : index
    %c32 = arith.constant 32 : index
    %5 = vector.load %arg1[%c0_4, %c0_5, %c32] : memref<1x8x256xf32, #tpu.memory_space<vmem>>, vector<1x8x32xf32>
    %6 = vector.shape_cast %5 : vector<1x8x32xf32> to vector<8x32xf32>
    %c1_6 = arith.constant 1 : index
    %c84 = arith.constant 84 : index
    %7 = vector.load %arg9[%c1_6, %c84] : memref<10x400xf32, #tpu.memory_space<vmem>>, vector<8x32xf32>
    tpu.vector_store %arg9[%c1_6, %c84], %6 {strides = array<i32>} : memref<10x400xf32, #tpu.memory_space<vmem>>, vector<8x32xf32>,
    %c0_7 = arith.constant 0 : index
    %c0_8 = arith.constant 0 : index
    %c64 = arith.constant 64 : index
    %8 = vector.load %arg1[%c0_7, %c0_8, %c64] : memref<1x8x256xf32, #tpu.memory_space<vmem>>, vector<1x8x32xf32>
    %9 = vector.shape_cast %8 : vector<1x8x32xf32> to vector<8x32xf32>
    %c1_9 = arith.constant 1 : index
    %c124 = arith.constant 124 : index
    %10 = vector.load %arg9[%c1_9, %c124] : memref<10x400xf32, #tpu.memory_space<vmem>>, vector<8x32xf32>
    tpu.vector_store %arg9[%c1_9, %c124], %9 {strides = array<i32>} : memref<10x400xf32, #tpu.memory_space<vmem>>, vector<8x32xf32>,
    %c0_10 = arith.constant 0 : index
    %c0_11 = arith.constant 0 : index
    %c96 = arith.constant 96 : index
    %11 = vector.load %arg1[%c0_10, %c0_11, %c96] : memref<1x8x256xf32, #tpu.memory_space<vmem>>, vector<1x8x32xf32>
    %12 = vector.shape_cast %11 : vector<1x8x32xf32> to vector<8x32xf32>
    %c1_12 = arith.constant 1 : index
    %c164 = arith.constant 164 : index
    %13 = vector.load %arg9[%c1_12, %c164] : memref<10x400xf32, #tpu.memory_space<vmem>>, vector<8x32xf32>
    tpu.vector_store %arg9[%c1_12, %c164], %12 {strides = array<i32>} : memref<10x400xf32, #tpu.memory_space<vmem>>, vector<8x32xf32>,
    %c0_13 = arith.constant 0 : index
    %c0_14 = arith.constant 0 : index
    %c128 = arith.constant 128 : index
    %14 = vector.load %arg1[%c0_13, %c0_14, %c128] : memref<1x8x256xf32, #tpu.memory_space<vmem>>, vector<1x8x32xf32>
    %15 = vector.shape_cast %14 : vector<1x8x32xf32> to vector<8x32xf32>
    %c1_15 = arith.constant 1 : index
    %c204 = arith.constant 204 : index
    %16 = vector.load %arg9[%c1_15, %c204] : memref<10x400xf32, #tpu.memory_space<vmem>>, vector<8x32xf32>
    tpu.vector_store %arg9[%c1_15, %c204], %15 {strides = array<i32>} : memref<10x400xf32, #tpu.memory_space<vmem>>, vector<8x32xf32>,
    %c0_16 = arith.constant 0 : index
    %c0_17 = arith.constant 0 : index
    %c160 = arith.constant 160 : index
    %17 = vector.load %arg1[%c0_16, %c0_17, %c160] : memref<1x8x256xf32, #tpu.memory_space<vmem>>, vector<1x8x32xf32>
    %18 = vector.shape_cast %17 : vector<1x8x32xf32> to vector<8x32xf32>
    %c1_18 = arith.constant 1 : index
    %c244 = arith.constant 244 : index
    %19 = vector.load %arg9[%c1_18, %c244] : memref<10x400xf32, #tpu.memory_space<vmem>>, vector<8x32xf32>
    tpu.vector_store %arg9[%c1_18, %c244], %18 {strides = array<i32>} : memref<10x400xf32, #tpu.memory_space<vmem>>, vector<8x32xf32>,
    %c0_19 = arith.constant 0 : index
    %c0_20 = arith.constant 0 : index
    %c192 = arith.constant 192 : index
    %20 = vector.load %arg1[%c0_19, %c0_20, %c192] : memref<1x8x256xf32, #tpu.memory_space<vmem>>, vector<1x8x32xf32>
    %21 = vector.shape_cast %20 : vector<1x8x32xf32> to vector<8x32xf32>
    %c1_21 = arith.constant 1 : index
    %c284 = arith.constant 284 : index
    %22 = vector.load %arg9[%c1_21, %c284] : memref<10x400xf32, #tpu.memory_space<vmem>>, vector<8x32xf32>
    tpu.vector_store %arg9[%c1_21, %c284], %21 {strides = array<i32>} : memref<10x400xf32, #tpu.memory_space<vmem>>, vector<8x32xf32>,
    %c0_22 = arith.constant 0 : index
    %c0_23 = arith.constant 0 : index
    %c224 = arith.constant 224 : index
    %23 = vector.load %arg1[%c0_22, %c0_23, %c224] : memref<1x8x256xf32, #tpu.memory_space<vmem>>, vector<1x8x32xf32>
    %24 = vector.shape_cast %23 : vector<1x8x32xf32> to vector<8x32xf32>
    %c1_24 = arith.constant 1 : index
    %c324 = arith.constant 324 : index
    %25 = vector.load %arg9[%c1_24, %c324] : memref<10x400xf32, #tpu.memory_space<vmem>>, vector<8x32xf32>
    tpu.vector_store %arg9[%c1_24, %c324], %24 {strides = array<i32>} : memref<10x400xf32, #tpu.memory_space<vmem>>, vector<8x32xf32>,
    %c0_25 = arith.constant 0 : index
    %c0_26 = arith.constant 0 : index
    %26 = vector.load %arg9[%c0_25, %c0_26] : memref<10x400xf32, #tpu.memory_space<vmem>>, vector<8x400xf32>
    %c0_27 = arith.constant 0 : index
    %c0_28 = arith.constant 0 : index
    %c0_29 = arith.constant 0 : index
    %27 = vector.load %arg2[%c0_27, %c0_28, %c0_29] : memref<3x400x512xf32, #tpu.memory_space<vmem>>, vector<1x400x512xf32>
    %28 = vector.shape_cast %27 : vector<1x400x512xf32> to vector<400x512xf32>
    %cst_30 = arith.constant dense<0.000000e+00> : vector<8x512xf32>
    %29 = tpu.matmul %26, %28, %cst_30 {dimension_numbers = #tpu.dot_dimension_numbers<[1], [0], [0], [1], [0, 0, 1, 1], [], []>} : vector<8x400xf32>, vector<400x512xf32>, vector<8x512xf32> -> vector<8x512xf32>
    %c0_31 = arith.constant 0 : index
    %c0_32 = arith.constant 0 : index
    %30 = vector.load %arg10[%c0_31, %c0_32] : memref<8x512xf32, #tpu.memory_space<vmem>>, vector<8x512xf32>
    tpu.vector_store %arg10[%c0_31, %c0_32], %29 {strides = array<i32>} : memref<8x512xf32, #tpu.memory_space<vmem>>, vector<8x512xf32>,
    %c0_33 = arith.constant 0 : index
    %c0_34 = arith.constant 0 : index
    %31 = vector.load %arg10[%c0_33, %c0_34] : memref<8x512xf32, #tpu.memory_space<vmem>>, vector<8x512xf32>
    %c1_35 = arith.constant 1 : index
    %c0_36 = arith.constant 0 : index
    %32 = vector.load %arg9[%c1_35, %c0_36] : memref<10x400xf32, #tpu.memory_space<vmem>>, vector<8x400xf32>
    %c1_37 = arith.constant 1 : index
    %c0_38 = arith.constant 0 : index
    %c0_39 = arith.constant 0 : index
    %33 = vector.load %arg2[%c1_37, %c0_38, %c0_39] : memref<3x400x512xf32, #tpu.memory_space<vmem>>, vector<1x400x512xf32>
    %34 = vector.shape_cast %33 : vector<1x400x512xf32> to vector<400x512xf32>
    %cst_40 = arith.constant dense<0.000000e+00> : vector<8x512xf32>
    %35 = tpu.matmul %32, %34, %cst_40 {dimension_numbers = #tpu.dot_dimension_numbers<[1], [0], [0], [1], [0, 0, 1, 1], [], []>} : vector<8x400xf32>, vector<400x512xf32>, vector<8x512xf32> -> vector<8x512xf32>
    %36 = arith.addf %31, %35 : vector<8x512xf32>
    %c0_41 = arith.constant 0 : index
    %c0_42 = arith.constant 0 : index
    %37 = vector.load %arg10[%c0_41, %c0_42] : memref<8x512xf32, #tpu.memory_space<vmem>>, vector<8x512xf32>
    tpu.vector_store %arg10[%c0_41, %c0_42], %36 {strides = array<i32>} : memref<8x512xf32, #tpu.memory_space<vmem>>, vector<8x512xf32>,
    %c0_43 = arith.constant 0 : index
    %c0_44 = arith.constant 0 : index
    %38 = vector.load %arg10[%c0_43, %c0_44] : memref<8x512xf32, #tpu.memory_space<vmem>>, vector<8x512xf32>
    %c2 = arith.constant 2 : index
    %c0_45 = arith.constant 0 : index
    %39 = vector.load %arg9[%c2, %c0_45] : memref<10x400xf32, #tpu.memory_space<vmem>>, vector<8x400xf32>
    %c2_46 = arith.constant 2 : index
    %c0_47 = arith.constant 0 : index
    %c0_48 = arith.constant 0 : index
    %40 = vector.load %arg2[%c2_46, %c0_47, %c0_48] : memref<3x400x512xf32, #tpu.memory_space<vmem>>, vector<1x400x512xf32>
    %41 = vector.shape_cast %40 : vector<1x400x512xf32> to vector<400x512xf32>
    %cst_49 = arith.constant dense<0.000000e+00> : vector<8x512xf32>
    %42 = tpu.matmul %39, %41, %cst_49 {dimension_numbers = #tpu.dot_dimension_numbers<[1], [0], [0], [1], [0, 0, 1, 1], [], []>} : vector<8x400xf32>, vector<400x512xf32>, vector<8x512xf32> -> vector<8x512xf32>
    %43 = arith.addf %38, %42 : vector<8x512xf32>
    %c0_50 = arith.constant 0 : index
    %c0_51 = arith.constant 0 : index
    %44 = vector.load %arg10[%c0_50, %c0_51] : memref<8x512xf32, #tpu.memory_space<vmem>>, vector<8x512xf32>
    tpu.vector_store %arg10[%c0_50, %c0_51], %43 {strides = array<i32>} : memref<8x512xf32, #tpu.memory_space<vmem>>, vector<8x512xf32>,
    %c0_52 = arith.constant 0 : index
    %c0_53 = arith.constant 0 : index
    %45 = vector.load %arg10[%c0_52, %c0_53] : memref<8x512xf32, #tpu.memory_space<vmem>>, vector<8x512xf32>
    %c0_54 = arith.constant 0 : index
    %c0_55 = arith.constant 0 : index
    %46 = vector.load %arg3[%c0_54, %c0_55] : memref<1x512xf32, #tpu.memory_space<vmem>>, vector<1x512xf32>
    %47 = vector.broadcast %46 : vector<1x512xf32> to vector<8x512xf32>
    %48 = arith.addf %45, %47 : vector<8x512xf32>
    %c0_56 = arith.constant 0 : index
    %c0_57 = arith.constant 0 : index
    %49 = vector.load %arg10[%c0_56, %c0_57] : memref<8x512xf32, #tpu.memory_space<vmem>>, vector<8x512xf32>
    tpu.vector_store %arg10[%c0_56, %c0_57], %48 {strides = array<i32>} : memref<8x512xf32, #tpu.memory_space<vmem>>, vector<8x512xf32>,
    %c0_58 = arith.constant 0 : index
    %c0_59 = arith.constant 0 : index
    %50 = vector.load %arg10[%c0_58, %c0_59] : memref<8x512xf32, #tpu.memory_space<vmem>>, vector<8x512xf32>
    %cst_60 = arith.constant dense<0.000000e+00> : vector<512xf32>
    %51 = vector.multi_reduction <add>, %50, %cst_60 [0] : vector<8x512xf32> to vector<512xf32>
    %52 = vector.shape_cast %51 : vector<512xf32> to vector<1x512xf32>
    %53 = arith.mulf %50, %50 : vector<8x512xf32>
    %cst_61 = arith.constant dense<0.000000e+00> : vector<512xf32>
    %54 = vector.multi_reduction <add>, %53, %cst_61 [0] : vector<8x512xf32> to vector<512xf32>
    %55 = vector.shape_cast %54 : vector<512xf32> to vector<1x512xf32>
    %c0_62 = arith.constant 0 : index
    %c0_63 = arith.constant 0 : index
    %56 = vector.load %arg6[%c0_62, %c0_63] : memref<512x2xf32, #tpu.memory_space<vmem>>, vector<512x2xf32>
    %cst_64 = arith.constant dense<0.000000e+00> : vector<1x2xf32>
    %57 = tpu.matmul %52, %56, %cst_64 {dimension_numbers = #tpu.dot_dimension_numbers<[1], [0], [0], [1], [0, 0, 1, 1], [], []>} : vector<1x512xf32>, vector<512x2xf32>, vector<1x2xf32> -> vector<1x2xf32>
    %c0_65 = arith.constant 0 : index
    %c0_66 = arith.constant 0 : index
    %58 = vector.load %arg6[%c0_65, %c0_66] : memref<512x2xf32, #tpu.memory_space<vmem>>, vector<512x2xf32>
    %cst_67 = arith.constant dense<0.000000e+00> : vector<1x2xf32>
    %59 = tpu.matmul %55, %58, %cst_67 {dimension_numbers = #tpu.dot_dimension_numbers<[1], [0], [0], [1], [0, 0, 1, 1], [], []>} : vector<1x512xf32>, vector<512x2xf32>, vector<1x2xf32> -> vector<1x2xf32>
    %cst_68 = arith.constant 2.048000e+03 : f32
    %60 = vector.broadcast %cst_68 : f32 to vector<1x2xf32>
    %61 = arith.divf %57, %60 : vector<1x2xf32>
    %cst_69 = arith.constant 2.048000e+03 : f32
    %62 = vector.broadcast %cst_69 : f32 to vector<1x2xf32>
    %63 = arith.divf %59, %62 : vector<1x2xf32>
    %64 = arith.mulf %61, %61 : vector<1x2xf32>
    %65 = arith.subf %63, %64 : vector<1x2xf32>
    %cst_70 = arith.constant 9.99999974E-6 : f32
    %66 = vector.broadcast %cst_70 : f32 to vector<1x2xf32>
    %67 = arith.addf %65, %66 : vector<1x2xf32>
    %68 = math.rsqrt %67 : vector<1x2xf32>
    %c0_71 = arith.constant 0 : index
    %c0_72 = arith.constant 0 : index
    %69 = vector.load %arg7[%c0_71, %c0_72] : memref<2x512xf32, #tpu.memory_space<vmem>>, vector<2x512xf32>
    %cst_73 = arith.constant dense<0.000000e+00> : vector<1x512xf32>
    %70 = tpu.matmul %61, %69, %cst_73 {dimension_numbers = #tpu.dot_dimension_numbers<[1], [0], [0], [1], [0, 0, 1, 1], [], []>} : vector<1x2xf32>, vector<2x512xf32>, vector<1x512xf32> -> vector<1x512xf32>
    %c0_74 = arith.constant 0 : index
    %c0_75 = arith.constant 0 : index
    %71 = vector.load %arg7[%c0_74, %c0_75] : memref<2x512xf32, #tpu.memory_space<vmem>>, vector<2x512xf32>
    %cst_76 = arith.constant dense<0.000000e+00> : vector<1x512xf32>
    %72 = tpu.matmul %68, %71, %cst_76 {dimension_numbers = #tpu.dot_dimension_numbers<[1], [0], [0], [1], [0, 0, 1, 1], [], []>} : vector<1x2xf32>, vector<2x512xf32>, vector<1x512xf32> -> vector<1x512xf32>
    %c0_77 = arith.constant 0 : index
    %c0_78 = arith.constant 0 : index
    %73 = vector.load %arg4[%c0_77, %c0_78] : memref<1x512xf32, #tpu.memory_space<vmem>>, vector<1x512xf32>
    %74 = arith.mulf %72, %73 : vector<1x512xf32>
    %c0_79 = arith.constant 0 : index
    %c0_80 = arith.constant 0 : index
    %75 = vector.load %arg5[%c0_79, %c0_80] : memref<1x512xf32, #tpu.memory_space<vmem>>, vector<1x512xf32>
    %76 = arith.mulf %70, %74 : vector<1x512xf32>
    %77 = arith.subf %75, %76 : vector<1x512xf32>
    %78 = vector.broadcast %74 : vector<1x512xf32> to vector<8x512xf32>
    %79 = arith.mulf %50, %78 : vector<8x512xf32>
    %80 = vector.broadcast %77 : vector<1x512xf32> to vector<8x512xf32>
    %81 = arith.addf %79, %80 : vector<8x512xf32>
    %cst_81 = arith.constant 0.000000e+00 : f32
    %82 = vector.broadcast %cst_81 : f32 to vector<8x512xf32>
    %83 = arith.maximumf %81, %82 : vector<8x512xf32>
    %c0_82 = arith.constant 0 : index
    %c0_83 = arith.constant 0 : index
    %c0_84 = arith.constant 0 : index
    %84 = vector.load %arg8[%c0_82, %c0_83, %c0_84] : memref<1x8x512xf32, #tpu.memory_space<vmem>>, vector<1x8x512xf32>
    %85 = vector.shape_cast %84 : vector<1x8x512xf32> to vector<8x512xf32>
    %86 = vector.shape_cast %83 : vector<8x512xf32> to vector<1x8x512xf32>
    tpu.vector_store %arg8[%c0_82, %c0_83, %c0_84], %86 {strides = array<i32>} : memref<1x8x512xf32, #tpu.memory_space<vmem>>, vector<1x8x512xf32>,
    return
  }
  func.func @transform_0(%arg0: i32) -> (i32, i32, i32) {
    %c0_i32 = arith.constant 0 : i32
    %c0_i32_0 = arith.constant 0 : i32
    %c0_i32_1 = arith.constant 0 : i32
    return %arg0, %c0_i32, %c0_i32_0 : i32, i32, i32
  }
  func.func @transform_1(%arg0: i32) -> (i32, i32, i32) {
    %c0_i32 = arith.constant 0 : i32
    %c0_i32_0 = arith.constant 0 : i32
    %c0_i32_1 = arith.constant 0 : i32
    %c0_i32_2 = arith.constant 0 : i32
    return %c0_i32, %c0_i32_0, %c0_i32_1 : i32, i32, i32
  }
  func.func @transform_2(%arg0: i32) -> (i32, i32) {
    %c0_i32 = arith.constant 0 : i32
    %c0_i32_0 = arith.constant 0 : i32
    %c0_i32_1 = arith.constant 0 : i32
    return %c0_i32, %c0_i32_0 : i32, i32
  }
  func.func @transform_3(%arg0: i32) -> (i32, i32) {
    %c0_i32 = arith.constant 0 : i32
    %c0_i32_0 = arith.constant 0 : i32
    %c0_i32_1 = arith.constant 0 : i32
    return %c0_i32, %c0_i32_0 : i32, i32
  }
  func.func @transform_4(%arg0: i32) -> (i32, i32) {
    %c0_i32 = arith.constant 0 : i32
    %c0_i32_0 = arith.constant 0 : i32
    %c0_i32_1 = arith.constant 0 : i32
    return %c0_i32, %c0_i32_0 : i32, i32
  }
  func.func @transform_5(%arg0: i32) -> (i32, i32) {
    %c0_i32 = arith.constant 0 : i32
    %c0_i32_0 = arith.constant 0 : i32
    %c0_i32_1 = arith.constant 0 : i32
    return %c0_i32, %c0_i32_0 : i32, i32
  }
  func.func @transform_6(%arg0: i32) -> (i32, i32) {
    %c0_i32 = arith.constant 0 : i32
    %c0_i32_0 = arith.constant 0 : i32
    %c0_i32_1 = arith.constant 0 : i32
    return %c0_i32, %c0_i32_0 : i32, i32
  }
  func.func @transform_7(%arg0: i32) -> (i32, i32, i32) {
    %c0_i32 = arith.constant 0 : i32
    %c0_i32_0 = arith.constant 0 : i32
    %c0_i32_1 = arith.constant 0 : i32
    return %arg0, %c0_i32, %c0_i32_0 : i32, i32, i32
  }
}

</mosaic_0001>

<bundles_post_ra>
// kernel: tpu_custom_call.1
= control target key start
LH: loop header
LB: loop body
LE: loop exit
PB: predicated region body
PF: predicated region fallthrough
CT: control target
= control target key end

     0   :  { %s4456_s0 = inlined_call_operand.hbm [shape: f32[2,8,256], index: 0, kind: input, shape index: {}]   ;;  %s4457_s1 = inlined_call_operand.hbm [shape: f32[3,400,512], index: 1, kind: input, shape index: {}]   ;;  %s4458_s2 = inlined_call_operand.hbm [shape: f32[1,512], index: 2, kind: input, shape index: {}]   ;;  %s4459_s3 = inlined_call_operand.hbm [shape: f32[1,512], index: 3, kind: input, shape index: {}]   ;;  %s4460_s4 = inlined_call_operand.hbm [shape: f32[1,512], index: 4, kind: input, shape index: {}]   ;;  %s4461_s5 = inlined_call_operand.vmem [shape: f32[512,2], index: 5, kind: input, shape index: {}]   ;;  %s4462_s6 = inlined_call_operand.hbm [shape: f32[2,512], index: 6, kind: input, shape index: {}]   ;;  %s4463_s7 = inlined_call_operand.hbm [shape: f32[2,8,512], index: 7, kind: output, shape index: {}]  }
   0x1   :  { %4499 = sst [smem:[#allocation50_spill]] %s4457_s1 }
   0x2   :  { %4500 = sst [smem:[#allocation51_spill]] %s4458_s2 }
   0x3   :  { %12 = vsyncpa [#allocation5], 0 }
   0x4   :  { %14 = vsyncpa [#allocation5 + $0x1], 0 }
   0x5   :  { %15 = vsyncpa [#allocation8], 0 }
   0x6   :  { %16 = vsyncpa [#allocation11], 0 }
   0x7   :  { %17 = vsyncpa [#allocation14], 0 }
   0x8   :  { %18 = vsyncpa [#allocation6], 0 }
   0x9   :  { %20 = vsyncpa [#allocation6 + $0x1], 0  ;;  %s3615_s24 = smov 0   ;;  %s3617_s25 = smov 0  }
   0xa   :  { %s3619_s26 = smov 0   ;;  %s3621_s27 = smov 0  }
   0xb LB: > { %s3555_s28 = smov [#allocation7]   ;;  %s3636_s30 = sadd.s32 4294967295, %s3553_s27   ;;  %s3553_s27 = sphi %s3621_s27, %s4584_s27   ;;  %s3549_s26 = sphi %s3619_s26, %s4583_s26   ;;  %s3545_s25 = sphi %s3617_s25, %s4582_s25   ;;  %s3541_s24 = sphi %s3615_s24, %s4581_s24  }
   0xc   : > { %s221_s29 = sshll.u32 %s3555_s28, 4  ;;  %p3023_p0 = scmp.ge.s32.totalorder %s3553_s27, 1  ;;  %s222_s29 = int_to_ptr.vmem [resolvable:$true] %s221_s29 }
   0xd   : > { %p4464_p1 = scmp.eq.s32.totalorder %s3636_s30, 0  ;;  %p209_p2 = scmp.lt.s32.totalorder %s3553_s27, 3 }
   0xe   : > { %s3556_s9 = smov [#allocation10]   ;;  %s3557_s12 = smov [#allocation9]  }
   0xf   : > { %p3641_p3 = pnand %p3023_p0, %p209_p2  ;;  %s246_s10 = sshll.u32 %s3556_s9, 4  ;;  %s247_s10 = int_to_ptr.vmem [resolvable:$true] %s246_s10 }
  0x10   : > { %s235_s13 = sshll.u32 %s3557_s12, 4  ;;  %s3330_s15 = scalar_lea.vmem %s222_s29, 76800  ;;  %s3654_s13 = int_to_ptr.vmem [resolvable:$true] %s235_s13 }
  0x11   : > { %s4501_s8 = scalar_select %p3641_p3, 1, 0 }
  0x12   : > { %p3230_p5 = pneg %p3641_p3  ;;  %p3331_p8 = scmp.ne.s32.totalorder %s222_s29, %s3330_s15 }
  0x13   : > { %p3338_p11 = scmp.lt.s32.totalorder %s222_s29, %s222_s29  ;;  %p3339_p12 = scmp.lt.s32.totalorder %s3330_s15, %s3330_s15 }
  0x14   : > { %p3650_p6 = pnand %p3230_p5, %p4464_p1 }
  0x15   : > { %p3340_p13 = por %p3339_p12, %p3338_p11 }
  0x16   : > { %p3658_p7 = pneg %p3650_p6 }
  0x18   : > { %p3333_p9 = pnand %p3331_p8, %p3658_p7 }
  0x1a   : > { %p3334_p10 = pneg %p3333_p9 }
  0x1c   : > { %p3341_p0 = pnand %p3340_p13, %p3334_p10 }
  0x1e   : > { %3344 = shalt.err (!%p3341_p0)
}
  0x1f   : > { %s3558_s16 = smov 512   ;;  %s3559_s17 = smov 32  }
  0x20   : > { %s4504_s1 = sld [smem:[#allocation50_spill]]  ;;  %s3356_s20 = scalar_lea.vmem %s247_s10, 64 }
  0x21   : > { %p3357_p2 = scmp.ne.s32.totalorder %s247_s10, %s3356_s20  ;;  %p3364_p9 = scmp.lt.s32.totalorder %s247_s10, %s247_s10 }
  0x22   : > { %p3365_p4 = scmp.lt.s32.totalorder %s3356_s20, %s3356_s20 }
  0x23   : > { %p3359_p5 = pnand %p3357_p2, %p3658_p7 }
  0x24   : > { %p3366_p1 = por %p3365_p4, %p3364_p9 }
  0x25   : > { %p3360_p8 = pneg %p3359_p5 }
  0x26   : > { %3233 = dma.hbm_to_vmem [thread:$0]  (!%p3650_p6), %s4504_s1, 76800, %s222_s29, [#allocation8], %s3558_s16, %s3558_s16, %s3559_s17  }
  0x27   : > { %p3367_p11 = pnand %p3366_p1, %p3360_p8 }
  0x29   : > { %3370 = shalt.err (!%p3367_p11)
}
  0x2a   : > { %3239 = dma.hbm_to_vmem [thread:$0]  (!%p3650_p6), %s4459_s3, 64, %s247_s10, [#allocation11]  }
  0x2b   : > { %s3382_s23 = scalar_lea.vmem %s3654_s13, 64  ;;  %p3390_p0 = scmp.lt.s32.totalorder %s3654_s13, %s3654_s13 }
  0x2c   : > { %p3383_p10 = scmp.ne.s32.totalorder %s3654_s13, %s3382_s23  ;;  %p3391_p4 = scmp.lt.s32.totalorder %s3382_s23, %s3382_s23 }
  0x2e   : > { %p3385_p12 = pnand %p3383_p10, %p3658_p7  ;;  %p3392_p1 = por %p3391_p4, %p3390_p0 }
  0x30   : > { %p3386_p13 = pneg %p3385_p12 }
  0x32   : > { %p3393_p2 = pnand %p3392_p1, %p3386_p13 }
  0x34   : > { %3396 = shalt.err (!%p3393_p2)
}
  0x35   : > { %s4505_s2 = sld [smem:[#allocation51_spill]]  ;;  %s3560_s9 = smov [#allocation12]  }
  0x36   : > { %s257_s10 = sshll.u32 %s3560_s9, 4  ;;  %s3561_s12 = smov [#allocation13]   ;;  %s258_s10 = int_to_ptr.vmem [resolvable:$true] %s257_s10 }
  0x37   : > { %s271_s15 = sshll.u32 %s3561_s12, 4  ;;  %s3408_s16 = scalar_lea.vmem %s258_s10, 64  ;;  %s272_s15 = int_to_ptr.vmem [resolvable:$true] %s271_s15 }
  0x38   : > { %p3409_p5 = scmp.ne.s32.totalorder %s258_s10, %s3408_s16  ;;  %p3416_p11 = scmp.lt.s32.totalorder %s258_s10, %s258_s10 }
  0x39   : > { %p3417_p10 = scmp.lt.s32.totalorder %s3408_s16, %s3408_s16 }
  0x3a   : > { %p3411_p8 = pnand %p3409_p5, %p3658_p7 }
  0x3b   : > { %3236 = dma.hbm_to_vmem [thread:$0]  (!%p3650_p6), %s4505_s2, 64, %s3654_s13, [#allocation8]  }
  0x3c   : > { %p3412_p9 = pneg %p3411_p8  ;;  %p3418_p12 = por %p3417_p10, %p3416_p11 }
  0x3e   : > { %p3419_p13 = pnand %p3418_p12, %p3412_p9 }
  0x40   : > { %3422 = shalt.err (!%p3419_p13)
}
  0x41   : > { %3242 = dma.hbm_to_vmem [thread:$0]  (!%p3650_p6), %s4460_s4, 64, %s258_s10, [#allocation11]  }
  0x42   : > { %s3434_s13 = scalar_lea.vmem %s272_s15, 128  ;;  %p3442_p2 = scmp.lt.s32.totalorder %s272_s15, %s272_s15 }
  0x43   : > { %p3435_p0 = scmp.ne.s32.totalorder %s272_s15, %s3434_s13  ;;  %p3443_p5 = scmp.lt.s32.totalorder %s3434_s13, %s3434_s13 }
  0x45   : > { %p3437_p4 = pnand %p3435_p0, %p3658_p7  ;;  %p3444_p8 = por %p3443_p5, %p3442_p2 }
  0x47   : > { %p3438_p1 = pneg %p3437_p4 }
  0x49   : > { %p3445_p3 = pnand %p3444_p8, %p3438_p1 }
  0x4b   : > { %3448 = shalt.err (!%p3445_p3)
}
  0x4c   : > { %3245 = dma.hbm_to_vmem [thread:$0]  (!%p3650_p6), %s4462_s6, 128, %s272_s15, [#allocation14]  }
  0x4d   : > { %s3022_s14 = sadd.s32 4294967294, %s3553_s27   ;;  %s3704_s11 = sadd.s32 1, %s3553_s27  }
  0x4e   : > { %s33_s21 = sadd.s32 1, %s3549_s26  ;;  %s30_s22 = ssub.s32 %s3553_s27, %s3704_s11 }
  0x4f   : > { %p40_p3 = scmp.ne.s32.totalorder %s3549_s26, %s3545_s25  ;;  %p31_p7 = scmp.eq.s32.totalorder %s30_s22, 0 }
  0x50   : > { %p41_p9 = scmp.eq.s32.totalorder %s3553_s27, 0  ;;  %p46_p11 = scmp.ne.s32.totalorder %s3545_s25, %s3541_s24 }
  0x51   : > { %p196_p10 = scmp.eq.s32.totalorder %s3636_s30, 1  ;;  %p4506_p13 = scmp.eq.s32.totalorder %s3636_s30, 0 }
  0x52   : > { %s3716_s23 = scalar_select %p31_p7, %s3549_s26, %s33_s21  }
  0x53   : > { %p42_p12 = por %p41_p9, %p40_p3  ;;  %p3720_p0 = por %p4506_p13, %p46_p11 }
  0x54   : > { %p3724_p6 = por %p196_p10, %p40_p3  ;;  %p202_p4 = scmp.eq.s32.totalorder %s3022_s14, 1 }
  0x55   : > { %s4507_s28 = scalar_select %p3720_p0, 1, 0 }
  0x56   : > { %s4508_s29 = scalar_select %p3724_p6, 1, 0 }
  0x57   : > { %p3259_p1 = scmp.lt.s32.totalorder %s3553_s27, 2  ;;  %s282_s9 = sand.u32 1, %s3549_s26  }
  0x58   : > { %p3730_p2 = por %p202_p4, %p46_p11  ;;  %s3030_s12 = sshll.u32 %s282_s9, 4 }
  0x59   : > { %s3064_s15 = sshll.u32 %s3553_s27, 8  ;;  %s286_s13 = scalar_lea.vmem [#allocation4], %s3030_s12 }
  0x5a   : > { %s4509_s10 = scalar_select %p3730_p2, 1, 0 }
  0x5b   : > { %s3738_s18 = scalar_lea.hbm %s4456_s0, %s3064_s15  ;;  %s294_s19 = sshll.u32 %s286_s13, 4  ;;  %s295_s19 = int_to_ptr.vmem [resolvable:$true] %s294_s19 }
  0x5c   : > { %p3740_p5 = pnand %p3259_p1, %p42_p12  ;;  %s283_s14 = scalar_lea.sflag [#allocation5], %s282_s9 }
  0x5d   : > { %s3449_s21 = scalar_lea.hbm %s3738_s18, 256  ;;  %s3454_s16 = scalar_lea.hbm %s4456_s0, 512 }
  0x5e   : > { %p3450_p8 = scmp.ne.s32.totalorder %s3738_s18, %s3449_s21  ;;  %p3451_p3 = pneg %p3740_p5 }
  0x5f   : > { %p3455_p11 = scmp.lt.s32.totalorder %s3738_s18, %s4456_s0  ;;  %p3456_p10 = scmp.lt.s32.totalorder %s3454_s16, %s3449_s21 }
  0x60   : > { %p3452_p7 = pnand %p3451_p3, %p3450_p8 }
  0x61   : > { %p3457_p12 = por %p3456_p10, %p3455_p11 }
  0x62   : > { %p3453_p9 = pneg %p3452_p7 }
  0x64   : > { %p3458_p13 = pnand %p3457_p12, %p3453_p9 }
  0x66   : > { %3461 = shalt.err (!%p3458_p13)
}
  0x67   : > { %s3462_s13 = scalar_lea.vmem %s295_s19, 256  ;;  %s3562_s9 = smov [#allocation4]  }
  0x68   : > { %p3463_p4 = scmp.ne.s32.totalorder %s295_s19, %s3462_s13  ;;  %s3467_s1 = sshll.u32 %s3562_s9, 4  ;;  %s3468_s1 = int_to_ptr.vmem [resolvable:$false] %s3467_s1 }
  0x69   : > { %s3469_s2 = scalar_lea.vmem %s3468_s1, 512  ;;  %p3470_p8 = scmp.lt.s32.totalorder %s295_s19, %s3468_s1 }
  0x6a   : > { %p3465_p1 = pnand %p3463_p4, %p3451_p3  ;;  %p3471_p7 = scmp.lt.s32.totalorder %s3469_s2, %s3462_s13 }
  0x6c   : > { %p3466_p2 = pneg %p3465_p1  ;;  %p3472_p6 = por %p3471_p7, %p3470_p8 }
  0x6e   : > { %p3473_p0 = pnand %p3472_p6, %p3466_p2 }
  0x70   : > { %3476 = shalt.err (!%p3473_p0)
}
  0x71   : > { %3249 = dma.hbm_to_vmem [thread:$0]  (!%p3740_p5), %s3738_s18, 256, %s295_s19, %s283_s14  }
  0x72   : > { %p4511_p9 = scmp.ne.s32.totalorder %s4501_s8, 0 }
  0x74   : > { %303 = sbr.rel (%p4511_p9) target bundleno = 1236 (0x4d4), region = 48 }
  0x79   : > { %s3761_s21 = sand.u32 1, %s3545_s25   ;;  %p4512_p3 = scmp.ne.s32.totalorder %s4507_s28, 0 }
  0x7a   : > { %s3034_s22 = sshll.u32 %s3761_s21, 4  ;;  %s306_s15 = scalar_lea.sflag [#allocation5], %s3761_s21 }
  0x7b   : > { %s309_s1 = scalar_lea.vmem [#allocation4], %s3034_s22 }
  0x7c   : > { %3520 = dma.done.wait (%p4512_p3), %s306_s15, 256  }
  0x7d   : > { %3522 = vsyncadd (%p4512_p3), %s306_s15, 4294967040  ;;  %p4513_p0 = scmp.eq.s32.totalorder %s3636_s30, 0 }
  0x7f   : > { %3524 = dma.done.wait (%p4513_p0), [#allocation8], 76864   ;;  %p4514_p6 = pmov %p4513_p0 }
  0x80   : > { %p4515_p2 = pmov %p4513_p0 }
  0x81   : > { %3526 = vsyncadd (%p4514_p6), [#allocation8], 4294890432 }
  0x82   : > { %3528 = dma.done.wait (%p4515_p2), [#allocation11], 128   ;;  %p4516_p5 = pmov %p4513_p0 }
  0x83   : > { %p4517_p11 = pmov %p4513_p0 }
  0x84   : > { %3530 = vsyncadd (%p4516_p5), [#allocation11], 4294967168 }
  0x85   : > { %3532 = dma.done.wait (%p4517_p11), [#allocation14], 128   ;;  %p4518_p10 = pmov %p4513_p0 }
  0x86   : > { %v4468_v0 = vmov 0.0   ;;  %vm363_vm0 = vcmask 130048   ;;  %v424_v1 = vld [vmem:[%s309_s1 + $0x8] sm:$0xff]  ;;  %v390_v2 = vld [vmem:[%s309_s1] sm:$0xff]  ;;  %s3564_s2 = smov 84   ;;  %s3565_s8 = smov 100  }
  0x87   : > { %3534 = vsyncadd (%p4518_p10), [#allocation14], 4294967168  ;;  %362 = vst [vmem:[#allocation2 + $0x10] sm:$0xff] %v4468_v0  ;;  %v523_v3 = vld [vmem:[#allocation7 + $0x1e8] sm:$0xff]  ;;  %v426_v4 = vrot.slane %v424_v1, 7  ;;  %v522_v5 = vld [vmem:[#allocation7 + $0x1e0] sm:$0xff] }
  0x88   : > { %367 = vst [vmem:[#allocation2 + $0x30] sm:$0x3] %v4468_v0  ;;  %360 = vst [vmem:[#allocation2] sm:$0xff] %v4468_v0  ;;  %665 = vmatprep.subr.mxu0 %v523_v3  ;;  %v519_v6 = vld [vmem:[#allocation7 + $0x1c8] sm:$0xff]  ;;  %v518_v7 = vld [vmem:[#allocation7 + $0x1c0] sm:$0xff]  ;;  %v392_v8 = vrot.slane %v390_v2, 7 }
  0x89   : > { %361 = vst [vmem:[#allocation2 + $0x8] sm:$0xff] %v4468_v0  ;;  %365 = vst [vmem:[#allocation2 + $0x20] sm:$0x3] %v4468_v0  ;;  %666 = vmatpush1.msra.mxu0 %v522_v5  ;;  %427 = vrot.lane.b32.xlu0 %v426_v4, %s3564_s2  ;;  %v515_v9 = vld [vmem:[#allocation7 + $0x1a8] sm:$0xff]  ;;  %v514_v10 = vld [vmem:[#allocation7 + $0x1a0] sm:$0xff]  ;;  %s3566_s28 = smov 92  }
  0x8a   : > { %366 = vst [vmem:[#allocation2 + $0x28] sm:$0x3] %v4468_v0  ;;  %364 = vst.msk [vmem:[#allocation2 + $0x18] sm:$0xff] %vm363_vm0, %v4468_v0  ;;  %451 = vrot.lane.b32.xlu1 %v426_v4, %s3565_s8  ;;  %667 = vmatprep.subr.mxu0 %v519_v6  ;;  %v511_v11 = vld [vmem:[#allocation7 + $0x188] sm:$0xff]  ;;  %s3567_s18 = smov 60   ;;  %v510_v12 = vld [vmem:[#allocation7 + $0x180] sm:$0xff] }
  0x8b   : > { %668 = vmatpush1.msra.mxu0 %v518_v7  ;;  %v651_v13 = vld [vmem:[#allocation7 + $0x5e8] sm:$0xff]  ;;  %v650_v14 = vld [vmem:[#allocation7 + $0x5e0] sm:$0xff]  ;;  %s3568_s19 = smov 68   ;;  %s3569_s20 = smov 44   ;;  %vm368_vm1 = vcmask 123904   ;;  %vm432_vm2 = vcmask 162817  }
  0x8c   : > { %669 = vmatprep.subr.mxu0 %v515_v9  ;;  %736 = vmatprep.subr.mxu1 %v651_v13  ;;  %v647_v15 = vld [vmem:[#allocation7 + $0x5c8] sm:$0xff]  ;;  %v646_v17 = vld [vmem:[#allocation7 + $0x5c0] sm:$0xff]  ;;  %s3570_s14 = smov 76   ;;  %s3571_s16 = smov 52   ;;  %369 = vst.msk [vmem:[#allocation2 + $0x38] sm:$0x3] %vm368_vm1, %v4468_v0 }
  0x8d   : > { %441 = vrot.lane.b32.xlu0 %v426_v4, %s3566_s28  ;;  %670 = vmatpush1.msra.mxu0 %v514_v10  ;;  %v507_v16 = vld [vmem:[#allocation7 + $0x168] sm:$0xff]  ;;  %v506_v18 = vld [vmem:[#allocation7 + $0x160] sm:$0xff]  ;;  %vm436_vm3 = vcmask 155648   ;;  %vm444_vm4 = vcmask 490721   ;;  %vm446_vm5 = vcmask 483552   ;;  %vm398_vm6 = vcmask 228353  }
  0x8e   : > { %393 = vrot.lane.b32.xlu1 %v392_v8, %s3567_s18  ;;  %671 = vmatprep.subr.mxu0 %v511_v11  ;;  %v643_v19 = vld [vmem:[#allocation7 + $0x5a8] sm:$0xff]  ;;  %v642_v21 = vld [vmem:[#allocation7 + $0x5a0] sm:$0xff]  ;;  %vm402_vm7 = vcmask 221184   ;;  %vm454_vm8 = vcmask 818721   ;;  %vm456_vm9 = vcmask 811552   ;;  %vm410_vm10 = vcmask 556321  }
  0x8f   : > { %737 = vmatpush1.msra.mxu1 %v650_v14  ;;  %672 = vmatpush1.msra.mxu0 %v510_v12  ;;  %v503_v20 = vld [vmem:[#allocation7 + $0x148] sm:$0xff]  ;;  %v502_v22 = vld [vmem:[#allocation7 + $0x140] sm:$0xff]  ;;  %vm412_vm11 = vcmask 549152   ;;  %vm376_vm12 = vcmask 621921   ;;  %vm378_vm13 = vcmask 614752   ;;  %vm420_vm14 = vcmask 884321  }
  0x90   : > { %738 = vmatprep.subr.mxu1 %v647_v15  ;;  %673 = vmatprep.subr.mxu0 %v507_v16  ;;  %v639_v23 = vld [vmem:[#allocation7 + $0x588] sm:$0xff]  ;;  %v638_v25 = vld [vmem:[#allocation7 + $0x580] sm:$0xff]  ;;  %vm422_vm15 = vcmask 877152   ;;  %vm386_vm1 = vcmask 949921   ;;  %v4210_v0 = vld [vmem:[%s4461_s5 + $0x190] sm:$0xff]  ;;  %s3040_s8 = sshll.u32 %s3761_s21, 5 }
  0x91   : > { %407 = vrot.lane.b32.xlu0 %v392_v8, %s3568_s19  ;;  %739 = vmatpush1.msra.mxu1 %v646_v17  ;;  %v499_v24 = vld [vmem:[#allocation7 + $0x128] sm:$0xff]  ;;  %v498_v26 = vld [vmem:[#allocation7 + $0x120] sm:$0xff]  ;;  %4542 = vst [vmem:[#allocation44_spill] sm:$0xff] %v4210_v0  ;;  %s3065_s28 = sshll.u32 %s3636_s30, 9  ;;  %s359_s18 = scalar_lea.vmem [#allocation15], %s3040_s8 }
  0x92   : > { %373 = vrot.lane.b32.xlu1 %v392_v8, %s3569_s20  ;;  %674 = vmatpush1.msra.mxu0 %v506_v18  ;;  %v635_v27 = vld [vmem:[#allocation7 + $0x568] sm:$0xff]  ;;  %v634_v29 = vld [vmem:[#allocation7 + $0x560] sm:$0xff]  ;;  %s2904_s19 = sshll.u32 %s359_s18, 4  ;;  %s2890_s30 = scalar_lea.sflag [#allocation6], %s3761_s21  ;;  %s4415_s19 = int_to_ptr.vmem [resolvable:$true] %s2904_s19 }
  0x93   : > { %740 = vmatprep.subr.mxu1 %v643_v19  ;;  %675 = vmatprep.subr.mxu0 %v503_v20  ;;  %v495_v28 = vld [vmem:[#allocation7 + $0x108] sm:$0xff]  ;;  %v494_v30 = vld [vmem:[#allocation7 + $0x100] sm:$0xff]  ;;  %v525_v20 = vld [vmem:[#allocation7 + $0x1f8] sm:$0xff]  ;;  %s3477_s17 = scalar_lea.vmem %s4415_s19, 512  ;;  %p4578_p13 = scmp.ne.s32.totalorder %s4508_s29, 0 }
  0x94   : > { %741 = vmatpush1.msra.mxu1 %v642_v21  ;;  %676 = vmatpush1.msra.mxu0 %v502_v22  ;;  %v631_v31 = vld [vmem:[#allocation7 + $0x548] sm:$0xff]  ;;  %v630_v33 = vld [vmem:[#allocation7 + $0x540] sm:$0xff]  ;;  %v3789_v22 = vld [vmem:[#allocation2 + $0x18] sm:$0xff]  ;;  %p3478_p12 = scmp.ne.s32.totalorder %s4415_s19, %s3477_s17  ;;  %s3574_s12 = smov [#allocation15]  }
  0x95   : > { %417 = vrot.lane.b32.xlu0 %v426_v4, %s3570_s14  ;;  %742 = vmatprep.subr.mxu1 %v639_v23  ;;  %v491_v32 = vld [vmem:[#allocation7 + $0xe8] sm:$0xff]  ;;  %v490_v34 = vld [vmem:[#allocation7 + $0xe0] sm:$0xff]  ;;  %s3481_s13 = sshll.u32 %s3574_s12, 4  ;;  %s3482_s13 = int_to_ptr.vmem [resolvable:$false] %s3481_s13 }
  0x96   : > { %383 = vrot.lane.b32.xlu1 %v392_v8, %s3571_s16  ;;  %677 = vmatprep.subr.mxu0 %v499_v24  ;;  %v627_v35 = vld [vmem:[#allocation7 + $0x528] sm:$0xff]  ;;  %v626_v37 = vld [vmem:[#allocation7 + $0x520] sm:$0xff]  ;;  %s4413_s16 = scalar_lea.hbm %s4463_s7, %s3065_s28  ;;  %p3479_p4 = pnand %p3478_p12, %p4578_p13 }
  0x97   : > { %743 = vmatpush1.msra.mxu1 %v638_v25  ;;  %678 = vmatpush1.msra.mxu0 %v498_v26  ;;  %v487_v36 = vld [vmem:[#allocation7 + $0xc8] sm:$0xff]  ;;  %v486_v38 = vld [vmem:[#allocation7 + $0xc0] sm:$0xff]  ;;  %s3483_s9 = scalar_lea.vmem %s3482_s13, 1024  ;;  %p3484_p8 = scmp.lt.s32.totalorder %s4415_s19, %s3482_s13 }
  0x98   : > { %744 = vmatprep.subr.mxu1 %v635_v27  ;;  %679 = vmatprep.subr.mxu0 %v495_v28  ;;  %v623_v39 = vld [vmem:[#allocation7 + $0x508] sm:$0xff]  ;;  %v622_v41 = vld [vmem:[#allocation7 + $0x500] sm:$0xff]  ;;  %p3480_p1 = pneg %p3479_p4  ;;  %p3485_p7 = scmp.lt.s32.totalorder %s3483_s9, %s3477_s17 }
  0x99   : > { %745 = vmatpush1.msra.mxu1 %v634_v29  ;;  %680 = vmatpush1.msra.mxu0 %v494_v30  ;;  %v483_v40 = vld [vmem:[#allocation7 + $0xa8] sm:$0xff]  ;;  %v482_v42 = vld [vmem:[#allocation7 + $0xa0] sm:$0xff] }
  0x9a   : > { %746 = vmatprep.subr.mxu1 %v631_v31  ;;  %681 = vmatprep.subr.mxu0 %v491_v32  ;;  %v619_v43 = vld [vmem:[#allocation7 + $0x4e8] sm:$0xff]  ;;  %v618_v45 = vld [vmem:[#allocation7 + $0x4e0] sm:$0xff]  ;;  %p3486_p9 = por %p3485_p7, %p3484_p8 }
  0x9b   : > { %747 = vmatpush1.msra.mxu1 %v630_v33  ;;  %682 = vmatpush1.msra.mxu0 %v490_v34  ;;  %v479_v44 = vld [vmem:[#allocation7 + $0x88] sm:$0xff]  ;;  %v478_v46 = vld [vmem:[#allocation7 + $0x80] sm:$0xff] }
  0x9c   : > { %748 = vmatprep.subr.mxu1 %v627_v35  ;;  %683 = vmatprep.subr.mxu0 %v487_v36  ;;  %v615_v47 = vld [vmem:[#allocation7 + $0x4c8] sm:$0xff]  ;;  %v614_v49 = vld [vmem:[#allocation7 + $0x4c0] sm:$0xff]  ;;  %p3487_p3 = pnand %p3486_p9, %p3480_p1 }
  0x9d   : > { %749 = vmatpush1.msra.mxu1 %v626_v37  ;;  %684 = vmatpush1.msra.mxu0 %v486_v38  ;;  %v475_v48 = vld [vmem:[#allocation7 + $0x68] sm:$0xff]  ;;  %v474_v50 = vld [vmem:[#allocation7 + $0x60] sm:$0xff] }
  0x9e   : > { %750 = vmatprep.subr.mxu1 %v623_v39  ;;  %685 = vmatprep.subr.mxu0 %v483_v40  ;;  %v611_v51 = vld [vmem:[#allocation7 + $0x4a8] sm:$0xff]  ;;  %v610_v53 = vld [vmem:[#allocation7 + $0x4a0] sm:$0xff] }
  0x9f   : > { %751 = vmatpush1.msra.mxu1 %v622_v41  ;;  %686 = vmatpush1.msra.mxu0 %v482_v42  ;;  %v471_v52 = vld [vmem:[#allocation7 + $0x48] sm:$0xff]  ;;  %v470_v54 = vld [vmem:[#allocation7 + $0x40] sm:$0xff] }
  0xa0   : > { %752 = vmatprep.subr.mxu1 %v619_v43  ;;  %687 = vmatprep.subr.mxu0 %v479_v44  ;;  %v607_v55 = vld [vmem:[#allocation7 + $0x488] sm:$0xff]  ;;  %v606_v57 = vld [vmem:[#allocation7 + $0x480] sm:$0xff]  ;;  %v653_v44 = vld [vmem:[#allocation7 + $0x5f8] sm:$0xff] }
  0xa1   : > { %753 = vmatpush1.msra.mxu1 %v618_v45  ;;  %688 = vmatpush1.msra.mxu0 %v478_v46  ;;  %v467_v56 = vld [vmem:[#allocation7 + $0x28] sm:$0xff]  ;;  %v466_v58 = vld [vmem:[#allocation7 + $0x20] sm:$0xff] }
  0xa2   : > { %754 = vmatprep.subr.mxu1 %v615_v47  ;;  %689 = vmatprep.subr.mxu0 %v475_v48  ;;  %v603_v59 = vld [vmem:[#allocation7 + $0x468] sm:$0xff]  ;;  %v602_v61 = vld [vmem:[#allocation7 + $0x460] sm:$0xff] }
  0xa3   : > { %755 = vmatpush1.msra.mxu1 %v614_v49  ;;  %690 = vmatpush1.msra.mxu0 %v474_v50  ;;  %v463_v60 = vld [vmem:[#allocation7 + $0x8] sm:$0xff]  ;;  %v462_v62 = vld [vmem:[#allocation7] sm:$0xff] }
  0xa4   : > { %756 = vmatprep.subr.mxu1 %v611_v51  ;;  %691 = vmatprep.subr.mxu0 %v471_v52  ;;  %v599_v63 = vld [vmem:[#allocation7 + $0x448] sm:$0xff]  ;;  %v598_v2 = vld [vmem:[#allocation7 + $0x440] sm:$0xff] }
  0xa5   : > { %757 = vmatpush1.msra.mxu1 %v610_v53  ;;  %692 = vmatpush1.msra.mxu0 %v470_v54  ;;  %v587_v1 = vld [vmem:[#allocation7 + $0x3e8] sm:$0xff]  ;;  %v586_v3 = vld [vmem:[#allocation7 + $0x3e0] sm:$0xff]  ;;  %v524_v53 = vld [vmem:[#allocation7 + $0x1f0] sm:$0xff] }
  0xa6   : > { %758 = vmatprep.subr.mxu1 %v607_v55  ;;  %693 = vmatprep.subr.mxu0 %v467_v56  ;;  %v595_v4 = vld [vmem:[#allocation7 + $0x428] sm:$0xff]  ;;  %v594_v6 = vld [vmem:[#allocation7 + $0x420] sm:$0xff]  ;;  %v521_v55 = vld [vmem:[#allocation7 + $0x1d8] sm:$0xff] }
  0xa7   : > { %759 = vmatpush1.msra.mxu1 %v606_v57  ;;  %694 = vmatpush1.msra.mxu0 %v466_v58  ;;  %v583_v5 = vld [vmem:[#allocation7 + $0x3c8] sm:$0xff]  ;;  %v582_v7 = vld [vmem:[#allocation7 + $0x3c0] sm:$0xff]  ;;  %v520_v56 = vld [vmem:[#allocation7 + $0x1d0] sm:$0xff] }
  0xa8   : > { %760 = vmatprep.subr.mxu1 %v603_v59  ;;  %695 = vmatprep.subr.mxu0 %v463_v60  ;;  %v591_v8 = vld [vmem:[#allocation7 + $0x408] sm:$0xff]  ;;  %v590_v10 = vld [vmem:[#allocation7 + $0x400] sm:$0xff]  ;;  %v517_v57 = vld [vmem:[#allocation7 + $0x1b8] sm:$0xff] }
  0xa9   : > { %761 = vmatpush1.msra.mxu1 %v602_v61  ;;  %696 = vmatpush1.msra.mxu0 %v462_v62  ;;  %v579_v9 = vld [vmem:[#allocation7 + $0x3a8] sm:$0xff]  ;;  %v578_v11 = vld [vmem:[#allocation7 + $0x3a0] sm:$0xff]  ;;  %v516_v58 = vld [vmem:[#allocation7 + $0x1b0] sm:$0xff] }
  0xaa   : > { %762 = vmatprep.subr.mxu1 %v599_v63  ;;  %697 = vmatprep.subr.mxu0 %v587_v1  ;;  %v659_v12 = vld [vmem:[#allocation7 + $0x628] sm:$0xff]  ;;  %v658_v14 = vld [vmem:[#allocation7 + $0x620] sm:$0xff]  ;;  %v513_v59 = vld [vmem:[#allocation7 + $0x198] sm:$0xff] }
  0xab   : > { %763 = vmatpush1.msra.mxu1 %v598_v2  ;;  %698 = vmatpush2.msra.mxu0 %v586_v3  ;;  %v575_v13 = vld [vmem:[#allocation7 + $0x388] sm:$0xff]  ;;  %v574_v15 = vld [vmem:[#allocation7 + $0x380] sm:$0xff]  ;;  %v512_v60 = vld [vmem:[#allocation7 + $0x190] sm:$0xff] }
  0xac   : > { %764 = vmatprep.subr.mxu1 %v595_v4  ;;  %699 = vmatprep.subr.mxu0 %v583_v5  ;;  %v655_v16 = vld [vmem:[#allocation7 + $0x608] sm:$0xff]  ;;  %v654_v18 = vld [vmem:[#allocation7 + $0x600] sm:$0xff]  ;;  %v509_v61 = vld [vmem:[#allocation7 + $0x178] sm:$0xff] }
  0xad   : > { %765 = vmatpush1.msra.mxu1 %v594_v6  ;;  %700 = vmatpush2.msra.mxu0 %v582_v7  ;;  %v571_v17 = vld [vmem:[#allocation7 + $0x368] sm:$0xff]  ;;  %v570_v19 = vld [vmem:[#allocation7 + $0x360] sm:$0xff]  ;;  %v508_v62 = vld [vmem:[#allocation7 + $0x170] sm:$0xff] }
  0xae   : > { %766 = vmatprep.subr.mxu1 %v591_v8  ;;  %701 = vmatprep.subr.mxu0 %v579_v9  ;;  %v567_v21 = vld [vmem:[#allocation7 + $0x348] sm:$0xff]  ;;  %v566_v23 = vld [vmem:[#allocation7 + $0x340] sm:$0xff]  ;;  %v505_v2 = vld [vmem:[#allocation7 + $0x158] sm:$0xff] }
  0xaf   : > { %767 = vmatpush1.msra.mxu1 %v590_v10  ;;  %702 = vmatpush2.msra.mxu0 %v578_v11  ;;  %v563_v24 = vld [vmem:[#allocation7 + $0x328] sm:$0xff]  ;;  %v562_v25 = vld [vmem:[#allocation7 + $0x320] sm:$0xff]  ;;  %v652_v3 = vld [vmem:[#allocation7 + $0x5f0] sm:$0xff] }
  0xb0   : > { %796 = vmatprep.subr.mxu1 %v659_v12  ;;  %703 = vmatprep.subr.mxu0 %v575_v13  ;;  %v559_v26 = vld [vmem:[#allocation7 + $0x308] sm:$0xff]  ;;  %v558_v27 = vld [vmem:[#allocation7 + $0x300] sm:$0xff]  ;;  %v504_v4 = vld [vmem:[#allocation7 + $0x150] sm:$0xff] }
  0xb1   : > { %797 = vmatpush2.msra.mxu1 %v658_v14  ;;  %704 = vmatpush2.msra.mxu0 %v574_v15  ;;  %v555_v28 = vld [vmem:[#allocation7 + $0x2e8] sm:$0xff]  ;;  %v554_v29 = vld [vmem:[#allocation7 + $0x2e0] sm:$0xff]  ;;  %v649_v5 = vld [vmem:[#allocation7 + $0x5d8] sm:$0xff] }
  0xb2   : > { %798 = vmatprep.subr.mxu1 %v655_v16  ;;  %705 = vmatprep.subr.mxu0 %v571_v17  ;;  %v551_v30 = vld [vmem:[#allocation7 + $0x2c8] sm:$0xff]  ;;  %v550_v31 = vld [vmem:[#allocation7 + $0x2c0] sm:$0xff]  ;;  %v501_v6 = vld [vmem:[#allocation7 + $0x138] sm:$0xff] }
  0xb3   : > { %799 = vmatpush2.msra.mxu1 %v654_v18  ;;  %706 = vmatpush2.msra.mxu0 %v570_v19  ;;  %v547_v32 = vld [vmem:[#allocation7 + $0x2a8] sm:$0xff]  ;;  %v546_v33 = vld [vmem:[#allocation7 + $0x2a0] sm:$0xff]  ;;  %v648_v7 = vld [vmem:[#allocation7 + $0x5d0] sm:$0xff] }
  0xb4   : > { %807 = vmatprep.subr.mxu1 %v525_v20  ;;  %707 = vmatprep.subr.mxu0 %v567_v21  ;;  %v543_v34 = vld [vmem:[#allocation7 + $0x288] sm:$0xff]  ;;  %v542_v35 = vld [vmem:[#allocation7 + $0x280] sm:$0xff]  ;;  %v500_v8 = vld [vmem:[#allocation7 + $0x130] sm:$0xff] }
  0xb5   : > { %3041 = vmatprep.mubr.msk.f32.mxu1 %vm363_vm0, %v3789_v22  ;;  %708 = vmatpush2.msra.mxu0 %v566_v23  ;;  %v539_v36 = vld [vmem:[#allocation7 + $0x268] sm:$0xff]  ;;  %v538_v37 = vld [vmem:[#allocation7 + $0x260] sm:$0xff]  ;;  %v645_v9 = vld [vmem:[#allocation7 + $0x5b8] sm:$0xff] }
  0xb6   : > { %709 = vmatprep.subr.mxu0 %v563_v24  ;;  %v535_v38 = vld [vmem:[#allocation7 + $0x248] sm:$0xff]  ;;  %v534_v39 = vld [vmem:[#allocation7 + $0x240] sm:$0xff]  ;;  %v497_v10 = vld [vmem:[#allocation7 + $0x118] sm:$0xff] }
  0xb7   : > { %710 = vmatpush2.msra.mxu0 %v562_v25  ;;  %v531_v40 = vld [vmem:[#allocation7 + $0x228] sm:$0xff]  ;;  %v530_v41 = vld [vmem:[#allocation7 + $0x220] sm:$0xff]  ;;  %v644_v11 = vld [vmem:[#allocation7 + $0x5b0] sm:$0xff] }
  0xb8   : > { %711 = vmatprep.subr.mxu0 %v559_v26  ;;  %v527_v42 = vld [vmem:[#allocation7 + $0x208] sm:$0xff]  ;;  %v526_v43 = vld [vmem:[#allocation7 + $0x200] sm:$0xff]  ;;  %v496_v12 = vld [vmem:[#allocation7 + $0x110] sm:$0xff] }
  0xb9   : > { %712 = vmatpush2.msra.mxu0 %v558_v27  ;;  %v641_v13 = vld [vmem:[#allocation7 + $0x598] sm:$0xff]  ;;  %v640_v15 = vld [vmem:[#allocation7 + $0x590] sm:$0xff] }
  0xba   : > { %713 = vmatprep.subr.mxu0 %v555_v28  ;;  %v493_v14 = vld [vmem:[#allocation7 + $0xf8] sm:$0xff]  ;;  %v492_v16 = vld [vmem:[#allocation7 + $0xf0] sm:$0xff] }
  0xbb   : > { %714 = vmatpush2.msra.mxu0 %v554_v29  ;;  %v637_v17 = vld [vmem:[#allocation7 + $0x578] sm:$0xff]  ;;  %v636_v19 = vld [vmem:[#allocation7 + $0x570] sm:$0xff] }
  0xbc   : > { %715 = vmatprep.subr.mxu0 %v551_v30  ;;  %v489_v18 = vld [vmem:[#allocation7 + $0xd8] sm:$0xff]  ;;  %v488_v20 = vld [vmem:[#allocation7 + $0xd0] sm:$0xff] }
  0xbd   : > { %716 = vmatpush2.msra.mxu0 %v550_v31  ;;  %v633_v21 = vld [vmem:[#allocation7 + $0x558] sm:$0xff]  ;;  %v632_v24 = vld [vmem:[#allocation7 + $0x550] sm:$0xff] }
  0xbe   : > { %717 = vmatprep.subr.mxu0 %v547_v32  ;;  %v485_v23 = vld [vmem:[#allocation7 + $0xb8] sm:$0xff]  ;;  %v484_v25 = vld [vmem:[#allocation7 + $0xb0] sm:$0xff] }
  0xbf   : > { %718 = vmatpush2.msra.mxu0 %v546_v33  ;;  %v629_v26 = vld [vmem:[#allocation7 + $0x538] sm:$0xff]  ;;  %v628_v28 = vld [vmem:[#allocation7 + $0x530] sm:$0xff] }
  0xc0   : > { %719 = vmatprep.subr.mxu0 %v543_v34  ;;  %v481_v27 = vld [vmem:[#allocation7 + $0x98] sm:$0xff]  ;;  %v480_v29 = vld [vmem:[#allocation7 + $0x90] sm:$0xff] }
  0xc1   : > { %720 = vmatpush2.msra.mxu0 %v542_v35  ;;  %v625_v30 = vld [vmem:[#allocation7 + $0x518] sm:$0xff]  ;;  %v624_v32 = vld [vmem:[#allocation7 + $0x510] sm:$0xff] }
  0xc2   : > { %721 = vmatprep.subr.mxu0 %v539_v36  ;;  %v477_v31 = vld [vmem:[#allocation7 + $0x78] sm:$0xff]  ;;  %v476_v33 = vld [vmem:[#allocation7 + $0x70] sm:$0xff] }
  0xc3   : > { %722 = vmatpush2.msra.mxu0 %v538_v37  ;;  %v621_v34 = vld [vmem:[#allocation7 + $0x4f8] sm:$0xff]  ;;  %v620_v36 = vld [vmem:[#allocation7 + $0x4f0] sm:$0xff] }
  0xc4   : > { %723 = vmatprep.subr.mxu0 %v535_v38  ;;  %v473_v35 = vld [vmem:[#allocation7 + $0x58] sm:$0xff]  ;;  %v472_v37 = vld [vmem:[#allocation7 + $0x50] sm:$0xff] }
  0xc5   : > { %724 = vmatpush2.msra.mxu0 %v534_v39  ;;  %v617_v38 = vld [vmem:[#allocation7 + $0x4d8] sm:$0xff] }
  0xc6   : > { %725 = vmatprep.subr.mxu0 %v531_v40  ;;  %v469_v39 = vld [vmem:[#allocation7 + $0x38] sm:$0xff]  ;;  %v616_v40 = vld [vmem:[#allocation7 + $0x4d0] sm:$0xff] }
  0xc7   : > { %726 = vmatpush2.msra.mxu0 %v530_v41  ;;  %v468_v41 = vld [vmem:[#allocation7 + $0x30] sm:$0xff] }
  0xc8   : > { %727 = vmatprep.subr.mxu0 %v527_v42  ;;  %v613_v42 = vld [vmem:[#allocation7 + $0x4b8] sm:$0xff] }
  0xc9   : > { %728 = vmatpush2.msra.mxu0 %v526_v43  ;;  %v465_v43 = vld [vmem:[#allocation7 + $0x18] sm:$0xff] }
  0xca   : > { %878 = vmatprep.subr.mxu0 %v653_v44  ;;  %v612_v44 = vld [vmem:[#allocation7 + $0x4b0] sm:$0xff] }
  0xfb   : > { %v428_v45 = vpop.permute.xlu0 %427 }
  0xfc   : > { %v452_v46 = vpop.permute.xlu1 %451  ;;  %433 = vst.msk [vmem:[#allocation2 + $0x10] sm:$0xfe] %vm432_vm2, %v428_v45  ;;  %vm388_vm2 = vcmask 942752  }
  0xfd   : > { %437 = vst.msk [vmem:[#allocation2 + $0x30] sm:$0x1] %vm436_vm3, %v428_v45  ;;  %vm430_vm3 = vcmask 1048481  }
  0xff   : > { %v442_v47 = vpop.permute.xlu0 %441 }
 0x100   : > { %v394_v48 = vpop.permute.xlu1 %393  ;;  %445 = vst.msk [vmem:[#allocation2 + $0x10] sm:$0xfe] %vm444_vm4, %v442_v47  ;;  %vm434_vm4 = vcmask 1041312  }
 0x101   : > { %447 = vst.msk [vmem:[#allocation2 + $0x30] sm:$0x1] %vm446_vm5, %v442_v47  ;;  %vm396_vm5 = vcmask 1048545   ;;  %v589_v47 = vld [vmem:[#allocation7 + $0x3f8] sm:$0xff] }
 0x102   : > { %399 = vst.msk [vmem:[#allocation2 + $0x8] sm:$0xfe] %vm398_vm6, %v394_v48  ;;  %vm400_vm6 = vcmask 1041376  }
 0x103   : > { %403 = vst.msk [vmem:[#allocation2 + $0x28] sm:$0x1] %vm402_vm7, %v394_v48  ;;  %v408_v49 = vpop.permute.xlu0 %407  ;;  %vm1174_vm7 = vcmask 1046528  }
 0x104   : > { %455 = vst.msk [vmem:[#allocation2 + $0x10] sm:$0xfe] %vm454_vm8, %v452_v46  ;;  %v374_v50 = vpop.permute.xlu1 %373  ;;  %vm1705_vm8 = vcmask 1045504  }
 0x105   : > { %457 = vst.msk [vmem:[#allocation2 + $0x30] sm:$0x1] %vm456_vm9, %v452_v46  ;;  %v609_v46 = vld [vmem:[#allocation7 + $0x498] sm:$0xff]  ;;  %vm2475_vm9 = vcmask 15360  }
 0x106   : > { %411 = vst.msk [vmem:[#allocation2 + $0x8] sm:$0xfe] %vm410_vm10, %v408_v49 }
 0x107   : > { %413 = vst.msk [vmem:[#allocation2 + $0x28] sm:$0x1] %vm412_vm11, %v408_v49  ;;  %v418_v51 = vpop.permute.xlu0 %417  ;;  %v588_v49 = vld [vmem:[#allocation7 + $0x3f0] sm:$0xff] }
 0x108   : > { %377 = vst.msk [vmem:[#allocation2] sm:$0xfe] %vm376_vm12, %v374_v50  ;;  %v384_v52 = vpop.permute.xlu1 %383 }
 0x109   : > { %379 = vst.msk [vmem:[#allocation2 + $0x20] sm:$0x1] %vm378_vm13, %v374_v50  ;;  %v605_v50 = vld [vmem:[#allocation7 + $0x478] sm:$0xff] }
 0x10a   : > { %421 = vst.msk [vmem:[#allocation2 + $0x8] sm:$0xfe] %vm420_vm14, %v418_v51 }
 0x10b   : > { %423 = vst.msk [vmem:[#allocation2 + $0x28] sm:$0x1] %vm422_vm15, %v418_v51  ;;  %v3794_v54 = vld [vmem:[#allocation2 + $0x10] sm:$0xff]  ;;  %v585_v51 = vld [vmem:[#allocation7 + $0x3d8] sm:$0xff] }
 0x10c   : > { %387 = vst.msk [vmem:[#allocation2] sm:$0xfe] %vm386_vm1, %v384_v52  ;;  %801 = vmatmul.mubr.f32.vlgmr.msra.gmra.mxu1 %v3794_v54 }
 0x10d   : > { %389 = vst.msk [vmem:[#allocation2 + $0x20] sm:$0x1] %vm388_vm2, %v384_v52  ;;  %808 = vmatpush1.msra.mxu1 %v524_v53  ;;  %v604_v52 = vld [vmem:[#allocation7 + $0x470] sm:$0xff] }
 0x10e   : > { %431 = vst.msk [vmem:[#allocation2 + $0x8] sm:$0xfe] %vm430_vm3, %v428_v45  ;;  %809 = vmatprep.subr.mxu1 %v521_v55  ;;  %v584_v53 = vld [vmem:[#allocation7 + $0x3d0] sm:$0xff]  ;;  %v601_v55 = vld [vmem:[#allocation7 + $0x458] sm:$0xff] }
 0x10f   : > { %435 = vst.msk [vmem:[#allocation2 + $0x28] sm:$0x1] %vm434_vm4, %v428_v45  ;;  %810 = vmatpush1.msra.mxu1 %v520_v56  ;;  %v464_v45 = vld [vmem:[#allocation7 + $0x10] sm:$0xff]  ;;  %v581_v56 = vld [vmem:[#allocation7 + $0x3b8] sm:$0xff] }
 0x110   : > { %397 = vst.msk [vmem:[#allocation2] sm:$0xfe] %vm396_vm5, %v394_v48  ;;  %811 = vmatprep.subr.mxu1 %v517_v57  ;;  %v600_v57 = vld [vmem:[#allocation7 + $0x450] sm:$0xff] }
 0x111   : > { %401 = vst.msk [vmem:[#allocation2 + $0x20] sm:$0x1] %vm400_vm6, %v394_v48  ;;  %812 = vmatpush1.msra.mxu1 %v516_v58  ;;  %v608_v48 = vld [vmem:[#allocation7 + $0x490] sm:$0xff] }
 0x112   : > { %813 = vmatprep.subr.mxu1 %v513_v59  ;;  %v580_v58 = vld [vmem:[#allocation7 + $0x3b0] sm:$0xff]  ;;  %v597_v59 = vld [vmem:[#allocation7 + $0x438] sm:$0xff] }
 0x113   : > { %814 = vmatpush1.msra.mxu1 %v512_v60  ;;  %v577_v60 = vld [vmem:[#allocation7 + $0x398] sm:$0xff] }
 0x114   : > { %815 = vmatprep.subr.mxu1 %v509_v61  ;;  %v596_v61 = vld [vmem:[#allocation7 + $0x430] sm:$0xff] }
 0x115   : > { %v459_v63 = vld [vmem:[#allocation2 + $0x8] sm:$0xff]  ;;  %816 = vmatpush1.msra.mxu1 %v508_v62  ;;  %v576_v62 = vld [vmem:[#allocation7 + $0x390] sm:$0xff] }
 0x116   : > { %729 = vmatprep.mubr.f32.mxu0 %v459_v63  ;;  %871 = vmatprep.mubr.f32.mxu1 %v459_v63  ;;  %v593_v63 = vld [vmem:[#allocation7 + $0x418] sm:$0xff] }
 0x117   : > { %v3797_v1 = vld [vmem:[#allocation2] sm:$0xff]  ;;  %817 = vmatprep.subr.mxu1 %v505_v2  ;;  %v573_v2 = vld [vmem:[#allocation7 + $0x378] sm:$0xff] }
 0x118   : > { %730 = vmatmul.mubr.f32.vlgmr.msra.gmra.mxu0 %v3797_v1  ;;  %818 = vmatpush1.msra.mxu1 %v504_v4  ;;  %v572_v4 = vld [vmem:[#allocation7 + $0x370] sm:$0xff] }
 0x119   : > { %879 = vmatpush1.msra.mxu0 %v652_v3  ;;  %819 = vmatprep.subr.mxu1 %v501_v6  ;;  %v592_v3 = vld [vmem:[#allocation7 + $0x410] sm:$0xff]  ;;  %v569_v6 = vld [vmem:[#allocation7 + $0x358] sm:$0xff] }
 0x11a   : > { %880 = vmatprep.subr.mxu0 %v649_v5  ;;  %820 = vmatpush1.msra.mxu1 %v500_v8  ;;  %v661_v5 = vld [vmem:[#allocation7 + $0x638] sm:$0xff]  ;;  %v568_v8 = vld [vmem:[#allocation7 + $0x350] sm:$0xff] }
 0x11b   : > { %881 = vmatpush1.msra.mxu0 %v648_v7  ;;  %821 = vmatprep.subr.mxu1 %v497_v10  ;;  %v660_v7 = vld [vmem:[#allocation7 + $0x630] sm:$0xff]  ;;  %v962_v10 = vld [vmem:[#allocation2 + $0x28] sm:$0x1] }
 0x11c   : > { %882 = vmatprep.subr.mxu0 %v645_v9  ;;  %822 = vmatpush1.msra.mxu1 %v496_v12  ;;  %v958_v9 = vld [vmem:[#allocation2 + $0x8] sm:$0xfe]  ;;  %v565_v12 = vld [vmem:[#allocation7 + $0x338] sm:$0xff] }
 0x11d   : > { %883 = vmatpush1.msra.mxu0 %v644_v11  ;;  %823 = vmatprep.subr.mxu1 %v493_v14  ;;  %v657_v11 = vld [vmem:[#allocation7 + $0x618] sm:$0xff]  ;;  %v564_v14 = vld [vmem:[#allocation7 + $0x330] sm:$0xff] }
 0x11e   : > { %884 = vmatprep.subr.mxu0 %v641_v13  ;;  %824 = vmatpush1.msra.mxu1 %v492_v16  ;;  %v656_v13 = vld [vmem:[#allocation7 + $0x610] sm:$0xff]  ;;  %v1179_v16 = vrot.slane %v962_v10, 1  ;;  %v971_v10 = vld [vmem:[#allocation7 + $0x668] sm:$0xff] }
 0x11f   : > { %885 = vmatpush1.msra.mxu0 %v640_v15  ;;  %825 = vmatprep.subr.mxu1 %v489_v18  ;;  %v1178_v15 = vrot.slane %v958_v9, 1  ;;  %v561_v18 = vld [vmem:[#allocation7 + $0x318] sm:$0xff]  ;;  %v1139_v9 = vld [vmem:[#allocation7 + $0xba8] sm:$0xff] }
 0x120   : > { %886 = vmatprep.subr.mxu0 %v637_v17  ;;  %826 = vmatpush1.msra.mxu1 %v488_v20  ;;  %v1027_v17 = vld [vmem:[#allocation7 + $0x828] sm:$0xff]  ;;  %v560_v20 = vld [vmem:[#allocation7 + $0x310] sm:$0xff] }
 0x121   : > { %887 = vmatpush1.msra.mxu0 %v636_v19  ;;  %827 = vmatprep.subr.mxu1 %v485_v23  ;;  %v1026_v19 = vld [vmem:[#allocation7 + $0x820] sm:$0xff]  ;;  %v3804_v23 = vsel %vm1174_vm7, %v1178_v15, %v1179_v16 }
 0x122   : > { %888 = vmatprep.subr.mxu0 %v633_v21  ;;  %828 = vmatpush1.msra.mxu1 %v484_v25  ;;  %v1023_v21 = vld [vmem:[#allocation7 + $0x808] sm:$0xff]  ;;  %v1022_v25 = vld [vmem:[#allocation7 + $0x800] sm:$0xff] }
 0x123   : > { %889 = vmatpush1.msra.mxu0 %v632_v24  ;;  %829 = vmatprep.subr.mxu1 %v481_v27  ;;  %v557_v24 = vld [vmem:[#allocation7 + $0x2f8] sm:$0xff]  ;;  %v1019_v27 = vld [vmem:[#allocation7 + $0x7e8] sm:$0xff]  ;;  %v1134_v15 = vld [vmem:[#allocation7 + $0xb80] sm:$0xff] }
 0x124   : > { %890 = vmatprep.subr.mxu0 %v629_v26  ;;  %830 = vmatpush1.msra.mxu1 %v480_v29  ;;  %v556_v26 = vld [vmem:[#allocation7 + $0x2f0] sm:$0xff]  ;;  %v1015_v29 = vld [vmem:[#allocation7 + $0x7c8] sm:$0xff]  ;;  %v966_v16 = vld [vmem:[#allocation7 + $0x640] sm:$0xff] }
 0x125   : > { %891 = vmatpush1.msra.mxu0 %v628_v28  ;;  %831 = vmatprep.subr.mxu1 %v477_v31  ;;  %v1018_v28 = vld [vmem:[#allocation7 + $0x7e0] sm:$0xff] }
 0x126   : > { %892 = vmatprep.subr.mxu0 %v625_v30  ;;  %832 = vmatpush1.msra.mxu1 %v476_v33  ;;  %v549_v30 = vld [vmem:[#allocation7 + $0x2b8] sm:$0xff]  ;;  %v1014_v31 = vld [vmem:[#allocation7 + $0x7c0] sm:$0xff]  ;;  %v1011_v33 = vld [vmem:[#allocation7 + $0x7a8] sm:$0xff] }
 0x127   : > { %893 = vmatpush1.msra.mxu0 %v624_v32  ;;  %833 = vmatprep.subr.mxu1 %v473_v35  ;;  %v548_v32 = vld [vmem:[#allocation7 + $0x2b0] sm:$0xff]  ;;  %v1010_v35 = vld [vmem:[#allocation7 + $0x7a0] sm:$0xff] }
 0x128   : > { %894 = vmatprep.subr.mxu0 %v621_v34  ;;  %834 = vmatpush1.msra.mxu1 %v472_v37  ;;  %v545_v34 = vld [vmem:[#allocation7 + $0x298] sm:$0xff]  ;;  %v1007_v37 = vld [vmem:[#allocation7 + $0x788] sm:$0xff] }
 0x129   : > { %895 = vmatpush1.msra.mxu0 %v620_v36  ;;  %835 = vmatprep.subr.mxu1 %v469_v39  ;;  %v544_v36 = vld [vmem:[#allocation7 + $0x290] sm:$0xff]  ;;  %v1006_v39 = vld [vmem:[#allocation7 + $0x780] sm:$0xff] }
 0x12a   : > { %896 = vmatprep.subr.mxu0 %v617_v38  ;;  %836 = vmatpush1.msra.mxu1 %v468_v41  ;;  %v541_v38 = vld [vmem:[#allocation7 + $0x278] sm:$0xff]  ;;  %v1003_v41 = vld [vmem:[#allocation7 + $0x768] sm:$0xff] }
 0x12b   : > { %897 = vmatpush1.msra.mxu0 %v616_v40  ;;  %837 = vmatprep.subr.mxu1 %v465_v43  ;;  %v540_v40 = vld [vmem:[#allocation7 + $0x270] sm:$0xff]  ;;  %v1002_v43 = vld [vmem:[#allocation7 + $0x760] sm:$0xff] }
 0x12c   : > { %898 = vmatprep.subr.mxu0 %v613_v42  ;;  %838 = vmatpush1.msra.mxu1 %v464_v45  ;;  %v537_v42 = vld [vmem:[#allocation7 + $0x258] sm:$0xff]  ;;  %v999_v45 = vld [vmem:[#allocation7 + $0x748] sm:$0xff] }
 0x12d   : > { %899 = vmatpush1.msra.mxu0 %v612_v44  ;;  %839 = vmatprep.subr.mxu1 %v589_v47  ;;  %v536_v44 = vld [vmem:[#allocation7 + $0x250] sm:$0xff]  ;;  %v998_v47 = vld [vmem:[#allocation7 + $0x740] sm:$0xff] }
 0x12e   : > { %900 = vmatprep.subr.mxu0 %v609_v46  ;;  %840 = vmatpush2.msra.mxu1 %v588_v49  ;;  %v533_v46 = vld [vmem:[#allocation7 + $0x238] sm:$0xff]  ;;  %v995_v49 = vld [vmem:[#allocation7 + $0x728] sm:$0xff] }
 0x12f   : > { %901 = vmatpush1.msra.mxu0 %v608_v48  ;;  %841 = vmatprep.subr.mxu1 %v585_v51  ;;  %v532_v48 = vld [vmem:[#allocation7 + $0x230] sm:$0xff]  ;;  %v994_v51 = vld [vmem:[#allocation7 + $0x720] sm:$0xff] }
 0x130   : > { %902 = vmatprep.subr.mxu0 %v605_v50  ;;  %842 = vmatpush2.msra.mxu1 %v584_v53  ;;  %v529_v50 = vld [vmem:[#allocation7 + $0x218] sm:$0xff]  ;;  %v991_v53 = vld [vmem:[#allocation7 + $0x708] sm:$0xff] }
 0x131   : > { %903 = vmatpush1.msra.mxu0 %v604_v52  ;;  %843 = vmatprep.subr.mxu1 %v581_v56  ;;  %v528_v52 = vld [vmem:[#allocation7 + $0x210] sm:$0xff]  ;;  %v1155_v56 = vld [vmem:[#allocation7 + $0xc28] sm:$0xff] }
 0x132   : > { %904 = vmatprep.subr.mxu0 %v601_v55  ;;  %844 = vmatpush2.msra.mxu1 %v580_v58  ;;  %v990_v55 = vld [vmem:[#allocation7 + $0x700] sm:$0xff] }
 0x133   : > { %905 = vmatpush1.msra.mxu0 %v600_v57  ;;  %845 = vmatprep.subr.mxu1 %v577_v60  ;;  %v987_v57 = vld [vmem:[#allocation7 + $0x6e8] sm:$0xff]  ;;  %v1154_v58 = vld [vmem:[#allocation7 + $0xc20] sm:$0xff] }
 0x134   : > { %906 = vmatprep.subr.mxu0 %v597_v59  ;;  %846 = vmatpush2.msra.mxu1 %v576_v62  ;;  %v986_v59 = vld [vmem:[#allocation7 + $0x6e0] sm:$0xff]  ;;  %v1151_v60 = vld [vmem:[#allocation7 + $0xc08] sm:$0xff] }
 0x135   : > { %907 = vmatpush1.msra.mxu0 %v596_v61  ;;  %847 = vmatprep.subr.mxu1 %v573_v2  ;;  %v983_v61 = vld [vmem:[#allocation7 + $0x6c8] sm:$0xff]  ;;  %v1150_v62 = vld [vmem:[#allocation7 + $0xc00] sm:$0xff] }
 0x136   : > { %908 = vmatprep.subr.mxu0 %v593_v63  ;;  %848 = vmatpush2.msra.mxu1 %v572_v4  ;;  %v982_v63 = vld [vmem:[#allocation7 + $0x6c0] sm:$0xff]  ;;  %v1147_v2 = vld [vmem:[#allocation7 + $0xbe8] sm:$0xff] }
 0x137   : > { %909 = vmatpush1.msra.mxu0 %v592_v3  ;;  %849 = vmatprep.subr.mxu1 %v569_v6  ;;  %v979_v3 = vld [vmem:[#allocation7 + $0x6a8] sm:$0xff]  ;;  %v1146_v4 = vld [vmem:[#allocation7 + $0xbe0] sm:$0xff] }
 0x138   : > { %938 = vmatprep.subr.mxu0 %v661_v5  ;;  %850 = vmatpush2.msra.mxu1 %v568_v8  ;;  %v978_v5 = vld [vmem:[#allocation7 + $0x6a0] sm:$0xff]  ;;  %v1143_v6 = vld [vmem:[#allocation7 + $0xbc8] sm:$0xff] }
 0x139   : > { %939 = vmatpush2.msra.mxu0 %v660_v7  ;;  %851 = vmatprep.subr.mxu1 %v565_v12  ;;  %v975_v7 = vld [vmem:[#allocation7 + $0x688] sm:$0xff]  ;;  %v974_v8 = vld [vmem:[#allocation7 + $0x680] sm:$0xff] }
 0x13a   : > { %940 = vmatprep.subr.mxu0 %v657_v11  ;;  %3042 = vmatprep.mubr.msk.f32.mxu0 %vm363_vm0, %v3789_v22  ;;  %v553_v22 = vld [vmem:[#allocation7 + $0x2d8] sm:$0xff]  ;;  %v1138_v11 = vld [vmem:[#allocation7 + $0xba0] sm:$0xff] }
 0x13b   : > { %941 = vmatpush2.msra.mxu0 %v656_v13  ;;  %852 = vmatpush2.msra.mxu1 %v564_v14  ;;  %v970_v12 = vld [vmem:[#allocation7 + $0x660] sm:$0xff]  ;;  %v1135_v13 = vld [vmem:[#allocation7 + $0xb88] sm:$0xff] }
 0x13c   : > { %943 = vmatmul.mubr.f32.vlgmr.msra.gmra.mxu0 %v3794_v54  ;;  %1192 = vmatprep.subr.mxu0 %v1027_v17  ;;  %v552_v54 = vld [vmem:[#allocation7 + $0x2d0] sm:$0xff]  ;;  %v967_v14 = vld [vmem:[#allocation7 + $0x648] sm:$0xff] }
 0x13d   : > { %853 = vmatprep.subr.mxu1 %v561_v18  ;;  %1193 = vmatpush1.msra.mxu0 %v1026_v19  ;;  %v1131_v17 = vld [vmem:[#allocation7 + $0xb68] sm:$0xff]  ;;  %v1130_v19 = vld [vmem:[#allocation7 + $0xb60] sm:$0xff] }
 0x13e   : > { %1256 = vmatprep.mubr.f32.mxu0 %v3804_v23  ;;  %854 = vmatpush2.msra.mxu1 %v560_v20  ;;  %v1091_v18 = vld [vmem:[#allocation7 + $0xa28] sm:$0xff]  ;;  %v1090_v20 = vld [vmem:[#allocation7 + $0xa20] sm:$0xff] }
 0x13f   : > { %1194 = vmatprep.subr.mxu0 %v1023_v21  ;;  %855 = vmatprep.subr.mxu1 %v557_v24  ;;  %v1127_v21 = vld [vmem:[#allocation7 + $0xb48] sm:$0xff] }
 0x140   : > { %1195 = vmatpush1.msra.mxu0 %v1022_v25  ;;  %856 = vmatpush2.msra.mxu1 %v556_v26  ;;  %v1087_v24 = vld [vmem:[#allocation7 + $0xa08] sm:$0xff]  ;;  %v1126_v25 = vld [vmem:[#allocation7 + $0xb40] sm:$0xff] }
 0x141   : > { %1196 = vmatprep.subr.mxu0 %v1019_v27  ;;  %857 = vmatprep.subr.mxu1 %v553_v22  ;;  %v1086_v26 = vld [vmem:[#allocation7 + $0xa00] sm:$0xff]  ;;  %v1123_v27 = vld [vmem:[#allocation7 + $0xb28] sm:$0xff] }
 0x142   : > { %1197 = vmatpush1.msra.mxu0 %v1018_v28  ;;  %858 = vmatpush2.msra.mxu1 %v552_v54  ;;  %v1083_v22 = vld [vmem:[#allocation7 + $0x9e8] sm:$0xff]  ;;  %v1122_v28 = vld [vmem:[#allocation7 + $0xb20] sm:$0xff] }
 0x143   : > { %1198 = vmatprep.subr.mxu0 %v1015_v29  ;;  %859 = vmatprep.subr.mxu1 %v549_v30  ;;  %v1082_v54 = vld [vmem:[#allocation7 + $0x9e0] sm:$0xff]  ;;  %v1119_v29 = vld [vmem:[#allocation7 + $0xb08] sm:$0xff] }
 0x144   : > { %1199 = vmatpush1.msra.mxu0 %v1014_v31  ;;  %860 = vmatpush2.msra.mxu1 %v548_v32  ;;  %v1079_v30 = vld [vmem:[#allocation7 + $0x9c8] sm:$0xff]  ;;  %v1118_v31 = vld [vmem:[#allocation7 + $0xb00] sm:$0xff] }
 0x145   : > { %1200 = vmatprep.subr.mxu0 %v1011_v33  ;;  %861 = vmatprep.subr.mxu1 %v545_v34  ;;  %v1078_v32 = vld [vmem:[#allocation7 + $0x9c0] sm:$0xff]  ;;  %v1115_v33 = vld [vmem:[#allocation7 + $0xae8] sm:$0xff] }
 0x146   : > { %1201 = vmatpush1.msra.mxu0 %v1010_v35  ;;  %862 = vmatpush2.msra.mxu1 %v544_v36  ;;  %v1075_v34 = vld [vmem:[#allocation7 + $0x9a8] sm:$0xff]  ;;  %v1114_v35 = vld [vmem:[#allocation7 + $0xae0] sm:$0xff] }
 0x147   : > { %1202 = vmatprep.subr.mxu0 %v1007_v37  ;;  %863 = vmatprep.subr.mxu1 %v541_v38  ;;  %v1074_v36 = vld [vmem:[#allocation7 + $0x9a0] sm:$0xff]  ;;  %v1111_v37 = vld [vmem:[#allocation7 + $0xac8] sm:$0xff] }
 0x148   : > { %1203 = vmatpush1.msra.mxu0 %v1006_v39  ;;  %864 = vmatpush2.msra.mxu1 %v540_v40  ;;  %v1071_v38 = vld [vmem:[#allocation7 + $0x988] sm:$0xff]  ;;  %v1110_v39 = vld [vmem:[#allocation7 + $0xac0] sm:$0xff] }
 0x149   : > { %1204 = vmatprep.subr.mxu0 %v1003_v41  ;;  %865 = vmatprep.subr.mxu1 %v537_v42  ;;  %v1070_v40 = vld [vmem:[#allocation7 + $0x980] sm:$0xff]  ;;  %v1107_v41 = vld [vmem:[#allocation7 + $0xaa8] sm:$0xff] }
 0x14a   : > { %1205 = vmatpush1.msra.mxu0 %v1002_v43  ;;  %866 = vmatpush2.msra.mxu1 %v536_v44  ;;  %v1067_v42 = vld [vmem:[#allocation7 + $0x968] sm:$0xff]  ;;  %v1106_v43 = vld [vmem:[#allocation7 + $0xaa0] sm:$0xff] }
 0x14b   : > { %1206 = vmatprep.subr.mxu0 %v999_v45  ;;  %867 = vmatprep.subr.mxu1 %v533_v46  ;;  %v1066_v44 = vld [vmem:[#allocation7 + $0x960] sm:$0xff]  ;;  %v1103_v45 = vld [vmem:[#allocation7 + $0xa88] sm:$0xff] }
 0x14c   : > { %1207 = vmatpush1.msra.mxu0 %v998_v47  ;;  %868 = vmatpush2.msra.mxu1 %v532_v48  ;;  %v1063_v46 = vld [vmem:[#allocation7 + $0x948] sm:$0xff]  ;;  %v1102_v47 = vld [vmem:[#allocation7 + $0xa80] sm:$0xff] }
 0x14d   : > { %1208 = vmatprep.subr.mxu0 %v995_v49  ;;  %869 = vmatprep.subr.mxu1 %v529_v50  ;;  %v1062_v48 = vld [vmem:[#allocation7 + $0x940] sm:$0xff]  ;;  %v1099_v49 = vld [vmem:[#allocation7 + $0xa68] sm:$0xff] }
 0x14e   : > { %1209 = vmatpush1.msra.mxu0 %v994_v51  ;;  %870 = vmatpush2.msra.mxu1 %v528_v52  ;;  %v1059_v50 = vld [vmem:[#allocation7 + $0x928] sm:$0xff]  ;;  %v960_v51 = vld [vmem:[#allocation2 + $0x18] sm:$0xfe]  ;;  %v964_v52 = vld [vmem:[#allocation2 + $0x38] sm:$0x1] }
 0x14f   : > { %1210 = vmatprep.subr.mxu0 %v991_v53  ;;  %872 = vmatmul.mubr.f32.vlgmr.msra.gmra.mxu1 %v3797_v1  ;;  %v1142_v1 = vld [vmem:[#allocation7 + $0xbc0] sm:$0xff] }
 0x150   : > { %1211 = vmatpush1.msra.mxu0 %v990_v55  ;;  %1263 = vmatprep.subr.mxu1 %v1155_v56  ;;  %v1098_v53 = vld [vmem:[#allocation7 + $0xa60] sm:$0xff]  ;;  %v1095_v56 = vld [vmem:[#allocation7 + $0xa48] sm:$0xff] }
 0x151   : > { %1212 = vmatprep.subr.mxu0 %v987_v57  ;;  %1264 = vmatpush1.msra.mxu1 %v1154_v58  ;;  %v1058_v55 = vld [vmem:[#allocation7 + $0x920] sm:$0xff]  ;;  %v1055_v57 = vld [vmem:[#allocation7 + $0x908] sm:$0xff] }
 0x152   : > { %1213 = vmatpush1.msra.mxu0 %v986_v59  ;;  %1265 = vmatprep.subr.mxu1 %v1151_v60  ;;  %v1094_v58 = vld [vmem:[#allocation7 + $0xa40] sm:$0xff]  ;;  %v1184_v60 = vrot.slane %v960_v51, 1  ;;  %v1141_v51 = vld [vmem:[#allocation7 + $0xbb8] sm:$0xff] }
 0x153   : > { %1214 = vmatprep.subr.mxu0 %v983_v61  ;;  %1266 = vmatpush1.msra.mxu1 %v1150_v62  ;;  %v1054_v59 = vld [vmem:[#allocation7 + $0x900] sm:$0xff]  ;;  %v1185_v61 = vrot.slane %v964_v52, 1  ;;  %v959_v62 = vld [vmem:[#allocation2 + $0x10] sm:$0xfe]  ;;  %v993_v52 = vld [vmem:[#allocation7 + $0x718] sm:$0xff] }
 0x154   : > { %1215 = vmatpush1.msra.mxu0 %v982_v63  ;;  %1267 = vmatprep.subr.mxu1 %v1147_v2  ;;  %v963_v63 = vld [vmem:[#allocation2 + $0x30] sm:$0x1]  ;;  %v1163_v2 = vld [vmem:[#allocation7 + $0xc68] sm:$0xff] }
 0x155   : > { %1216 = vmatprep.subr.mxu0 %v979_v3  ;;  %1268 = vmatpush1.msra.mxu1 %v1146_v4  ;;  %v1051_v3 = vld [vmem:[#allocation7 + $0x8e8] sm:$0xff]  ;;  %v1162_v4 = vld [vmem:[#allocation7 + $0xc60] sm:$0xff] }
 0x156   : > { %1217 = vmatpush1.msra.mxu0 %v978_v5  ;;  %1269 = vmatprep.subr.mxu1 %v1143_v6  ;;  %v1050_v5 = vld [vmem:[#allocation7 + $0x8e0] sm:$0xff]  ;;  %v1159_v6 = vld [vmem:[#allocation7 + $0xc48] sm:$0xff] }
 0x157   : > { %1218 = vmatprep.subr.mxu0 %v975_v7  ;;  %1270 = vmatpush1.msra.mxu1 %v1142_v1  ;;  %v1047_v7 = vld [vmem:[#allocation7 + $0x8c8] sm:$0xff]  ;;  %v1181_v1 = vrot.slane %v959_v62, 1  ;;  %v1132_v62 = vld [vmem:[#allocation7 + $0xb70] sm:$0xff] }
 0x158   : > { %1219 = vmatpush1.msra.mxu0 %v974_v8  ;;  %1271 = vmatprep.subr.mxu1 %v1139_v9  ;;  %v1182_v8 = vrot.slane %v963_v63, 1  ;;  %v1158_v9 = vld [vmem:[#allocation7 + $0xc40] sm:$0xff]  ;;  %v984_v63 = vld [vmem:[#allocation7 + $0x6d0] sm:$0xff] }
 0x159   : > { %1220 = vmatprep.subr.mxu0 %v971_v10  ;;  %1272 = vmatpush1.msra.mxu1 %v1138_v11  ;;  %v3809_v10 = vsel %vm1174_vm7, %v1184_v60, %v1185_v61  ;;  %v1046_v11 = vld [vmem:[#allocation7 + $0x8c0] sm:$0xff]  ;;  %v1133_v60 = vld [vmem:[#allocation7 + $0xb78] sm:$0xff] }
 0x15a   : > { %1221 = vmatpush1.msra.mxu0 %v970_v12  ;;  %1273 = vmatprep.subr.mxu1 %v1135_v13  ;;  %v1029_v12 = vld [vmem:[#allocation7 + $0x838] sm:$0xff]  ;;  %v1043_v13 = vld [vmem:[#allocation7 + $0x8a8] sm:$0xff] }
 0x15b   : > { %1222 = vmatprep.subr.mxu0 %v967_v14  ;;  %1274 = vmatpush1.msra.mxu1 %v1134_v15  ;;  %v3814_v14 = vsel %vm1174_vm7, %v1181_v1, %v1182_v8  ;;  %v1028_v15 = vld [vmem:[#allocation7 + $0x830] sm:$0xff]  ;;  %v985_v61 = vld [vmem:[#allocation7 + $0x6d8] sm:$0xff] }
 0x15c   : > { %1223 = vmatpush1.msra.mxu0 %v966_v16  ;;  %1275 = vmatprep.subr.mxu1 %v1131_v17  ;;  %v1042_v16 = vld [vmem:[#allocation7 + $0x8a0] sm:$0xff]  ;;  %v1025_v17 = vld [vmem:[#allocation7 + $0x818] sm:$0xff]  ;;  %v1124_v1 = vld [vmem:[#allocation7 + $0xb30] sm:$0xff] }
 0x15d   : > { %1224 = vmatprep.subr.mxu0 %v1091_v18  ;;  %1276 = vmatpush1.msra.mxu1 %v1130_v19  ;;  %v1039_v18 = vld [vmem:[#allocation7 + $0x888] sm:$0xff]  ;;  %v1024_v19 = vld [vmem:[#allocation7 + $0x810] sm:$0xff] }
 0x15e   : > { %1225 = vmatpush2.msra.mxu0 %v1090_v20  ;;  %1277 = vmatprep.subr.mxu1 %v1127_v21  ;;  %v1038_v20 = vld [vmem:[#allocation7 + $0x880] sm:$0xff]  ;;  %v1021_v21 = vld [vmem:[#allocation7 + $0x7f8] sm:$0xff]  ;;  %v976_v8 = vld [vmem:[#allocation7 + $0x690] sm:$0xff] }
 0x15f   : > { %1226 = vmatprep.subr.mxu0 %v1087_v24  ;;  %1278 = vmatpush1.msra.mxu1 %v1126_v25  ;;  %v957_v24 = vld [vmem:[#allocation2] sm:$0xfe]  ;;  %v961_v25 = vld [vmem:[#allocation2 + $0x20] sm:$0x1] }
 0x160   : > { %1227 = vmatpush2.msra.mxu0 %v1086_v26  ;;  %1279 = vmatprep.subr.mxu1 %v1123_v27  ;;  %v1035_v26 = vld [vmem:[#allocation7 + $0x868] sm:$0xff]  ;;  %v1020_v27 = vld [vmem:[#allocation7 + $0x7f0] sm:$0xff] }
 0x161   : > { %1228 = vmatprep.subr.mxu0 %v1083_v22  ;;  %1280 = vmatpush1.msra.mxu1 %v1122_v28  ;;  %v1034_v22 = vld [vmem:[#allocation7 + $0x860] sm:$0xff]  ;;  %v1017_v28 = vld [vmem:[#allocation7 + $0x7d8] sm:$0xff] }
 0x162   : > { %1229 = vmatpush2.msra.mxu0 %v1082_v54  ;;  %1281 = vmatprep.subr.mxu1 %v1119_v29  ;;  %v1031_v54 = vld [vmem:[#allocation7 + $0x848] sm:$0xff]  ;;  %v1016_v29 = vld [vmem:[#allocation7 + $0x7d0] sm:$0xff] }
 0x163   : > { %1230 = vmatprep.subr.mxu0 %v1079_v30  ;;  %1282 = vmatpush1.msra.mxu1 %v1118_v31  ;;  %v1175_v30 = vrot.slane %v957_v24, 1  ;;  %v1176_v31 = vrot.slane %v961_v25, 1  ;;  %v1092_v24 = vld [vmem:[#allocation7 + $0xa30] sm:$0xff]  ;;  %v1109_v25 = vld [vmem:[#allocation7 + $0xab8] sm:$0xff] }
 0x164   : > { %1231 = vmatpush2.msra.mxu0 %v1078_v32  ;;  %1283 = vmatprep.subr.mxu1 %v1115_v33  ;;  %v1013_v32 = vld [vmem:[#allocation7 + $0x7b8] sm:$0xff]  ;;  %v1012_v33 = vld [vmem:[#allocation7 + $0x7b0] sm:$0xff] }
 0x165   : > { %1232 = vmatprep.subr.mxu0 %v1075_v34  ;;  %1284 = vmatpush1.msra.mxu1 %v1114_v35  ;;  %v1157_v34 = vld [vmem:[#allocation7 + $0xc38] sm:$0xff] }
 0x166   : > { %1233 = vmatpush2.msra.mxu0 %v1074_v36  ;;  %1285 = vmatprep.subr.mxu1 %v1111_v37  ;;  %v1009_v35 = vld [vmem:[#allocation7 + $0x798] sm:$0xff]  ;;  %v3819_v36 = vsel %vm1174_vm7, %v1175_v30, %v1176_v31  ;;  %v1156_v37 = vld [vmem:[#allocation7 + $0xc30] sm:$0xff] }
 0x167   : > { %1234 = vmatprep.subr.mxu0 %v1071_v38  ;;  %1286 = vmatpush1.msra.mxu1 %v1110_v39  ;;  %v1008_v38 = vld [vmem:[#allocation7 + $0x790] sm:$0xff]  ;;  %v1153_v39 = vld [vmem:[#allocation7 + $0xc18] sm:$0xff] }
 0x168   : > { %1235 = vmatpush2.msra.mxu0 %v1070_v40  ;;  %1287 = vmatprep.subr.mxu1 %v1107_v41  ;;  %v1005_v40 = vld [vmem:[#allocation7 + $0x778] sm:$0xff]  ;;  %v1152_v41 = vld [vmem:[#allocation7 + $0xc10] sm:$0xff] }
 0x169   : > { %1236 = vmatprep.subr.mxu0 %v1067_v42  ;;  %1288 = vmatpush1.msra.mxu1 %v1106_v43  ;;  %v1004_v42 = vld [vmem:[#allocation7 + $0x770] sm:$0xff]  ;;  %v1149_v43 = vld [vmem:[#allocation7 + $0xbf8] sm:$0xff] }
 0x16a   : > { %1237 = vmatpush2.msra.mxu0 %v1066_v44  ;;  %1289 = vmatprep.subr.mxu1 %v1103_v45  ;;  %v1001_v44 = vld [vmem:[#allocation7 + $0x758] sm:$0xff]  ;;  %v1148_v45 = vld [vmem:[#allocation7 + $0xbf0] sm:$0xff] }
 0x16b   : > { %1238 = vmatprep.subr.mxu0 %v1063_v46  ;;  %1290 = vmatpush1.msra.mxu1 %v1102_v47  ;;  %v1000_v46 = vld [vmem:[#allocation7 + $0x750] sm:$0xff]  ;;  %v1145_v47 = vld [vmem:[#allocation7 + $0xbd8] sm:$0xff] }
 0x16c   : > { %1239 = vmatpush2.msra.mxu0 %v1062_v48  ;;  %1291 = vmatprep.subr.mxu1 %v1099_v49  ;;  %v997_v48 = vld [vmem:[#allocation7 + $0x738] sm:$0xff]  ;;  %v1144_v49 = vld [vmem:[#allocation7 + $0xbd0] sm:$0xff] }
 0x16d   : > { %1240 = vmatprep.subr.mxu0 %v1059_v50  ;;  %1292 = vmatpush1.msra.mxu1 %v1098_v53  ;;  %v996_v50 = vld [vmem:[#allocation7 + $0x730] sm:$0xff]  ;;  %v1101_v31 = vld [vmem:[#allocation7 + $0xa78] sm:$0xff] }
 0x16e   : > { %1241 = vmatpush2.msra.mxu0 %v1058_v55  ;;  %1293 = vmatprep.subr.mxu1 %v1095_v56  ;;  %v1140_v53 = vld [vmem:[#allocation7 + $0xbb0] sm:$0xff]  ;;  %v1137_v56 = vld [vmem:[#allocation7 + $0xb98] sm:$0xff] }
 0x16f   : > { %1242 = vmatprep.subr.mxu0 %v1055_v57  ;;  %1294 = vmatpush1.msra.mxu1 %v1094_v58  ;;  %v992_v55 = vld [vmem:[#allocation7 + $0x710] sm:$0xff]  ;;  %v989_v57 = vld [vmem:[#allocation7 + $0x6f8] sm:$0xff] }
 0x170   : > { %1243 = vmatpush2.msra.mxu0 %v1054_v59  ;;  %1323 = vmatprep.subr.mxu1 %v1163_v2  ;;  %v1136_v58 = vld [vmem:[#allocation7 + $0xb90] sm:$0xff]  ;;  %v1129_v2 = vld [vmem:[#allocation7 + $0xb58] sm:$0xff] }
 0x171   : > { %1244 = vmatprep.subr.mxu0 %v1051_v3  ;;  %1324 = vmatpush2.msra.mxu1 %v1162_v4  ;;  %v988_v59 = vld [vmem:[#allocation7 + $0x6f0] sm:$0xff]  ;;  %v981_v3 = vld [vmem:[#allocation7 + $0x6b8] sm:$0xff] }
 0x172   : > { %1245 = vmatpush2.msra.mxu0 %v1050_v5  ;;  %1325 = vmatprep.subr.mxu1 %v1159_v6  ;;  %v1128_v4 = vld [vmem:[#allocation7 + $0xb50] sm:$0xff]  ;;  %v1125_v6 = vld [vmem:[#allocation7 + $0xb38] sm:$0xff] }
 0x173   : > { %1246 = vmatprep.subr.mxu0 %v1047_v7  ;;  %1326 = vmatpush2.msra.mxu1 %v1158_v9  ;;  %v980_v5 = vld [vmem:[#allocation7 + $0x6b0] sm:$0xff]  ;;  %v977_v7 = vld [vmem:[#allocation7 + $0x698] sm:$0xff] }
 0x174   : > { %3043 = vmatprep.mubr.msk.f32.mxu1 %vm363_vm0, %v3809_v10  ;;  %1247 = vmatpush2.msra.mxu0 %v1046_v11  ;;  %v1121_v9 = vld [vmem:[#allocation7 + $0xb18] sm:$0xff]  ;;  %v1084_v30 = vld [vmem:[#allocation7 + $0x9f0] sm:$0xff] }
 0x175   : > { %1328 = vmatmul.mubr.f32.vlgmr.msra.gmra.mxu1 %v3814_v14  ;;  %1334 = vmatprep.subr.mxu1 %v1029_v12  ;;  %v973_v11 = vld [vmem:[#allocation7 + $0x678] sm:$0xff]  ;;  %v1120_v12 = vld [vmem:[#allocation7 + $0xb10] sm:$0xff] }
 0x176   : > { %1248 = vmatprep.subr.mxu0 %v1043_v13  ;;  %1335 = vmatpush1.msra.mxu1 %v1028_v15  ;;  %v972_v13 = vld [vmem:[#allocation7 + $0x670] sm:$0xff]  ;;  %v1117_v15 = vld [vmem:[#allocation7 + $0xaf8] sm:$0xff] }
 0x177   : > { %1398 = vmatprep.mubr.f32.mxu1 %v3804_v23  ;;  %1249 = vmatpush2.msra.mxu0 %v1042_v16  ;;  %v1030_v23 = vld [vmem:[#allocation7 + $0x840] sm:$0xff]  ;;  %v969_v16 = vld [vmem:[#allocation7 + $0x658] sm:$0xff] }
 0x178   : > { %1336 = vmatprep.subr.mxu1 %v1025_v17  ;;  %1250 = vmatprep.subr.mxu0 %v1039_v18  ;;  %v1116_v17 = vld [vmem:[#allocation7 + $0xaf0] sm:$0xff] }
 0x179   : > { %1337 = vmatpush1.msra.mxu1 %v1024_v19  ;;  %1251 = vmatpush2.msra.mxu0 %v1038_v20  ;;  %v968_v18 = vld [vmem:[#allocation7 + $0x650] sm:$0xff]  ;;  %v1113_v19 = vld [vmem:[#allocation7 + $0xad8] sm:$0xff] }
 0x17a   : > { %1338 = vmatprep.subr.mxu1 %v1021_v21  ;;  %1252 = vmatprep.subr.mxu0 %v1035_v26  ;;  %v1093_v20 = vld [vmem:[#allocation7 + $0xa38] sm:$0xff]  ;;  %v1112_v21 = vld [vmem:[#allocation7 + $0xad0] sm:$0xff] }
 0x17b   : > { %1339 = vmatpush1.msra.mxu1 %v1020_v27  ;;  %1253 = vmatpush2.msra.mxu0 %v1034_v22  ;;  %v1089_v26 = vld [vmem:[#allocation7 + $0xa18] sm:$0xff]  ;;  %v1108_v27 = vld [vmem:[#allocation7 + $0xab0] sm:$0xff] }
 0x17c   : > { %1340 = vmatprep.subr.mxu1 %v1017_v28  ;;  %1254 = vmatprep.subr.mxu0 %v1031_v54  ;;  %v1088_v22 = vld [vmem:[#allocation7 + $0xa10] sm:$0xff]  ;;  %v1105_v28 = vld [vmem:[#allocation7 + $0xa98] sm:$0xff] }
 0x17d   : > { %1341 = vmatpush1.msra.mxu1 %v1016_v29  ;;  %1255 = vmatpush2.msra.mxu0 %v1030_v23  ;;  %v1085_v54 = vld [vmem:[#allocation7 + $0x9f8] sm:$0xff]  ;;  %v1104_v29 = vld [vmem:[#allocation7 + $0xa90] sm:$0xff] }
 0x17e   : > { %1342 = vmatprep.subr.mxu1 %v1013_v32  ;;  %1257 = vmatmul.mubr.f32.vlgmr.msra.gmra.mxu0 %v3819_v36  ;;  %v1081_v23 = vld [vmem:[#allocation7 + $0x9d8] sm:$0xff]  ;;  %v1100_v32 = vld [vmem:[#allocation7 + $0xa70] sm:$0xff] }
 0x17f   : > { %1343 = vmatpush1.msra.mxu1 %v1012_v33  ;;  %1405 = vmatprep.subr.mxu0 %v1157_v34  ;;  %v1080_v33 = vld [vmem:[#allocation7 + $0x9d0] sm:$0xff]  ;;  %v1097_v34 = vld [vmem:[#allocation7 + $0xa58] sm:$0xff] }
 0x180   : > { %1344 = vmatprep.subr.mxu1 %v1009_v35  ;;  %1406 = vmatpush1.msra.mxu0 %v1156_v37  ;;  %v1077_v35 = vld [vmem:[#allocation7 + $0x9b8] sm:$0xff]  ;;  %v1096_v37 = vld [vmem:[#allocation7 + $0xa50] sm:$0xff] }
 0x181   : > { %1345 = vmatpush1.msra.mxu1 %v1008_v38  ;;  %1407 = vmatprep.subr.mxu0 %v1153_v39  ;;  %v1076_v38 = vld [vmem:[#allocation7 + $0x9b0] sm:$0xff]  ;;  %v1165_v39 = vld [vmem:[#allocation7 + $0xc78] sm:$0xff] }
 0x182   : > { %1346 = vmatprep.subr.mxu1 %v1005_v40  ;;  %1408 = vmatpush1.msra.mxu0 %v1152_v41  ;;  %v1073_v40 = vld [vmem:[#allocation7 + $0x998] sm:$0xff]  ;;  %v1489_v41 = vld [vmem:[#allocation2 + $0x8] sm:$0xfc] }
 0x183   : > { %1347 = vmatpush1.msra.mxu1 %v1004_v42  ;;  %1409 = vmatprep.subr.mxu0 %v1149_v43  ;;  %v1164_v42 = vld [vmem:[#allocation7 + $0xc70] sm:$0xff] }
 0x184   : > { %1348 = vmatprep.subr.mxu1 %v1001_v44  ;;  %1410 = vmatpush1.msra.mxu0 %v1148_v45  ;;  %v1072_v43 = vld [vmem:[#allocation7 + $0x990] sm:$0xff]  ;;  %v1493_v44 = vld [vmem:[#allocation2 + $0x28] sm:$0x3]  ;;  %v1161_v45 = vld [vmem:[#allocation7 + $0xc58] sm:$0xff] }
 0x185   : > { %1349 = vmatpush1.msra.mxu1 %v1000_v46  ;;  %1411 = vmatprep.subr.mxu0 %v1145_v47  ;;  %v1069_v46 = vld [vmem:[#allocation7 + $0x978] sm:$0xff]  ;;  %v1160_v47 = vld [vmem:[#allocation7 + $0xc50] sm:$0xff] }
 0x186   : > { %1350 = vmatprep.subr.mxu1 %v997_v48  ;;  %1412 = vmatpush1.msra.mxu0 %v1144_v49  ;;  %v1068_v48 = vld [vmem:[#allocation7 + $0x970] sm:$0xff]  ;;  %v1709_v49 = vrot.slane %v1489_v41, 2  ;;  %v1506_v41 = vld [vmem:[#allocation7 + $0xcc8] sm:$0xff] }
 0x187   : > { %1351 = vmatpush1.msra.mxu1 %v996_v50  ;;  %1413 = vmatprep.subr.mxu0 %v1141_v51  ;;  %v1710_v50 = vrot.slane %v1493_v44, 2  ;;  %v1558_v51 = vld [vmem:[#allocation7 + $0xe68] sm:$0xff] }
 0x188   : > { %1352 = vmatprep.subr.mxu1 %v993_v52  ;;  %1414 = vmatpush1.msra.mxu0 %v1140_v53  ;;  %v1065_v52 = vld [vmem:[#allocation7 + $0x958] sm:$0xff]  ;;  %v1557_v53 = vld [vmem:[#allocation7 + $0xe60] sm:$0xff]  ;;  %v1502_v44 = vld [vmem:[#allocation7 + $0xca8] sm:$0xff] }
 0x189   : > { %1353 = vmatpush1.msra.mxu1 %v992_v55  ;;  %1415 = vmatprep.subr.mxu0 %v1137_v56  ;;  %v1064_v55 = vld [vmem:[#allocation7 + $0x950] sm:$0xff]  ;;  %v1554_v56 = vld [vmem:[#allocation7 + $0xe48] sm:$0xff] }
 0x18a   : > { %1354 = vmatprep.subr.mxu1 %v989_v57  ;;  %1416 = vmatpush1.msra.mxu0 %v1136_v58  ;;  %v3826_v57 = vsel %vm1705_vm8, %v1709_v49, %v1710_v50  ;;  %v1061_v58 = vld [vmem:[#allocation7 + $0x938] sm:$0xff]  ;;  %v1665_v49 = vld [vmem:[#allocation7 + $0x11c0] sm:$0xff] }
 0x18b   : > { %1355 = vmatpush1.msra.mxu1 %v988_v59  ;;  %1417 = vmatprep.subr.mxu0 %v1133_v60  ;;  %v1553_v59 = vld [vmem:[#allocation7 + $0xe40] sm:$0xff]  ;;  %v1060_v60 = vld [vmem:[#allocation7 + $0x930] sm:$0xff] }
 0x18c   : > { %1356 = vmatprep.subr.mxu1 %v985_v61  ;;  %1418 = vmatpush1.msra.mxu0 %v1132_v62  ;;  %v1550_v61 = vld [vmem:[#allocation7 + $0xe28] sm:$0xff]  ;;  %v1549_v62 = vld [vmem:[#allocation7 + $0xe20] sm:$0xff] }
 0x18d   : > { %1357 = vmatpush1.msra.mxu1 %v984_v63  ;;  %1419 = vmatprep.subr.mxu0 %v1129_v2  ;;  %v1546_v63 = vld [vmem:[#allocation7 + $0xe08] sm:$0xff]  ;;  %v1053_v2 = vld [vmem:[#allocation7 + $0x8f8] sm:$0xff]  ;;  %v1497_v50 = vld [vmem:[#allocation7 + $0xc80] sm:$0xff] }
 0x18e   : > { %1358 = vmatprep.subr.mxu1 %v981_v3  ;;  %1420 = vmatpush1.msra.mxu0 %v1128_v4  ;;  %v1545_v3 = vld [vmem:[#allocation7 + $0xe00] sm:$0xff]  ;;  %v1052_v4 = vld [vmem:[#allocation7 + $0x8f0] sm:$0xff] }
 0x18f   : > { %1359 = vmatpush1.msra.mxu1 %v980_v5  ;;  %1421 = vmatprep.subr.mxu0 %v1125_v6  ;;  %v1542_v5 = vld [vmem:[#allocation7 + $0xde8] sm:$0xff]  ;;  %v1049_v6 = vld [vmem:[#allocation7 + $0x8d8] sm:$0xff] }
 0x190   : > { %1360 = vmatprep.subr.mxu1 %v977_v7  ;;  %1422 = vmatpush1.msra.mxu0 %v1124_v1  ;;  %v1541_v7 = vld [vmem:[#allocation7 + $0xde0] sm:$0xff]  ;;  %v1048_v1 = vld [vmem:[#allocation7 + $0x8d0] sm:$0xff] }
 0x191   : > { %1361 = vmatpush1.msra.mxu1 %v976_v8  ;;  %1423 = vmatprep.subr.mxu0 %v1121_v9  ;;  %v1538_v8 = vld [vmem:[#allocation7 + $0xdc8] sm:$0xff]  ;;  %v1045_v9 = vld [vmem:[#allocation7 + $0x8b8] sm:$0xff] }
 0x192   : > { %1362 = vmatprep.subr.mxu1 %v973_v11  ;;  %1424 = vmatpush1.msra.mxu0 %v1120_v12  ;;  %v1537_v11 = vld [vmem:[#allocation7 + $0xdc0] sm:$0xff]  ;;  %v1044_v12 = vld [vmem:[#allocation7 + $0x8b0] sm:$0xff] }
 0x193   : > { %1363 = vmatpush1.msra.mxu1 %v972_v13  ;;  %1425 = vmatprep.subr.mxu0 %v1117_v15  ;;  %v1534_v13 = vld [vmem:[#allocation7 + $0xda8] sm:$0xff]  ;;  %v1041_v15 = vld [vmem:[#allocation7 + $0x898] sm:$0xff] }
 0x194   : > { %1364 = vmatprep.subr.mxu1 %v969_v16  ;;  %1426 = vmatpush1.msra.mxu0 %v1116_v17  ;;  %v1533_v16 = vld [vmem:[#allocation7 + $0xda0] sm:$0xff]  ;;  %v1040_v17 = vld [vmem:[#allocation7 + $0x890] sm:$0xff] }
 0x195   : > { %1365 = vmatpush1.msra.mxu1 %v968_v18  ;;  %1427 = vmatprep.subr.mxu0 %v1113_v19  ;;  %v1530_v18 = vld [vmem:[#allocation7 + $0xd88] sm:$0xff]  ;;  %v1037_v19 = vld [vmem:[#allocation7 + $0x878] sm:$0xff] }
 0x196   : > { %1366 = vmatprep.subr.mxu1 %v1093_v20  ;;  %1428 = vmatpush1.msra.mxu0 %v1112_v21  ;;  %v1529_v20 = vld [vmem:[#allocation7 + $0xd80] sm:$0xff]  ;;  %v1036_v21 = vld [vmem:[#allocation7 + $0x870] sm:$0xff] }
 0x197   : > { %1367 = vmatpush2.msra.mxu1 %v1092_v24  ;;  %1429 = vmatprep.subr.mxu0 %v1109_v25  ;;  %v1526_v24 = vld [vmem:[#allocation7 + $0xd68] sm:$0xff]  ;;  %v1033_v25 = vld [vmem:[#allocation7 + $0x858] sm:$0xff] }
 0x198   : > { %1368 = vmatprep.subr.mxu1 %v1089_v26  ;;  %1430 = vmatpush1.msra.mxu0 %v1108_v27  ;;  %v1525_v26 = vld [vmem:[#allocation7 + $0xd60] sm:$0xff]  ;;  %v1032_v27 = vld [vmem:[#allocation7 + $0x850] sm:$0xff] }
 0x199   : > { %1369 = vmatpush2.msra.mxu1 %v1088_v22  ;;  %1431 = vmatprep.subr.mxu0 %v1105_v28  ;;  %v1522_v22 = vld [vmem:[#allocation7 + $0xd48] sm:$0xff]  ;;  %v1521_v28 = vld [vmem:[#allocation7 + $0xd40] sm:$0xff] }
 0x19a   : > { %1370 = vmatprep.subr.mxu1 %v1085_v54  ;;  %1432 = vmatpush1.msra.mxu0 %v1104_v29  ;;  %v1686_v54 = vld [vmem:[#allocation7 + $0x1268] sm:$0xff] }
 0x19b   : > { %1371 = vmatpush2.msra.mxu1 %v1084_v30  ;;  %1433 = vmatprep.subr.mxu0 %v1101_v31  ;;  %v1518_v29 = vld [vmem:[#allocation7 + $0xd28] sm:$0xff]  ;;  %v1685_v30 = vld [vmem:[#allocation7 + $0x1260] sm:$0xff] }
 0x19c   : > { %1372 = vmatprep.subr.mxu1 %v1081_v23  ;;  %1434 = vmatpush1.msra.mxu0 %v1100_v32  ;;  %v1517_v31 = vld [vmem:[#allocation7 + $0xd20] sm:$0xff]  ;;  %v1682_v23 = vld [vmem:[#allocation7 + $0x1248] sm:$0xff] }
 0x19d   : > { %1373 = vmatpush2.msra.mxu1 %v1080_v33  ;;  %1435 = vmatprep.subr.mxu0 %v1097_v34  ;;  %v1514_v32 = vld [vmem:[#allocation7 + $0xd08] sm:$0xff]  ;;  %v1681_v33 = vld [vmem:[#allocation7 + $0x1240] sm:$0xff] }
 0x19e   : > { %1374 = vmatprep.subr.mxu1 %v1077_v35  ;;  %1436 = vmatpush1.msra.mxu0 %v1096_v37  ;;  %v1513_v34 = vld [vmem:[#allocation7 + $0xd00] sm:$0xff]  ;;  %v1678_v35 = vld [vmem:[#allocation7 + $0x1228] sm:$0xff] }
 0x19f   : > { %1375 = vmatpush2.msra.mxu1 %v1076_v38  ;;  %1465 = vmatprep.subr.mxu0 %v1165_v39  ;;  %v1510_v37 = vld [vmem:[#allocation7 + $0xce8] sm:$0xff]  ;;  %v1677_v38 = vld [vmem:[#allocation7 + $0x1220] sm:$0xff] }
 0x1a0   : > { %1376 = vmatprep.subr.mxu1 %v1073_v40  ;;  %1466 = vmatpush2.msra.mxu0 %v1164_v42  ;;  %v1509_v39 = vld [vmem:[#allocation7 + $0xce0] sm:$0xff]  ;;  %v1674_v40 = vld [vmem:[#allocation7 + $0x1208] sm:$0xff] }
 0x1a1   : > { %1377 = vmatpush2.msra.mxu1 %v1072_v43  ;;  %1467 = vmatprep.subr.mxu0 %v1161_v45  ;;  %v1505_v42 = vld [vmem:[#allocation7 + $0xcc0] sm:$0xff]  ;;  %v1670_v43 = vld [vmem:[#allocation7 + $0x11e8] sm:$0xff] }
 0x1a2   : > { %1378 = vmatprep.subr.mxu1 %v1069_v46  ;;  %1468 = vmatpush2.msra.mxu0 %v1160_v47  ;;  %v1669_v45 = vld [vmem:[#allocation7 + $0x11e0] sm:$0xff]  ;;  %v1666_v47 = vld [vmem:[#allocation7 + $0x11c8] sm:$0xff] }
 0x1a3   : > { %3044 = vmatprep.mubr.msk.f32.mxu0 %vm363_vm0, %v3809_v10  ;;  %1379 = vmatpush2.msra.mxu1 %v1068_v48  ;;  %v1057_v10 = vld [vmem:[#allocation7 + $0x918] sm:$0xff]  ;;  %v1501_v46 = vld [vmem:[#allocation7 + $0xca0] sm:$0xff]  ;;  %v1498_v48 = vld [vmem:[#allocation7 + $0xc88] sm:$0xff] }
 0x1a4   : > { %1470 = vmatmul.mubr.f32.vlgmr.msra.gmra.mxu0 %v3814_v14  ;;  %1723 = vmatprep.subr.mxu0 %v1558_v51  ;;  %v1056_v14 = vld [vmem:[#allocation7 + $0x910] sm:$0xff]  ;;  %v1662_v51 = vld [vmem:[#allocation7 + $0x11a8] sm:$0xff] }
 0x1a5   : > { %1380 = vmatprep.subr.mxu1 %v1065_v52  ;;  %1724 = vmatpush1.msra.mxu0 %v1557_v53  ;;  %v1622_v52 = vld [vmem:[#allocation7 + $0x1068] sm:$0xff]  ;;  %v1661_v53 = vld [vmem:[#allocation7 + $0x11a0] sm:$0xff] }
 0x1a6   : > { %1787 = vmatprep.mubr.f32.mxu0 %v3826_v57  ;;  %1381 = vmatpush2.msra.mxu1 %v1064_v55  ;;  %v1621_v55 = vld [vmem:[#allocation7 + $0x1060] sm:$0xff] }
 0x1a7   : > { %1725 = vmatprep.subr.mxu0 %v1554_v56  ;;  %1382 = vmatprep.subr.mxu1 %v1061_v58  ;;  %v1658_v56 = vld [vmem:[#allocation7 + $0x1188] sm:$0xff] }
 0x1a8   : > { %1726 = vmatpush1.msra.mxu0 %v1553_v59  ;;  %1383 = vmatpush2.msra.mxu1 %v1060_v60  ;;  %v1618_v58 = vld [vmem:[#allocation7 + $0x1048] sm:$0xff]  ;;  %v1657_v59 = vld [vmem:[#allocation7 + $0x1180] sm:$0xff] }
 0x1a9   : > { %1727 = vmatprep.subr.mxu0 %v1550_v61  ;;  %1384 = vmatprep.subr.mxu1 %v1057_v10  ;;  %v1617_v60 = vld [vmem:[#allocation7 + $0x1040] sm:$0xff]  ;;  %v1654_v61 = vld [vmem:[#allocation7 + $0x1168] sm:$0xff] }
 0x1aa   : > { %1728 = vmatpush1.msra.mxu0 %v1549_v62  ;;  %1385 = vmatpush2.msra.mxu1 %v1056_v14  ;;  %v1614_v10 = vld [vmem:[#allocation7 + $0x1028] sm:$0xff]  ;;  %v1653_v62 = vld [vmem:[#allocation7 + $0x1160] sm:$0xff] }
 0x1ab   : > { %1729 = vmatprep.subr.mxu0 %v1546_v63  ;;  %1386 = vmatprep.subr.mxu1 %v1053_v2  ;;  %v1613_v14 = vld [vmem:[#allocation7 + $0x1020] sm:$0xff]  ;;  %v1650_v63 = vld [vmem:[#allocation7 + $0x1148] sm:$0xff] }
 0x1ac   : > { %1730 = vmatpush1.msra.mxu0 %v1545_v3  ;;  %1387 = vmatpush2.msra.mxu1 %v1052_v4  ;;  %v1610_v2 = vld [vmem:[#allocation7 + $0x1008] sm:$0xff]  ;;  %v1649_v3 = vld [vmem:[#allocation7 + $0x1140] sm:$0xff] }
 0x1ad   : > { %1731 = vmatprep.subr.mxu0 %v1542_v5  ;;  %1388 = vmatprep.subr.mxu1 %v1049_v6  ;;  %v1609_v4 = vld [vmem:[#allocation7 + $0x1000] sm:$0xff]  ;;  %v1646_v5 = vld [vmem:[#allocation7 + $0x1128] sm:$0xff] }
 0x1ae   : > { %1732 = vmatpush1.msra.mxu0 %v1541_v7  ;;  %1389 = vmatpush2.msra.mxu1 %v1048_v1  ;;  %v1606_v6 = vld [vmem:[#allocation7 + $0xfe8] sm:$0xff]  ;;  %v1645_v7 = vld [vmem:[#allocation7 + $0x1120] sm:$0xff] }
 0x1af   : > { %1733 = vmatprep.subr.mxu0 %v1538_v8  ;;  %1390 = vmatprep.subr.mxu1 %v1045_v9  ;;  %v1605_v1 = vld [vmem:[#allocation7 + $0xfe0] sm:$0xff]  ;;  %v1642_v8 = vld [vmem:[#allocation7 + $0x1108] sm:$0xff] }
 0x1b0   : > { %1734 = vmatpush1.msra.mxu0 %v1537_v11  ;;  %1391 = vmatpush2.msra.mxu1 %v1044_v12  ;;  %v1602_v9 = vld [vmem:[#allocation7 + $0xfc8] sm:$0xff]  ;;  %v1641_v11 = vld [vmem:[#allocation7 + $0x1100] sm:$0xff] }
 0x1b1   : > { %1735 = vmatprep.subr.mxu0 %v1534_v13  ;;  %1392 = vmatprep.subr.mxu1 %v1041_v15  ;;  %v1601_v12 = vld [vmem:[#allocation7 + $0xfc0] sm:$0xff]  ;;  %v1638_v13 = vld [vmem:[#allocation7 + $0x10e8] sm:$0xff] }
 0x1b2   : > { %1736 = vmatpush1.msra.mxu0 %v1533_v16  ;;  %1393 = vmatpush2.msra.mxu1 %v1040_v17  ;;  %v1598_v15 = vld [vmem:[#allocation7 + $0xfa8] sm:$0xff]  ;;  %v1637_v16 = vld [vmem:[#allocation7 + $0x10e0] sm:$0xff] }
 0x1b3   : > { %1737 = vmatprep.subr.mxu0 %v1530_v18  ;;  %1394 = vmatprep.subr.mxu1 %v1037_v19  ;;  %v1597_v17 = vld [vmem:[#allocation7 + $0xfa0] sm:$0xff]  ;;  %v1634_v18 = vld [vmem:[#allocation7 + $0x10c8] sm:$0xff] }
 0x1b4   : > { %1738 = vmatpush1.msra.mxu0 %v1529_v20  ;;  %1395 = vmatpush2.msra.mxu1 %v1036_v21  ;;  %v1594_v19 = vld [vmem:[#allocation7 + $0xf88] sm:$0xff]  ;;  %v1633_v20 = vld [vmem:[#allocation7 + $0x10c0] sm:$0xff] }
 0x1b5   : > { %1739 = vmatprep.subr.mxu0 %v1526_v24  ;;  %1396 = vmatprep.subr.mxu1 %v1033_v25  ;;  %v1593_v21 = vld [vmem:[#allocation7 + $0xf80] sm:$0xff]  ;;  %v1630_v24 = vld [vmem:[#allocation7 + $0x10a8] sm:$0xff] }
 0x1b6   : > { %1740 = vmatpush1.msra.mxu0 %v1525_v26  ;;  %1397 = vmatpush2.msra.mxu1 %v1032_v27  ;;  %v1590_v25 = vld [vmem:[#allocation7 + $0xf68] sm:$0xff]  ;;  %v1491_v26 = vld [vmem:[#allocation2 + $0x18] sm:$0xfc]  ;;  %v1495_v27 = vld [vmem:[#allocation2 + $0x38] sm:$0x3] }
 0x1b7   : > { %1741 = vmatprep.subr.mxu0 %v1522_v22  ;;  %1399 = vmatmul.mubr.f32.vlgmr.msra.gmra.mxu1 %v3819_v36  ;;  %v1673_v36 = vld [vmem:[#allocation7 + $0x1200] sm:$0xff] }
 0x1b8   : > { %1742 = vmatpush1.msra.mxu0 %v1521_v28  ;;  %1794 = vmatprep.subr.mxu1 %v1686_v54  ;;  %v1629_v22 = vld [vmem:[#allocation7 + $0x10a0] sm:$0xff]  ;;  %v1626_v54 = vld [vmem:[#allocation7 + $0x1088] sm:$0xff] }
 0x1b9   : > { %1743 = vmatprep.subr.mxu0 %v1518_v29  ;;  %1795 = vmatpush1.msra.mxu1 %v1685_v30  ;;  %v1589_v28 = vld [vmem:[#allocation7 + $0xf60] sm:$0xff]  ;;  %v1586_v29 = vld [vmem:[#allocation7 + $0xf48] sm:$0xff]  ;;  %v1490_v30 = vld [vmem:[#allocation2 + $0x10] sm:$0xfc] }
 0x1ba   : > { %1744 = vmatpush1.msra.mxu0 %v1517_v31  ;;  %1796 = vmatprep.subr.mxu1 %v1682_v23  ;;  %v1625_v31 = vld [vmem:[#allocation7 + $0x1080] sm:$0xff] }
 0x1bb   : > { %1745 = vmatprep.subr.mxu0 %v1514_v32  ;;  %1797 = vmatpush1.msra.mxu1 %v1681_v33  ;;  %v1585_v23 = vld [vmem:[#allocation7 + $0xf40] sm:$0xff]  ;;  %v1715_v32 = vrot.slane %v1491_v26, 2  ;;  %v1716_v33 = vrot.slane %v1495_v27, 2  ;;  %v1672_v26 = vld [vmem:[#allocation7 + $0x11f8] sm:$0xff] }
 0x1bc   : > { %1746 = vmatpush1.msra.mxu0 %v1513_v34  ;;  %1798 = vmatprep.subr.mxu1 %v1678_v35  ;;  %v1494_v34 = vld [vmem:[#allocation2 + $0x30] sm:$0x3]  ;;  %v1694_v35 = vld [vmem:[#allocation7 + $0x12a8] sm:$0xff]  ;;  %v1524_v27 = vld [vmem:[#allocation7 + $0xd58] sm:$0xff] }
 0x1bd   : > { %1747 = vmatprep.subr.mxu0 %v1510_v37  ;;  %1799 = vmatpush1.msra.mxu1 %v1677_v38  ;;  %v1582_v37 = vld [vmem:[#allocation7 + $0xf28] sm:$0xff]  ;;  %v1693_v38 = vld [vmem:[#allocation7 + $0x12a0] sm:$0xff] }
 0x1be   : > { %1748 = vmatpush1.msra.mxu0 %v1509_v39  ;;  %1800 = vmatprep.subr.mxu1 %v1674_v40  ;;  %v1581_v39 = vld [vmem:[#allocation7 + $0xf20] sm:$0xff]  ;;  %v1690_v40 = vld [vmem:[#allocation7 + $0x1288] sm:$0xff] }
 0x1bf   : > { %1749 = vmatprep.subr.mxu0 %v1506_v41  ;;  %1801 = vmatpush1.msra.mxu1 %v1673_v36  ;;  %v1578_v41 = vld [vmem:[#allocation7 + $0xf08] sm:$0xff]  ;;  %v1712_v36 = vrot.slane %v1490_v30, 2  ;;  %v1667_v30 = vld [vmem:[#allocation7 + $0x11d0] sm:$0xff] }
 0x1c0   : > { %1750 = vmatpush1.msra.mxu0 %v1505_v42  ;;  %1802 = vmatprep.subr.mxu1 %v1670_v43  ;;  %v1713_v42 = vrot.slane %v1494_v34, 2  ;;  %v1689_v43 = vld [vmem:[#allocation7 + $0x1280] sm:$0xff]  ;;  %v1515_v34 = vld [vmem:[#allocation7 + $0xd10] sm:$0xff] }
 0x1c1   : > { %1751 = vmatprep.subr.mxu0 %v1502_v44  ;;  %1803 = vmatpush1.msra.mxu1 %v1669_v45  ;;  %v3831_v44 = vsel %vm1705_vm8, %v1715_v32, %v1716_v33  ;;  %v1577_v45 = vld [vmem:[#allocation7 + $0xf00] sm:$0xff]  ;;  %v1516_v32 = vld [vmem:[#allocation7 + $0xd18] sm:$0xff]  ;;  %v1663_v33 = vld [vmem:[#allocation7 + $0x11b0] sm:$0xff] }
 0x1c2   : > { %1752 = vmatpush1.msra.mxu0 %v1501_v46  ;;  %1804 = vmatprep.subr.mxu1 %v1666_v47  ;;  %v1560_v46 = vld [vmem:[#allocation7 + $0xe78] sm:$0xff]  ;;  %v1574_v47 = vld [vmem:[#allocation7 + $0xee8] sm:$0xff] }
 0x1c3   : > { %1753 = vmatprep.subr.mxu0 %v1498_v48  ;;  %1805 = vmatpush1.msra.mxu1 %v1665_v49  ;;  %v3836_v48 = vsel %vm1705_vm8, %v1712_v36, %v1713_v42  ;;  %v1559_v49 = vld [vmem:[#allocation7 + $0xe70] sm:$0xff] }
 0x1c4   : > { %1754 = vmatpush1.msra.mxu0 %v1497_v50  ;;  %1806 = vmatprep.subr.mxu1 %v1662_v51  ;;  %v1573_v50 = vld [vmem:[#allocation7 + $0xee0] sm:$0xff]  ;;  %v1556_v51 = vld [vmem:[#allocation7 + $0xe58] sm:$0xff]  ;;  %v1655_v36 = vld [vmem:[#allocation7 + $0x1170] sm:$0xff] }
 0x1c5   : > { %1755 = vmatprep.subr.mxu0 %v1622_v52  ;;  %1807 = vmatpush1.msra.mxu1 %v1661_v53  ;;  %v1570_v52 = vld [vmem:[#allocation7 + $0xec8] sm:$0xff]  ;;  %v1555_v53 = vld [vmem:[#allocation7 + $0xe50] sm:$0xff] }
 0x1c6   : > { %1756 = vmatpush2.msra.mxu0 %v1621_v55  ;;  %1808 = vmatprep.subr.mxu1 %v1658_v56  ;;  %v1488_v55 = vld [vmem:[#allocation2] sm:$0xfc]  ;;  %v1507_v42 = vld [vmem:[#allocation7 + $0xcd0] sm:$0xff] }
 0x1c7   : > { %1757 = vmatprep.subr.mxu0 %v1618_v58  ;;  %1809 = vmatpush1.msra.mxu1 %v1657_v59  ;;  %v1569_v56 = vld [vmem:[#allocation7 + $0xec0] sm:$0xff]  ;;  %v1552_v58 = vld [vmem:[#allocation7 + $0xe38] sm:$0xff] }
 0x1c8   : > { %1758 = vmatpush2.msra.mxu0 %v1617_v60  ;;  %1810 = vmatprep.subr.mxu1 %v1654_v61  ;;  %v1492_v59 = vld [vmem:[#allocation2 + $0x20] sm:$0x3]  ;;  %v1566_v60 = vld [vmem:[#allocation7 + $0xea8] sm:$0xff]  ;;  %v1551_v61 = vld [vmem:[#allocation7 + $0xe30] sm:$0xff] }
 0x1c9   : > { %1759 = vmatprep.subr.mxu0 %v1614_v10  ;;  %1811 = vmatpush1.msra.mxu1 %v1653_v62  ;;  %v1565_v10 = vld [vmem:[#allocation7 + $0xea0] sm:$0xff]  ;;  %v1548_v62 = vld [vmem:[#allocation7 + $0xe18] sm:$0xff] }
 0x1ca   : > { %1760 = vmatpush2.msra.mxu0 %v1613_v14  ;;  %1812 = vmatprep.subr.mxu1 %v1650_v63  ;;  %v1562_v14 = vld [vmem:[#allocation7 + $0xe88] sm:$0xff]  ;;  %v1547_v63 = vld [vmem:[#allocation7 + $0xe10] sm:$0xff] }
 0x1cb   : > { %1761 = vmatprep.subr.mxu0 %v1610_v2  ;;  %1813 = vmatpush1.msra.mxu1 %v1649_v3  ;;  %v1706_v2 = vrot.slane %v1488_v55, 2  ;;  %v1707_v3 = vrot.slane %v1492_v59, 2  ;;  %v1624_v55 = vld [vmem:[#allocation7 + $0x1078] sm:$0xff] }
 0x1cc   : > { %1762 = vmatpush2.msra.mxu0 %v1609_v4  ;;  %1814 = vmatprep.subr.mxu1 %v1646_v5  ;;  %v1544_v4 = vld [vmem:[#allocation7 + $0xdf8] sm:$0xff]  ;;  %v1543_v5 = vld [vmem:[#allocation7 + $0xdf0] sm:$0xff] }
 0x1cd   : > { %1763 = vmatprep.subr.mxu0 %v1606_v6  ;;  %1815 = vmatpush1.msra.mxu1 %v1645_v7  ;;  %v1688_v6 = vld [vmem:[#allocation7 + $0x1278] sm:$0xff] }
 0x1ce   : > { %1764 = vmatpush2.msra.mxu0 %v1605_v1  ;;  %1816 = vmatprep.subr.mxu1 %v1642_v8  ;;  %v1540_v7 = vld [vmem:[#allocation7 + $0xdd8] sm:$0xff]  ;;  %v3841_v1 = vsel %vm1705_vm8, %v1706_v2, %v1707_v3  ;;  %v1687_v8 = vld [vmem:[#allocation7 + $0x1270] sm:$0xff] }
 0x1cf   : > { %1765 = vmatprep.subr.mxu0 %v1602_v9  ;;  %1817 = vmatpush1.msra.mxu1 %v1641_v11  ;;  %v1539_v9 = vld [vmem:[#allocation7 + $0xdd0] sm:$0xff]  ;;  %v1684_v11 = vld [vmem:[#allocation7 + $0x1258] sm:$0xff] }
 0x1d0   : > { %1766 = vmatpush2.msra.mxu0 %v1601_v12  ;;  %1818 = vmatprep.subr.mxu1 %v1638_v13  ;;  %v1536_v12 = vld [vmem:[#allocation7 + $0xdb8] sm:$0xff]  ;;  %v1683_v13 = vld [vmem:[#allocation7 + $0x1250] sm:$0xff] }
 0x1d1   : > { %1767 = vmatprep.subr.mxu0 %v1598_v15  ;;  %1819 = vmatpush1.msra.mxu1 %v1637_v16  ;;  %v1535_v15 = vld [vmem:[#allocation7 + $0xdb0] sm:$0xff]  ;;  %v1680_v16 = vld [vmem:[#allocation7 + $0x1238] sm:$0xff] }
 0x1d2   : > { %1768 = vmatpush2.msra.mxu0 %v1597_v17  ;;  %1820 = vmatprep.subr.mxu1 %v1634_v18  ;;  %v1532_v17 = vld [vmem:[#allocation7 + $0xd98] sm:$0xff]  ;;  %v1679_v18 = vld [vmem:[#allocation7 + $0x1230] sm:$0xff] }
 0x1d3   : > { %1769 = vmatprep.subr.mxu0 %v1594_v19  ;;  %1821 = vmatpush1.msra.mxu1 %v1633_v20  ;;  %v1531_v19 = vld [vmem:[#allocation7 + $0xd90] sm:$0xff]  ;;  %v1676_v20 = vld [vmem:[#allocation7 + $0x1218] sm:$0xff] }
 0x1d4   : > { %1770 = vmatpush2.msra.mxu0 %v1593_v21  ;;  %1822 = vmatprep.subr.mxu1 %v1630_v24  ;;  %v1528_v21 = vld [vmem:[#allocation7 + $0xd78] sm:$0xff]  ;;  %v1675_v24 = vld [vmem:[#allocation7 + $0x1210] sm:$0xff] }
 0x1d5   : > { %1771 = vmatprep.subr.mxu0 %v1590_v25  ;;  %1823 = vmatpush1.msra.mxu1 %v1629_v22  ;;  %v1527_v25 = vld [vmem:[#allocation7 + $0xd70] sm:$0xff]  ;;  %v1640_v59 = vld [vmem:[#allocation7 + $0x10f8] sm:$0xff] }
 0x1d6   : > { %1772 = vmatpush2.msra.mxu0 %v1589_v28  ;;  %1824 = vmatprep.subr.mxu1 %v1626_v54  ;;  %v1671_v22 = vld [vmem:[#allocation7 + $0x11f0] sm:$0xff]  ;;  %v1668_v54 = vld [vmem:[#allocation7 + $0x11d8] sm:$0xff] }
 0x1d7   : > { %1773 = vmatprep.subr.mxu0 %v1586_v29  ;;  %1825 = vmatpush1.msra.mxu1 %v1625_v31  ;;  %v1523_v28 = vld [vmem:[#allocation7 + $0xd50] sm:$0xff]  ;;  %v1520_v29 = vld [vmem:[#allocation7 + $0xd38] sm:$0xff] }
 0x1d8   : > { %1774 = vmatpush2.msra.mxu0 %v1585_v23  ;;  %1854 = vmatprep.subr.mxu1 %v1694_v35  ;;  %v1519_v31 = vld [vmem:[#allocation7 + $0xd30] sm:$0xff]  ;;  %v1664_v23 = vld [vmem:[#allocation7 + $0x11b8] sm:$0xff] }
 0x1d9   : > { %1775 = vmatprep.subr.mxu0 %v1582_v37  ;;  %1855 = vmatpush2.msra.mxu1 %v1693_v38  ;;  %v1660_v35 = vld [vmem:[#allocation7 + $0x1198] sm:$0xff]  ;;  %v1659_v38 = vld [vmem:[#allocation7 + $0x1190] sm:$0xff] }
 0x1da   : > { %1776 = vmatpush2.msra.mxu0 %v1581_v39  ;;  %1856 = vmatprep.subr.mxu1 %v1690_v40  ;;  %v1512_v37 = vld [vmem:[#allocation7 + $0xcf8] sm:$0xff]  ;;  %v1511_v39 = vld [vmem:[#allocation7 + $0xcf0] sm:$0xff] }
 0x1db   : > { %1777 = vmatprep.subr.mxu0 %v1578_v41  ;;  %1857 = vmatpush2.msra.mxu1 %v1689_v43  ;;  %v1656_v40 = vld [vmem:[#allocation7 + $0x1178] sm:$0xff]  ;;  %v1615_v2 = vld [vmem:[#allocation7 + $0x1030] sm:$0xff] }
 0x1dc   : > { %3045 = vmatprep.mubr.msk.f32.mxu1 %vm363_vm0, %v3831_v44  ;;  %1778 = vmatpush2.msra.mxu0 %v1577_v45  ;;  %v1508_v41 = vld [vmem:[#allocation7 + $0xcd8] sm:$0xff] }
 0x1dd   : > { %1859 = vmatmul.mubr.f32.vlgmr.msra.gmra.mxu1 %v3836_v48  ;;  %1865 = vmatprep.subr.mxu1 %v1560_v46  ;;  %v1652_v43 = vld [vmem:[#allocation7 + $0x1158] sm:$0xff]  ;;  %v1651_v46 = vld [vmem:[#allocation7 + $0x1150] sm:$0xff] }
 0x1de   : > { %1779 = vmatprep.subr.mxu0 %v1574_v47  ;;  %1866 = vmatpush1.msra.mxu1 %v1559_v49  ;;  %v1504_v45 = vld [vmem:[#allocation7 + $0xcb8] sm:$0xff]  ;;  %v1503_v47 = vld [vmem:[#allocation7 + $0xcb0] sm:$0xff] }
 0x1df   : > { %1929 = vmatprep.mubr.f32.mxu1 %v3826_v57  ;;  %1780 = vmatpush2.msra.mxu0 %v1573_v50  ;;  %v1561_v57 = vld [vmem:[#allocation7 + $0xe80] sm:$0xff]  ;;  %v1648_v49 = vld [vmem:[#allocation7 + $0x1138] sm:$0xff] }
 0x1e0   : > { %1867 = vmatprep.subr.mxu1 %v1556_v51  ;;  %1781 = vmatprep.subr.mxu0 %v1570_v52  ;;  %v1500_v50 = vld [vmem:[#allocation7 + $0xc98] sm:$0xff]  ;;  %v1647_v51 = vld [vmem:[#allocation7 + $0x1130] sm:$0xff] }
 0x1e1   : > { %1868 = vmatpush1.msra.mxu1 %v1555_v53  ;;  %1782 = vmatpush2.msra.mxu0 %v1569_v56  ;;  %v1499_v52 = vld [vmem:[#allocation7 + $0xc90] sm:$0xff]  ;;  %v1644_v53 = vld [vmem:[#allocation7 + $0x1118] sm:$0xff] }
 0x1e2   : > { %1869 = vmatprep.subr.mxu1 %v1552_v58  ;;  %1783 = vmatprep.subr.mxu0 %v1566_v60  ;;  %v1643_v56 = vld [vmem:[#allocation7 + $0x1110] sm:$0xff]  ;;  %v1620_v60 = vld [vmem:[#allocation7 + $0x1058] sm:$0xff] }
 0x1e3   : > { %1870 = vmatpush1.msra.mxu1 %v1551_v61  ;;  %1784 = vmatpush2.msra.mxu0 %v1565_v10  ;;  %v1623_v58 = vld [vmem:[#allocation7 + $0x1070] sm:$0xff]  ;;  %v1632_v3 = vld [vmem:[#allocation7 + $0x10b8] sm:$0xff] }
 0x1e4   : > { %1871 = vmatprep.subr.mxu1 %v1548_v62  ;;  %1785 = vmatprep.subr.mxu0 %v1562_v14  ;;  %v1639_v61 = vld [vmem:[#allocation7 + $0x10f0] sm:$0xff]  ;;  %v1636_v62 = vld [vmem:[#allocation7 + $0x10d8] sm:$0xff] }
 0x1e5   : > { %1872 = vmatpush1.msra.mxu1 %v1547_v63  ;;  %1786 = vmatpush2.msra.mxu0 %v1561_v57  ;;  %v1619_v10 = vld [vmem:[#allocation7 + $0x1050] sm:$0xff]  ;;  %v1616_v14 = vld [vmem:[#allocation7 + $0x1038] sm:$0xff] }
 0x1e6   : > { %1873 = vmatprep.subr.mxu1 %v1544_v4  ;;  %1788 = vmatmul.mubr.f32.vlgmr.msra.gmra.mxu0 %v3841_v1  ;;  %v1635_v63 = vld [vmem:[#allocation7 + $0x10d0] sm:$0xff]  ;;  %v1612_v57 = vld [vmem:[#allocation7 + $0x1018] sm:$0xff] }
 0x1e7   : > { %1874 = vmatpush1.msra.mxu1 %v1543_v5  ;;  %1936 = vmatprep.subr.mxu0 %v1688_v6  ;;  %v1631_v4 = vld [vmem:[#allocation7 + $0x10b0] sm:$0xff]  ;;  %v1628_v6 = vld [vmem:[#allocation7 + $0x1098] sm:$0xff] }
 0x1e8   : > { %1875 = vmatprep.subr.mxu1 %v1540_v7  ;;  %1937 = vmatpush1.msra.mxu0 %v1687_v8  ;;  %v1611_v5 = vld [vmem:[#allocation7 + $0x1010] sm:$0xff]  ;;  %v1608_v7 = vld [vmem:[#allocation7 + $0xff8] sm:$0xff] }
 0x1e9   : > { %1876 = vmatpush1.msra.mxu1 %v1539_v9  ;;  %1938 = vmatprep.subr.mxu0 %v1684_v11  ;;  %v1627_v8 = vld [vmem:[#allocation7 + $0x1090] sm:$0xff]  ;;  %v1696_v11 = vld [vmem:[#allocation7 + $0x12b8] sm:$0xff] }
 0x1ea   : > { %1877 = vmatprep.subr.mxu1 %v1536_v12  ;;  %1939 = vmatpush1.msra.mxu0 %v1683_v13  ;;  %v1607_v9 = vld [vmem:[#allocation7 + $0xff0] sm:$0xff]  ;;  %v1604_v12 = vld [vmem:[#allocation7 + $0xfd8] sm:$0xff] }
 0x1eb   : > { %1878 = vmatpush1.msra.mxu1 %v1535_v15  ;;  %1940 = vmatprep.subr.mxu0 %v1680_v16  ;;  %v1695_v13 = vld [vmem:[#allocation7 + $0x12b0] sm:$0xff]  ;;  %v1692_v16 = vld [vmem:[#allocation7 + $0x1298] sm:$0xff] }
 0x1ec   : > { %1879 = vmatprep.subr.mxu1 %v1532_v17  ;;  %1941 = vmatpush1.msra.mxu0 %v1679_v18  ;;  %v1603_v15 = vld [vmem:[#allocation7 + $0xfd0] sm:$0xff]  ;;  %v1600_v17 = vld [vmem:[#allocation7 + $0xfb8] sm:$0xff]  ;;  %v3844_v18 = vpop.f32.mrf.mxu0 }
 0x1ed   : > { %1880 = vmatpush1.msra.mxu1 %v1531_v19  ;;  %1942 = vmatprep.subr.mxu0 %v1676_v20  ;;  %v1691_v19 = vld [vmem:[#allocation7 + $0x1290] sm:$0xff] }
 0x1ee   : > { %1881 = vmatprep.subr.mxu1 %v1528_v21  ;;  %1943 = vmatpush1.msra.mxu0 %v1675_v24  ;;  %v1599_v20 = vld [vmem:[#allocation7 + $0xfb0] sm:$0xff]  ;;  %v3846_v21 = vpop.f32.mrf.mxu1  ;;  %v1596_v24 = vld [vmem:[#allocation7 + $0xf98] sm:$0xff] }
 0x1ef   : > { %1882 = vmatpush1.msra.mxu1 %v1527_v25  ;;  %1944 = vmatprep.subr.mxu0 %v1672_v26  ;;  %v3851_v25 = vld [vmem:[%s4461_s5 + $0xf8] sm:$0xff]  ;;  %v1595_v26 = vld [vmem:[#allocation7 + $0xf90] sm:$0xff] }
 0x1f0   : > { %1883 = vmatprep.subr.mxu1 %v1524_v27  ;;  %1945 = vmatpush1.msra.mxu0 %v1671_v22  ;;  %v3858_v27 = vld [vmem:[%s4461_s5 + $0x78] sm:$0xff]  ;;  %v3860_v22 = vpop.f32.mrf.mxu0 }
 0x1f1   : > { %1884 = vmatpush1.msra.mxu1 %v1523_v28  ;;  %1946 = vmatprep.subr.mxu0 %v1668_v54  ;;  %v1592_v28 = vld [vmem:[#allocation7 + $0xf78] sm:$0xff]  ;;  %v1591_v54 = vld [vmem:[#allocation7 + $0xf70] sm:$0xff] }
 0x1f2   : > { %1885 = vmatprep.subr.mxu1 %v1520_v29  ;;  %1947 = vmatpush1.msra.mxu0 %v1667_v30  ;;  %v3864_v29 = vpop.f32.mrf.mxu1 }
 0x1f3   : > { %1886 = vmatpush1.msra.mxu1 %v1519_v31  ;;  %1948 = vmatprep.subr.mxu0 %v1664_v23  ;;  %v1587_v31 = vld [vmem:[#allocation7 + $0xf50] sm:$0xff]  ;;  %v1584_v23 = vld [vmem:[#allocation7 + $0xf38] sm:$0xff] }
 0x1f4   : > { %1887 = vmatprep.subr.mxu1 %v1516_v32  ;;  %1949 = vmatpush1.msra.mxu0 %v1663_v33  ;;  %v1583_v33 = vld [vmem:[#allocation7 + $0xf30] sm:$0xff] }
 0x1f5   : > { %1888 = vmatpush1.msra.mxu1 %v1515_v34  ;;  %1950 = vmatprep.subr.mxu0 %v1660_v35  ;;  %v1580_v35 = vld [vmem:[#allocation7 + $0xf18] sm:$0xff] }
 0x1f6   : > { %1889 = vmatprep.subr.mxu1 %v1512_v37  ;;  %1951 = vmatpush1.msra.mxu0 %v1659_v38  ;;  %v1579_v38 = vld [vmem:[#allocation7 + $0xf10] sm:$0xff] }
 0x1f7   : > { %1890 = vmatpush1.msra.mxu1 %v1511_v39  ;;  %1952 = vmatprep.subr.mxu0 %v1656_v40  ;;  %v1576_v40 = vld [vmem:[#allocation7 + $0xef8] sm:$0xff] }
 0x1f8   : > { %1891 = vmatprep.subr.mxu1 %v1508_v41  ;;  %1953 = vmatpush1.msra.mxu0 %v1655_v36  ;;  %v1575_v41 = vld [vmem:[#allocation7 + $0xef0] sm:$0xff]  ;;  %v1572_v36 = vld [vmem:[#allocation7 + $0xed8] sm:$0xff] }
 0x1f9   : > { %1892 = vmatpush1.msra.mxu1 %v1507_v42  ;;  %1954 = vmatprep.subr.mxu0 %v1652_v43  ;;  %v1571_v42 = vld [vmem:[#allocation7 + $0xed0] sm:$0xff]  ;;  %v1568_v43 = vld [vmem:[#allocation7 + $0xeb8] sm:$0xff] }
 0x1fa   : > { %1893 = vmatprep.subr.mxu1 %v1504_v45  ;;  %1955 = vmatpush1.msra.mxu0 %v1651_v46  ;;  %v1567_v45 = vld [vmem:[#allocation7 + $0xeb0] sm:$0xff]  ;;  %v1564_v46 = vld [vmem:[#allocation7 + $0xe98] sm:$0xff] }
 0x1fb   : > { %1894 = vmatpush1.msra.mxu1 %v1503_v47  ;;  %1956 = vmatprep.subr.mxu0 %v1648_v49  ;;  %v1563_v47 = vld [vmem:[#allocation7 + $0xe90] sm:$0xff] }
 0x1fc   : > { %1895 = vmatprep.subr.mxu1 %v1500_v50  ;;  %1957 = vmatpush1.msra.mxu0 %v1647_v51  ;;  %v944_v30 = vpop.f32.mrf.mxu0  ;;  %v3874_v49 = vld [vmem:[%s4461_s5 + $0xf0] sm:$0xff]  ;;  %v3887_v51 = vld [vmem:[%s4461_s5 + $0xe8] sm:$0xff] }
 0x1fd   : > { %1896 = vmatpush1.msra.mxu1 %v1499_v52  ;;  %1958 = vmatprep.subr.mxu0 %v1644_v53  ;;  %v3879_v50 = vld [vmem:[%s4461_s5 + $0x70] sm:$0xff]  ;;  %v3892_v52 = vld [vmem:[%s4461_s5 + $0x68] sm:$0xff]  ;;  %v3897_v53 = vld [vmem:[%s4461_s5 + $0xe0] sm:$0xff] }
 0x1fe   : > { %1897 = vmatprep.subr.mxu1 %v1624_v55  ;;  %1959 = vmatpush1.msra.mxu0 %v1643_v56  ;;  %v946_v34 = vpop.f32.mrf.mxu0  ;;  %v3909_v55 = vld [vmem:[%s4461_s5 + $0xd8] sm:$0xff] }
 0x1ff   : > { %1898 = vmatpush2.msra.mxu1 %v1623_v58  ;;  %1960 = vmatprep.subr.mxu0 %v1640_v59  ;;  %v3915_v56 = vld [vmem:[%s4461_s5 + $0x58] sm:$0xff]  ;;  %v3921_v58 = vld [vmem:[%s4461_s5 + $0xd0] sm:$0xff] }
 0x200   : > { %1899 = vmatprep.subr.mxu1 %v1620_v60  ;;  %1961 = vmatpush1.msra.mxu0 %v1639_v61  ;;  %v3929_v59 = vld [vmem:[%s4461_s5 + $0x50] sm:$0xff]  ;;  %v3935_v60 = vld [vmem:[%s4461_s5 + $0xc8] sm:$0xff] }
 0x201   : > { %1900 = vmatpush2.msra.mxu1 %v1619_v10  ;;  %1962 = vmatprep.subr.mxu0 %v1636_v62  ;;  %v3941_v61 = vld [vmem:[%s4461_s5 + $0x48] sm:$0xff]  ;;  %v3947_v10 = vld [vmem:[%s4461_s5 + $0xc0] sm:$0xff] }
 0x202   : > { %1901 = vmatprep.subr.mxu1 %v1616_v14  ;;  %1963 = vmatpush1.msra.mxu0 %v1635_v63  ;;  %v3953_v62 = vld [vmem:[%s4461_s5 + $0x40] sm:$0xff]  ;;  %v3959_v14 = vld [vmem:[%s4461_s5 + $0xb8] sm:$0xff] }
 0x203   : > { %1902 = vmatpush2.msra.mxu1 %v1615_v2  ;;  %1964 = vmatprep.subr.mxu0 %v1632_v3  ;;  %v3965_v63 = vld [vmem:[%s4461_s5 + $0x38] sm:$0xff]  ;;  %v3971_v2 = vld [vmem:[%s4461_s5 + $0xb0] sm:$0xff] }
 0x204   : > { %1903 = vmatprep.subr.mxu1 %v1612_v57  ;;  %1965 = vmatpush1.msra.mxu0 %v1631_v4  ;;  %v3976_v3 = vld [vmem:[%s4461_s5 + $0x30] sm:$0xff]  ;;  %v3981_v57 = vld [vmem:[%s4461_s5 + $0xa8] sm:$0xff] }
 0x205   : > { %1904 = vmatpush2.msra.mxu1 %v1611_v5  ;;  %1966 = vmatprep.subr.mxu0 %v1628_v6  ;;  %v3987_v4 = vld [vmem:[%s4461_s5 + $0x28] sm:$0xff]  ;;  %v3993_v5 = vld [vmem:[%s4461_s5 + $0xa0] sm:$0xff] }
 0x206   : > { %1905 = vmatprep.subr.mxu1 %v1608_v7  ;;  %1967 = vmatpush1.msra.mxu0 %v1627_v8  ;;  %v3999_v6 = vld [vmem:[%s4461_s5 + $0x20] sm:$0xff]  ;;  %v4005_v7 = vld [vmem:[%s4461_s5 + $0x98] sm:$0xff] }
 0x207   : > { %1906 = vmatpush2.msra.mxu1 %v1607_v9  ;;  %1996 = vmatprep.subr.mxu0 %v1696_v11  ;;  %v4011_v8 = vld [vmem:[%s4461_s5 + $0x18] sm:$0xff]  ;;  %v4017_v9 = vld [vmem:[%s4461_s5 + $0x90] sm:$0xff] }
 0x208   : > { %1907 = vmatprep.subr.mxu1 %v1604_v12  ;;  %1997 = vmatpush2.msra.mxu0 %v1695_v13  ;;  %v4023_v11 = vld [vmem:[%s4461_s5 + $0x10] sm:$0xff]  ;;  %v4029_v12 = vld [vmem:[%s4461_s5 + $0x88] sm:$0xff] }
 0x209   : > { %1908 = vmatpush2.msra.mxu1 %v1603_v15  ;;  %1998 = vmatprep.subr.mxu0 %v1692_v16  ;;  %v4035_v13 = vld [vmem:[%s4461_s5 + $0x8] sm:$0xff]  ;;  %v4041_v15 = vld [vmem:[%s4461_s5 + $0x80] sm:$0xff] }
 0x20a   : > { %1909 = vmatprep.subr.mxu1 %v1600_v17  ;;  %1999 = vmatpush2.msra.mxu0 %v1691_v19  ;;  %v4047_v16 = vld [vmem:[%s4461_s5] sm:$0xff]  ;;  %v4056_v17 = vld [vmem:[%s4461_s5 + $0x1f8] sm:$0xff] }
 0x20b   : > { %3046 = vmatprep.mubr.msk.f32.mxu0 %vm363_vm0, %v3831_v44  ;;  %1910 = vmatpush2.msra.mxu1 %v1599_v20  ;;  %v1588_v44 = vld [vmem:[#allocation7 + $0xf58] sm:$0xff]  ;;  %v4068_v20 = vld [vmem:[%s4461_s5 + $0x1f0] sm:$0xff]  ;;  %vm2479_vm0 = vcmask 1041408  }
 0x20c   : > { %2001 = vmatmul.mubr.f32.vlgmr.msra.gmra.mxu0 %v3836_v48  ;;  %1911 = vmatprep.subr.mxu1 %v1596_v24  ;;  %v4062_v19 = vld [vmem:[%s4461_s5 + $0x178] sm:$0xff]  ;;  %v4074_v24 = vld [vmem:[%s4461_s5 + $0x170] sm:$0xff] }
 0x20d   : > { %3066 = vmatprep.subr.mxu0 %v3851_v25  ;;  %1912 = vmatpush2.msra.mxu1 %v1595_v26  ;;  %4519 = vst [vmem:[#allocation21_spill] sm:$0xff] %v4074_v24  ;;  %v4086_v26 = vld [vmem:[%s4461_s5 + $0x168] sm:$0xff] }
 0x20e   : > { %3067 = vmatpush3.msra.mxu0 %v3858_v27  ;;  %1913 = vmatprep.subr.mxu1 %v1592_v28  ;;  %4521 = vst [vmem:[#allocation23_spill] sm:$0xff] %v4086_v26  ;;  %v4092_v28 = vld [vmem:[%s4461_s5 + $0x1e0] sm:$0xff] }
 0x20f   : > { %1914 = vmatpush2.msra.mxu1 %v1591_v54  ;;  %v873_v32 = vpop.f32.mrf.mxu1  ;;  %3068 = vmatprep.subr.mxu0 %v3874_v49  ;;  %4522 = vst [vmem:[#allocation24_spill] sm:$0xff] %v4092_v28  ;;  %v4098_v54 = vld [vmem:[%s4461_s5 + $0x160] sm:$0xff] }
 0x210   : > { %1915 = vmatprep.subr.mxu1 %v1588_v44  ;;  %v3867_v48 = vadd.f32 %v944_v30, %v873_v32  ;;  %3069 = vmatpush3.msra.mxu0 %v3879_v50  ;;  %4523 = vst [vmem:[#allocation25_spill] sm:$0xff] %v4098_v54  ;;  %v4104_v30 = vld [vmem:[%s4461_s5 + $0x1d8] sm:$0xff]  ;;  %v4128_v32 = vld [vmem:[%s4461_s5 + $0x1c8] sm:$0xff] }
 0x211   : > { %1916 = vmatpush2.msra.mxu1 %v1587_v31  ;;  %v875_v37 = vpop.f32.mrf.mxu1  ;;  %3070 = vmatprep.subr.mxu0 %v3887_v51  ;;  %4524 = vst [vmem:[#allocation26_spill] sm:$0xff] %v4104_v30  ;;  %v4110_v44 = vld [vmem:[%s4461_s5 + $0x158] sm:$0xff]  ;;  %v4116_v31 = vld [vmem:[%s4461_s5 + $0x1d0] sm:$0xff]  ;;  %4528 = vst [vmem:[#allocation30_spill] sm:$0xff] %v4128_v32 }
 0x212   : > { %1917 = vmatprep.subr.mxu1 %v1584_v23  ;;  %v3869_v39 = vadd.f32 %v946_v34, %v875_v37  ;;  %3071 = vmatpush3.msra.mxu0 %v3892_v52  ;;  %4525 = vst [vmem:[#allocation27_spill] sm:$0xff] %v4110_v44  ;;  %4526 = vst [vmem:[#allocation28_spill] sm:$0xff] %v4116_v31  ;;  %v4122_v23 = vld [vmem:[%s4461_s5 + $0x150] sm:$0xff]  ;;  %v4140_v34 = vld [vmem:[%s4461_s5 + $0x1c0] sm:$0xff] }
 0x213   : > { %1918 = vmatpush2.msra.mxu1 %v1583_v33  ;;  %3072 = vmatprep.subr.mxu0 %v3897_v53  ;;  %4527 = vst [vmem:[#allocation29_spill] sm:$0xff] %v4122_v23  ;;  %v4134_v33 = vld [vmem:[%s4461_s5 + $0x148] sm:$0xff]  ;;  %4530 = vst [vmem:[#allocation32_spill] sm:$0xff] %v4140_v34  ;;  %v4152_v37 = vld [vmem:[%s4461_s5 + $0x1b8] sm:$0xff] }
 0x214   : > { %1919 = vmatprep.subr.mxu1 %v1580_v35  ;;  %4529 = vst [vmem:[#allocation31_spill] sm:$0xff] %v4134_v33  ;;  %v4146_v35 = vld [vmem:[%s4461_s5 + $0x140] sm:$0xff]  ;;  %4532 = vst [vmem:[#allocation34_spill] sm:$0xff] %v4152_v37 }
 0x215   : > { %1920 = vmatpush2.msra.mxu1 %v1579_v38  ;;  %4531 = vst [vmem:[#allocation33_spill] sm:$0xff] %v4146_v35  ;;  %v4158_v38 = vld [vmem:[%s4461_s5 + $0x138] sm:$0xff] }
 0x216   : > { %1921 = vmatprep.subr.mxu1 %v1576_v40  ;;  %4533 = vst [vmem:[#allocation35_spill] sm:$0xff] %v4158_v38  ;;  %v4164_v40 = vld [vmem:[%s4461_s5 + $0x1b0] sm:$0xff] }
 0x217   : > { %1922 = vmatpush2.msra.mxu1 %v1575_v41  ;;  %4534 = vst [vmem:[#allocation36_spill] sm:$0xff] %v4164_v40  ;;  %v4170_v41 = vld [vmem:[%s4461_s5 + $0x130] sm:$0xff] }
 0x218   : > { %1923 = vmatprep.subr.mxu1 %v1572_v36  ;;  %4535 = vst [vmem:[#allocation37_spill] sm:$0xff] %v4170_v41  ;;  %v4175_v36 = vld [vmem:[%s4461_s5 + $0x1a8] sm:$0xff] }
 0x219   : > { %1924 = vmatpush2.msra.mxu1 %v1571_v42  ;;  %4536 = vst [vmem:[#allocation38_spill] sm:$0xff] %v4175_v36  ;;  %v4180_v42 = vld [vmem:[%s4461_s5 + $0x128] sm:$0xff] }
 0x21a   : > { %1925 = vmatprep.subr.mxu1 %v1568_v43  ;;  %4537 = vst [vmem:[#allocation39_spill] sm:$0xff] %v4180_v42  ;;  %v4186_v43 = vld [vmem:[%s4461_s5 + $0x1a0] sm:$0xff] }
 0x21b   : > { %1926 = vmatpush2.msra.mxu1 %v1567_v45  ;;  %4538 = vst [vmem:[#allocation40_spill] sm:$0xff] %v4186_v43  ;;  %v4192_v45 = vld [vmem:[%s4461_s5 + $0x120] sm:$0xff] }
 0x21c   : > { %1927 = vmatprep.subr.mxu1 %v1564_v46  ;;  %4539 = vst [vmem:[#allocation41_spill] sm:$0xff] %v4192_v45  ;;  %v4198_v46 = vld [vmem:[%s4461_s5 + $0x198] sm:$0xff] }
 0x21d   : > { %1928 = vmatpush2.msra.mxu1 %v1563_v47  ;;  %4540 = vst [vmem:[#allocation42_spill] sm:$0xff] %v4198_v46  ;;  %v4204_v47 = vld [vmem:[%s4461_s5 + $0x118] sm:$0xff] }
 0x21e   : > { %1930 = vmatmul.mubr.f32.vlgmr.msra.gmra.mxu1 %v3841_v1  ;;  %v3903_v1 = vld [vmem:[%s4461_s5 + $0x60] sm:$0xff]  ;;  %3101 = vmatprep.subr.mxu1 %v4056_v17  ;;  %4541 = vst [vmem:[#allocation43_spill] sm:$0xff] %v4204_v47 }
 0x21f   : > { %3073 = vmatpush3.msra.mxu0 %v3903_v1  ;;  %3102 = vmatpush3.msra.mxu1 %v4062_v19 }
 0x220   : > { %3074 = vmatprep.subr.mxu0 %v3909_v55  ;;  %3103 = vmatprep.subr.mxu1 %v4068_v20 }
 0x221   : > { %3075 = vmatpush3.msra.mxu0 %v3915_v56  ;;  %3104 = vmatpush3.msra.mxu1 %v4074_v24 }
 0x222   : > { %3076 = vmatprep.subr.mxu0 %v3921_v58 }
 0x223   : > { %3077 = vmatpush3.msra.mxu0 %v3929_v59 }
 0x224   : > { %3078 = vmatprep.subr.mxu0 %v3935_v60 }
 0x225   : > { %3079 = vmatpush3.msra.mxu0 %v3941_v61 }
 0x226   : > { %3080 = vmatprep.subr.mxu0 %v3947_v10 }
 0x227   : > { %3081 = vmatpush3.msra.mxu0 %v3953_v62 }
 0x228   : > { %3082 = vmatprep.subr.mxu0 %v3959_v14 }
 0x229   : > { %3083 = vmatpush3.msra.mxu0 %v3965_v63 }
 0x22a   : > { %3084 = vmatprep.subr.mxu0 %v3971_v2 }
 0x22b   : > { %3085 = vmatpush3.msra.mxu0 %v3976_v3 }
 0x22c   : > { %3086 = vmatprep.subr.mxu0 %v3981_v57 }
 0x22d   : > { %3087 = vmatpush3.msra.mxu0 %v3987_v4 }
 0x22e   : > { %3088 = vmatprep.subr.mxu0 %v3993_v5 }
 0x22f   : > { %3089 = vmatpush3.msra.mxu0 %v3999_v6 }
 0x230   : > { %3090 = vmatprep.subr.mxu0 %v4005_v7 }
 0x231   : > { %3091 = vmatpush3.msra.mxu0 %v4011_v8 }
 0x232   : > { %3092 = vmatprep.subr.mxu0 %v4017_v9 }
 0x233   : > { %3093 = vmatpush3.msra.mxu0 %v4023_v11 }
 0x234   : > { %3094 = vmatprep.subr.mxu0 %v4029_v12 }
 0x235   : > { %3095 = vmatpush3.msra.mxu0 %v4035_v13 }
 0x236   : > { %3096 = vmatprep.subr.mxu0 %v4041_v15 }
 0x237   : > { %3097 = vmatpush3.msra.mxu0 %v4047_v16 }
 0x238   : > { %3136 = vmatprep.subr.mxu0 %v3851_v25  ;;  %v4080_v25 = vld [vmem:[%s4461_s5 + $0x1e8] sm:$0xff] }
 0x239   : > { %4520 = vst [vmem:[#allocation22_spill] sm:$0xff] %v4080_v25  ;;  %3105 = vmatprep.subr.mxu1 %v4080_v25 }
 0x23a   : > { %3106 = vmatpush3.msra.mxu1 %v4086_v26 }
 0x23b   : > { %3107 = vmatprep.subr.mxu1 %v4092_v28 }
 0x23c   : > { %3108 = vmatpush3.msra.mxu1 %v4098_v54 }
 0x23d   : > { %3109 = vmatprep.subr.mxu1 %v4104_v30 }
 0x23e   : > { %3110 = vmatpush3.msra.mxu1 %v4110_v44 }
 0x23f   : > { %3111 = vmatprep.subr.mxu1 %v4116_v31  ;;  %v805_v31 = vadd.f32 %v3864_v29, %v3860_v22 }
 0x240   : > { %3112 = vmatpush3.msra.mxu1 %v4122_v23 }
 0x241   : > { %3113 = vmatprep.subr.mxu1 %v4128_v32 }
 0x242   : > { %3114 = vmatpush3.msra.mxu1 %v4134_v33  ;;  %v803_v33 = vadd.f32 %v3846_v21, %v3844_v18 }
 0x243   : > { %3115 = vmatprep.subr.mxu1 %v4140_v34  ;;  %v4259_v34 = vld [vmem:[#allocation9] sm:$0xf] }
 0x244   : > { %3116 = vmatpush3.msra.mxu1 %v4146_v35 }
 0x245   : > { %3117 = vmatprep.subr.mxu1 %v4152_v37 }
 0x246   : > { %3118 = vmatpush3.msra.mxu1 %v4158_v38 }
 0x247   : > { %3119 = vmatprep.subr.mxu1 %v4164_v40 }
 0x248   : > { %3120 = vmatpush3.msra.mxu1 %v4170_v41 }
 0x249   : > { %3121 = vmatprep.subr.mxu1 %v4175_v36  ;;  %v2021_v36 = vlaneseq }
 0x24a   : > { %3122 = vmatpush3.msra.mxu1 %v4180_v42  ;;  %v4216_v42 = vld [vmem:[%s4461_s5 + $0x110] sm:$0xff] }
 0x24b   : > { %3123 = vmatprep.subr.mxu1 %v4186_v43  ;;  %4543 = vst [vmem:[#allocation45_spill] sm:$0xff] %v4216_v42  ;;  %v4222_v43 = vld [vmem:[%s4461_s5 + $0x188] sm:$0xff] }
 0x24c   : > { %3124 = vmatpush3.msra.mxu1 %v4192_v45  ;;  %4544 = vst [vmem:[#allocation46_spill] sm:$0xff] %v4222_v43  ;;  %v4228_v45 = vld [vmem:[%s4461_s5 + $0x108] sm:$0xff] }
 0x24d   : > { %3125 = vmatprep.subr.mxu1 %v4198_v46  ;;  %4545 = vst [vmem:[#allocation47_spill] sm:$0xff] %v4228_v45  ;;  %v4234_v46 = vld [vmem:[%s4461_s5 + $0x180] sm:$0xff] }
 0x24e   : > { %3126 = vmatpush3.msra.mxu1 %v4204_v47  ;;  %4546 = vst [vmem:[#allocation48_spill] sm:$0xff] %v4234_v46  ;;  %v4240_v47 = vld [vmem:[%s4461_s5 + $0x100] sm:$0xff] }
 0x24f   : > { %3127 = vmatprep.subr.mxu1 %v4210_v0  ;;  %4547 = vst [vmem:[#allocation49_spill] sm:$0xff] %v4240_v47  ;;  %v1258_v0 = vpop.f32.mrf.mxu0 }
 0x250   : > { %3128 = vmatpush3.msra.mxu1 %v4216_v42  ;;  %v1329_v42 = vpop.f32.mrf.mxu1 }
 0x251   : > { %3129 = vmatprep.subr.mxu1 %v4222_v43  ;;  %v1260_v40 = vpop.f32.mrf.mxu0  ;;  %v4248_v43 = vshrl.u32 %v2021_v36, 7 }
 0x252   : > { %3130 = vmatpush3.msra.mxu1 %v4228_v45  ;;  %v1331_v41 = vpop.f32.mrf.mxu1  ;;  %v1330_v45 = vadd.f32 %v1329_v42, %v1258_v0 }
 0x253   : > { %3131 = vmatprep.subr.mxu1 %v4234_v46  ;;  %v4255_v46 = vsub.s32 0, %v4248_v43  ;;  %v1332_v32 = vadd.f32 %v1331_v41, %v1260_v40  ;;  %v4264_v36 = vsub.s32 1, %v4248_v43 }
 0x254   : > { %3132 = vmatpush3.msra.mxu1 %v4240_v47  ;;  %v1476_v0 = vadd.f32 %v1330_v45, %v803_v33 }
 0x255   : > { %3171 = vmatprep.subr.mxu1 %v4056_v17  ;;  %v2024_v44 = vrot.slane %v4259_v34, %v4255_v46  ;;  %v1477_v28 = vadd.f32 %v1332_v32, %v805_v31  ;;  %v2028_v18 = vrot.slane %v4259_v34, %v4264_v36 }
 0x264   : > { %v4250_v37 = vpop.f32.mrf.mxu0 }
 0x266   : > { %v4257_v47 = vpop.f32.mrf.mxu0 }
 0x277   : > { %v4246_v38 = vpop.f32.mrf.mxu1 }
 0x279   : > { %v4252_v35 = vpop.f32.mrf.mxu1 }
 0x29d   : > { %v1860_v17 = vpop.f32.mrf.mxu1 }
 0x29f   : > { %v1862_v30 = vpop.f32.mrf.mxu1 }
 0x2a6   : > { %v1789_v23 = vpop.f32.mrf.mxu0 }
 0x2a7   : > { %v1861_v42 = vadd.f32 %v1860_v17, %v1789_v23 }
 0x2a8   : > { %v1791_v54 = vpop.f32.mrf.mxu0 }
 0x2a9   : > { %v2007_v26 = vadd.f32 %v1861_v42, %v1476_v0  ;;  %v1863_v25 = vadd.f32 %v1862_v30, %v1791_v54 }
 0x2ab   : > { %v4272_v21 = vadd.f32 %v2024_v44, %v2007_v26  ;;  %v2008_v40 = vadd.f32 %v1863_v25, %v1477_v28 }
 0x2ad   : > { %v2053_v41 = vrot.slane %v4272_v21, 4  ;;  %v4275_v24 = vadd.f32 %v2028_v18, %v2008_v40 }
 0x2af   : > { %v2059_v22 = vrot.slane %v4275_v24, 4  ;;  %v2054_v29 = vadd.f32 %v2053_v41, %v4272_v21  ;;  %v2078_v23 = vmul.f32 %v4275_v24, %v4275_v24  ;;  %v2077_v41 = vmul.f32 %v4272_v21, %v4272_v21 }
 0x2b1   : > { %v2060_v31 = vadd.f32 %v2059_v22, %v4275_v24  ;;  %v2055_v54 = vrot.slane %v2054_v29, 2  ;;  %v2087_v30 = vrot.slane %v2078_v23, 4 }
 0x2b3   : > { %v2061_v32 = vrot.slane %v2060_v31, 2  ;;  %v2056_v33 = vadd.f32 %v2055_v54, %v2054_v29  ;;  %v2088_v26 = vadd.f32 %v2087_v30, %v2078_v23 }
 0x2b5   : > { %v2062_v44 = vadd.f32 %v2061_v32, %v2060_v31  ;;  %v2089_v25 = vrot.slane %v2088_v26, 2  ;;  %v2057_v28 = vrot.slane %v2056_v33, 1  ;;  %v4549_v32 = vld [vmem:[#allocation21_spill] sm:$0xff] }
 0x2b7   : > { %v2063_v45 = vrot.slane %v2062_v44, 1  ;;  %v2090_v17 = vadd.f32 %v2089_v25, %v2088_v26  ;;  %v2058_v18 = vadd.f32 %v2057_v28, %v2056_v33  ;;  %v4550_v33 = vld [vmem:[#allocation22_spill] sm:$0xff]  ;;  %v4551_v26 = vld [vmem:[#allocation23_spill] sm:$0xff]  ;;  %v4552_v25 = vld [vmem:[#allocation24_spill] sm:$0xff] }
 0x2b8   : > { %v4553_v28 = vld [vmem:[#allocation25_spill] sm:$0xff] }
 0x2b9   : > { %v2064_v0 = vadd.f32 %v2063_v45, %v2062_v44  ;;  %v2091_v42 = vrot.slane %v2090_v17, 1  ;;  %v4554_v45 = vld [vmem:[#allocation26_spill] sm:$0xff] }
 0x2bb   : > { %2233 = vmatprep.mubr.f32.mxu0 %v2064_v0  ;;  %v2092_v40 = vadd.f32 %v2091_v42, %v2090_v17  ;;  %v4555_v17 = vld [vmem:[#allocation27_spill] sm:$0xff]  ;;  %v4557_v0 = vld [vmem:[#allocation29_spill] sm:$0xff]  ;;  %v4558_v42 = vld [vmem:[#allocation30_spill] sm:$0xff] }
 0x2bc   : > { %2234 = vmatmul.mubr.f32.vlgmr.msra.gmra.mxu0 %v2058_v18  ;;  %v4559_v18 = vld [vmem:[#allocation31_spill] sm:$0xff] }
 0x2bd   : > { %3137 = vmatpush3.msra.mxu0 %v3858_v27  ;;  %2373 = vmatprep.mubr.f32.mxu0 %v2092_v40  ;;  %v2081_v27 = vrot.slane %v2077_v41, 4  ;;  %v4560_v40 = vld [vmem:[#allocation32_spill] sm:$0xff] }
 0x2be   : > { %3138 = vmatprep.subr.mxu0 %v3874_v49 }
 0x2bf   : > { %3139 = vmatpush3.msra.mxu0 %v3879_v50  ;;  %v2082_v49 = vadd.f32 %v2081_v27, %v2077_v41  ;;  %v4561_v27 = vld [vmem:[#allocation33_spill] sm:$0xff] }
 0x2c0   : > { %3140 = vmatprep.subr.mxu0 %v3887_v51 }
 0x2c1   : > { %3141 = vmatpush3.msra.mxu0 %v3892_v52  ;;  %v2083_v50 = vrot.slane %v2082_v49, 2 }
 0x2c2   : > { %3142 = vmatprep.subr.mxu0 %v3897_v53 }
 0x2c3   : > { %3143 = vmatpush3.msra.mxu0 %v3903_v1  ;;  %v2084_v51 = vadd.f32 %v2083_v50, %v2082_v49  ;;  %v1472_v1 = vadd.f32 %v4250_v37, %v4246_v38  ;;  %v4562_v49 = vld [vmem:[#allocation34_spill] sm:$0xff]  ;;  %v4563_v50 = vld [vmem:[#allocation35_spill] sm:$0xff] }
 0x2c4   : > { %3144 = vmatprep.subr.mxu0 %v3909_v55  ;;  %v4318_v55 = vsub.s32 2, %v4248_v43 }
 0x2c5   : > { %3145 = vmatpush3.msra.mxu0 %v3915_v56  ;;  %v2085_v52 = vrot.slane %v2084_v51, 1 }
 0x2c6   : > { %3146 = vmatprep.subr.mxu0 %v3921_v58  ;;  %v1474_v58 = vadd.f32 %v4257_v47, %v4252_v35 }
 0x2c7   : > { %3147 = vmatpush3.msra.mxu0 %v3929_v59  ;;  %v2086_v53 = vadd.f32 %v2085_v52, %v2084_v51  ;;  %v4323_v59 = vsub.s32 3, %v4248_v43  ;;  %v4564_v51 = vld [vmem:[#allocation36_spill] sm:$0xff] }
 0x2c8   : > { %3148 = vmatprep.subr.mxu0 %v3935_v60  ;;  %v4548_v60 = vmov 0.0  }
 0x2c9   : > { %3149 = vmatpush3.msra.mxu0 %v3941_v61 }
 0x2ca   : > { %3150 = vmatprep.subr.mxu0 %v3947_v10  ;;  %v1478_v10 = vadd.f32 %v1472_v1, %v3867_v48  ;;  %v4566_v1 = vld [vmem:[#allocation38_spill] sm:$0xff] }
 0x2cb   : > { %3151 = vmatpush3.msra.mxu0 %v3953_v62 }
 0x2cc   : > { %3152 = vmatprep.subr.mxu0 %v3959_v14  ;;  %v2002_v56 = vpop.f32.mrf.mxu0  ;;  %v2032_v14 = vrot.slane %v4259_v34, %v4318_v55 }
 0x2cd   : > { %3153 = vmatpush3.msra.mxu0 %v3965_v63 }
 0x2ce   : > { %3154 = vmatprep.subr.mxu0 %v3971_v2  ;;  %v2004_v63 = vpop.f32.mrf.mxu0 }
 0x2cf   : > { %3155 = vmatpush3.msra.mxu0 %v3976_v3  ;;  %v1479_v3 = vadd.f32 %v1474_v58, %v3869_v39  ;;  %v4568_v58 = vld [vmem:[#allocation40_spill] sm:$0xff] }
 0x2d0   : > { %3156 = vmatprep.subr.mxu0 %v3981_v57 }
 0x2d1   : > { %3157 = vmatpush3.msra.mxu0 %v3987_v4 }
 0x2d2   : > { %3158 = vmatprep.subr.mxu0 %v3993_v5  ;;  %v2036_v5 = vrot.slane %v4259_v34, %v4323_v59 }
 0x2d3   : > { %3159 = vmatpush3.msra.mxu0 %v3999_v6 }
 0x2d4   : > { %3160 = vmatprep.subr.mxu0 %v4005_v7 }
 0x2d5   : > { %3161 = vmatpush3.msra.mxu0 %v4011_v8 }
 0x2d6   : > { %3162 = vmatprep.subr.mxu0 %v4017_v9 }
 0x2d7   : > { %3163 = vmatpush3.msra.mxu0 %v4023_v11 }
 0x2d8   : > { %3164 = vmatprep.subr.mxu0 %v4029_v12 }
 0x2d9   : > { %3165 = vmatpush3.msra.mxu0 %v4035_v13 }
 0x2da   : > { %3166 = vmatprep.subr.mxu0 %v4041_v15 }
 0x2db   : > { %3167 = vmatpush3.msra.mxu0 %v4047_v16 }
 0x2dc   : > { %2374 = vmatmul.mubr.f32.vlgmr.msra.gmra.mxu0 %v2086_v53  ;;  %v4565_v53 = vld [vmem:[#allocation37_spill] sm:$0xff] }
 0x2dd   : > { %2552 = vmatprep.mubr.f32.mxu0 %v4548_v60 }
 0x2de   : > { %v1931_v61 = vpop.f32.mrf.mxu1 }
 0x2df   : > { %v2003_v62 = vadd.f32 %v2002_v56, %v1931_v61  ;;  %v4567_v56 = vld [vmem:[#allocation39_spill] sm:$0xff] }
 0x2e0   : > { %v1933_v2 = vpop.f32.mrf.mxu1 }
 0x2e1   : > { %v2009_v57 = vadd.f32 %v2003_v62, %v1478_v10  ;;  %v2005_v4 = vadd.f32 %v2004_v63, %v1933_v2  ;;  %v4569_v10 = vld [vmem:[#allocation41_spill] sm:$0xff]  ;;  %v4570_v62 = vld [vmem:[#allocation42_spill] sm:$0xff]  ;;  %v4572_v63 = vld [vmem:[#allocation44_spill] sm:$0xff] }
 0x2e3   : > { %v4332_v6 = vadd.f32 %v2032_v14, %v2009_v57  ;;  %v2010_v7 = vadd.f32 %v2005_v4, %v1479_v3  ;;  %v4571_v14 = vld [vmem:[#allocation43_spill] sm:$0xff]  ;;  %v4573_v3 = vld [vmem:[#allocation45_spill] sm:$0xff]  ;;  %v4574_v57 = vld [vmem:[#allocation46_spill] sm:$0xff] }
 0x2e4   : > { %v4575_v4 = vld [vmem:[#allocation47_spill] sm:$0xff] }
 0x2e5   : > { %v2065_v8 = vrot.slane %v4332_v6, 4  ;;  %v4335_v9 = vadd.f32 %v2036_v5, %v2010_v7  ;;  %v2079_v44 = vmul.f32 %v4332_v6, %v4332_v6  ;;  %v4576_v5 = vld [vmem:[#allocation48_spill] sm:$0xff] }
 0x2e7   : > { %v2071_v48 = vrot.slane %v4335_v9, 4  ;;  %v2066_v11 = vadd.f32 %v2065_v8, %v4332_v6  ;;  %v2080_v12 = vmul.f32 %v4335_v9, %v4335_v9  ;;  %v4577_v8 = vld [vmem:[#allocation49_spill] sm:$0xff] }
 0x2e9   : > { %v2072_v39 = vadd.f32 %v2071_v48, %v4335_v9  ;;  %v2067_v13 = vrot.slane %v2066_v11, 2  ;;  %v2099_v15 = vrot.slane %v2080_v12, 4  ;;  %v3572_v48 = vmov 1983009808  }
 0x2eb   : > { %v2073_v16 = vrot.slane %v2072_v39, 2  ;;  %v2068_v34 = vadd.f32 %v2067_v13, %v2066_v11  ;;  %v2100_v35 = vadd.f32 %v2099_v15, %v2080_v12  ;;  %v2460_v11 = vunpack.c.l.s4 %v3572_v48 }
 0x2ed   : > { %v2074_v37 = vadd.f32 %v2073_v16, %v2072_v39  ;;  %v2101_v38 = vrot.slane %v2100_v35, 2  ;;  %v2069_v47 = vrot.slane %v2068_v34, 1  ;;  %v2461_v12 = vunpack.c.0.s8 %v2460_v11  ;;  %v2456_v39 = vld [vmem:[#allocation13] sm:$0xff] }
 0x2ee   : > { %v2458_v15 = vcombine.high %v2456_v39, %v2456_v39 }
 0x2ef   : > { %v2075_v22 = vrot.slane %v2074_v37, 1  ;;  %v2102_v29 = vadd.f32 %v2101_v38, %v2100_v35  ;;  %v2070_v54 = vadd.f32 %v2069_v47, %v2068_v34  ;;  %v2464_v13 = vsub.s32 %v2461_v12, %v4248_v43 }
 0x2f1   : > { %v2076_v23 = vadd.f32 %v2075_v22, %v2074_v37  ;;  %v2103_v31 = vrot.slane %v2102_v29, 1  ;;  %v2465_v16 = vrot.slane %v2456_v39, %v2464_v13  ;;  %v2472_v34 = vrot.slane %v2458_v15, %v2464_v13 }
 0x2f3   : > { %2303 = vmatprep.mubr.f32.mxu1 %v2076_v23  ;;  %v2104_v30 = vadd.f32 %v2103_v31, %v2102_v29  ;;  %v2473_v35 = vcombine.high %v2465_v16, %v2465_v16  ;;  %v2474_v37 = vcombine.high %v2472_v34, %v2472_v34 }
 0x2f4   : > { %2304 = vmatmul.mubr.f32.vlgmr.msra.gmra.mxu1 %v2070_v54 }
 0x2f5   : > { %3172 = vmatpush3.msra.mxu1 %v4062_v19  ;;  %2443 = vmatprep.mubr.f32.mxu1 %v2104_v30  ;;  %v4556_v19 = vld [vmem:[#allocation28_spill] sm:$0xff] }
 0x2f6   : > { %3173 = vmatprep.subr.mxu1 %v4068_v20  ;;  %v2093_v20 = vrot.slane %v2079_v44, 4  ;;  %3047 = vmatprep.subr.msk.mxu0 %vm2479_vm0, %v2473_v35 }
 0x2f7   : > { %3174 = vmatpush3.msra.mxu1 %v4549_v32  ;;  %3048 = vmatpush1.msk.msra.mxu0 %vm2479_vm0, %v2465_v16 }
 0x2f8   : > { %3175 = vmatprep.subr.mxu1 %v4550_v33  ;;  %v2094_v41 = vadd.f32 %v2093_v20, %v2079_v44  ;;  %3053 = vmatprep.subr.msk.mxu0 %vm2479_vm0, %v2473_v35  ;;  %v2801_v35 = vld [vmem:[#allocation12] sm:$0xf] }
 0x2f9   : > { %3176 = vmatpush3.msra.mxu1 %v4551_v26 }
 0x2fa   : > { %3177 = vmatprep.subr.mxu1 %v4552_v25  ;;  %v2095_v52 = vrot.slane %v2094_v41, 2 }
 0x2fb   : > { %3178 = vmatpush3.msra.mxu1 %v4553_v28 }
 0x2fc   : > { %3179 = vmatprep.subr.mxu1 %v4554_v45  ;;  %v2096_v61 = vadd.f32 %v2095_v52, %v2094_v41  ;;  %v3573_v41 = vmov 1966171168  }
 0x2fd   : > { %3180 = vmatpush3.msra.mxu1 %v4555_v17 }
 0x2fe   : > { %3181 = vmatprep.subr.mxu1 %v4556_v19  ;;  %v2097_v2 = vrot.slane %v2096_v61, 1 }
 0x2ff   : > { %3182 = vmatpush3.msra.mxu1 %v4557_v0 }
 0x300   : > { %3183 = vmatprep.subr.mxu1 %v4558_v42  ;;  %v2098_v7 = vadd.f32 %v2097_v2, %v2096_v61 }
 0x301   : > { %3184 = vmatpush3.msra.mxu1 %v4559_v18 }
 0x302   : > { %3185 = vmatprep.subr.mxu1 %v4560_v40 }
 0x303   : > { %3186 = vmatpush3.msra.mxu1 %v4561_v27  ;;  %v2813_v27 = vunpack.c.l.s4 %v3573_v41 }
 0x304   : > { %3187 = vmatprep.subr.mxu1 %v4562_v49 }
 0x305   : > { %3188 = vmatpush3.msra.mxu1 %v4563_v50  ;;  %v2814_v61 = vunpack.c.0.s8 %v2813_v27 }
 0x306   : > { %3189 = vmatprep.subr.mxu1 %v4564_v51 }
 0x307   : > { %3190 = vmatpush3.msra.mxu1 %v4565_v53 }
 0x308   : > { %3191 = vmatprep.subr.mxu1 %v4566_v1 }
 0x309   : > { %3192 = vmatpush3.msra.mxu1 %v4567_v56 }
 0x30a   : > { %3193 = vmatprep.subr.mxu1 %v4568_v58 }
 0x30b   : > { %3194 = vmatpush3.msra.mxu1 %v4569_v10 }
 0x30c   : > { %3195 = vmatprep.subr.mxu1 %v4570_v62 }
 0x30d   : > { %3196 = vmatpush3.msra.mxu1 %v4571_v14 }
 0x30e   : > { %3197 = vmatprep.subr.mxu1 %v4572_v63 }
 0x30f   : > { %3198 = vmatpush3.msra.mxu1 %v4573_v3 }
 0x310   : > { %3199 = vmatprep.subr.mxu1 %v4574_v57  ;;  %v2817_v57 = vsub.s32 %v2814_v61, %v4248_v43 }
 0x311   : > { %3200 = vmatpush3.msra.mxu1 %v4575_v4 }
 0x312   : > { %3201 = vmatprep.subr.mxu1 %v4576_v5 }
 0x313   : > { %3202 = vmatpush3.msra.mxu1 %v4577_v8 }
 0x314   : > { %2444 = vmatmul.mubr.f32.vlgmr.msra.gmra.mxu1 %v2098_v7  ;;  %3050 = vmatprep.subr.msk.mxu1 %vm2479_vm0, %v2474_v37 }
 0x315   : > { %2623 = vmatprep.mubr.f32.mxu1 %v4548_v60  ;;  %3051 = vmatpush1.msk.msra.mxu1 %vm2479_vm0, %v2472_v34 }
 0x316   : > { %3056 = vmatprep.subr.msk.mxu1 %vm2479_vm0, %v2474_v37 }
 0x37c   : > { %v3098_v38 = vpop.f32.mrf.mxu0 }
 0x37e   : > { %v3099_v47 = vpop.f32.mrf.mxu0 }
 0x37f   : > { %v3100_v23 = vadd.f32 %v3099_v47, %v3098_v38 }
 0x39c   : > { %v3168_v32 = vpop.f32.mrf.mxu0 }
 0x39e   : > { %v3169_v33 = vpop.f32.mrf.mxu0 }
 0x39f   : > { %v3170_v25 = vadd.f32 %v3169_v33, %v3168_v32 }
 0x3b4   : > { %v3133_v22 = vpop.f32.mrf.mxu1 }
 0x3b6   : > { %v3134_v29 = vpop.f32.mrf.mxu1 }
 0x3b7   : > { %v3135_v31 = vadd.f32 %v3134_v29, %v3133_v22 }
 0x3b9   : > { %v2306_v54 = vadd.f32 %v3135_v31, %v3100_v23 }
 0x3bb   : > { %v2450_v30 = vmul.f32 0.00048828125, %v2306_v54 }
 0x3bd   : > { %3049 = vmatmul.mubr.msk.f32.vlgmr.msra.gmra.mxu0 %vm2475_vm9, %v2450_v30  ;;  %3052 = vmatmul.mubr.msk.f32.vlgmr.msra.gmra.mxu1 %vm2475_vm9, %v2450_v30  ;;  %v2452_v19 = vmul.f32 %v2450_v30, %v2450_v30 }
 0x3be   : > { %3054 = vmatpush1.msk.msra.mxu0 %vm2479_vm0, %v2465_v16  ;;  %3057 = vmatpush1.msk.msra.mxu1 %vm2479_vm0, %v2472_v34 }
 0x3bf   : > { %2697 = vmatprep.mubr.f32.mxu0 %v4548_v60  ;;  %2768 = vmatprep.mubr.f32.mxu1 %v4548_v60  ;;  %v2775_v60 = vld [vmem:[#allocation10] sm:$0xf] }
 0x3c0   : > { %v2780_v51 = vrot.slane %v2775_v60, %v4255_v46  ;;  %v2788_v52 = vrot.slane %v2775_v60, %v4318_v55  ;;  %v2784_v56 = vrot.slane %v2775_v60, %v4264_v36  ;;  %v2792_v58 = vrot.slane %v2775_v60, %v4323_v59 }
 0x3d4   : > { %v3203_v26 = vpop.f32.mrf.mxu1 }
 0x3d6   : > { %v3204_v44 = vpop.f32.mrf.mxu1 }
 0x3d7   : > { %v3205_v28 = vadd.f32 %v3204_v44, %v3203_v26 }
 0x3d9   : > { %v2446_v45 = vadd.f32 %v3205_v28, %v3170_v25 }
 0x3db   : > { %v2451_v17 = vmul.f32 0.00048828125, %v2446_v45 }
 0x3dd   : > { %v2453_v20 = vsub.f32 %v2451_v17, %v2452_v19 }
 0x3df   : > { %v2454_v0 = vadd.f32 1e-05, %v2453_v20 }
 0x3e1   : > { %3317 = vrsqrt.f32 %v2454_v0 }
 0x3ee   : > { %v3318_v42 = vpop.eup %3317 }
 0x3ef   : > { %3055 = vmatmul.mubr.msk.f32.vlgmr.msra.gmra.mxu0 %vm2475_vm9, %v3318_v42  ;;  %3058 = vmatmul.mubr.msk.f32.vlgmr.msra.gmra.mxu1 %vm2475_vm9, %v3318_v42 }
 0x47d   : > { %v2554_v18 = vpop.f32.mrf.mxu0  ;;  %v2625_v40 = vpop.f32.mrf.mxu1 }
 0x47f   : > { %v2556_v49 = vpop.f32.mrf.mxu0  ;;  %v2627_v50 = vpop.f32.mrf.mxu1 }
 0x4af   : > { %v2699_v53 = vpop.f32.mrf.mxu0  ;;  %v2770_v1 = vpop.f32.mrf.mxu1 }
 0x4b0   : > { %v2797_v10 = vmul.f32 %v2780_v51, %v2699_v53  ;;  %v2799_v62 = vmul.f32 %v2788_v52, %v2770_v1 }
 0x4b1   : > { %v2701_v14 = vpop.f32.mrf.mxu0  ;;  %v2772_v63 = vpop.f32.mrf.mxu1 }
 0x4b2   : > { %v2798_v2 = vmul.f32 %v2784_v56, %v2701_v14  ;;  %v2800_v3 = vmul.f32 %v2792_v58, %v2772_v63  ;;  %v2802_v4 = vmul.f32 %v2797_v10, %v2554_v18  ;;  %v2804_v5 = vmul.f32 %v2799_v62, %v2625_v40 }
 0x4b3   : > { %v2839_v15 = vrot.slane %v2797_v10, %v4255_v46  ;;  %v2847_v16 = vrot.slane %v2799_v62, %v4255_v46 }
 0x4b4   : > { %v2803_v7 = vmul.f32 %v2798_v2, %v2556_v49  ;;  %v2805_v8 = vmul.f32 %v2800_v3, %v2627_v50  ;;  %v2843_v34 = vrot.slane %v2798_v2, %v4255_v46  ;;  %v2851_v43 = vrot.slane %v2800_v3, %v4255_v46 }
 0x4b5   : > { %v2852_v47 = vmul.f32 %v2839_v15, %v4272_v21  ;;  %v2854_v22 = vmul.f32 %v2847_v16, %v4332_v6 }
 0x4b6   : > { %v2810_v48 = vcombine.low %v2802_v4, %v2803_v7  ;;  %v2811_v11 = vcombine.low %v2804_v5, %v2805_v8  ;;  %v2853_v29 = vmul.f32 %v2843_v34, %v4275_v24  ;;  %v2855_v23 = vmul.f32 %v2851_v43, %v4335_v9 }
 0x4b8   : > { %v2818_v12 = vrot.slane %v2810_v48, %v2817_v57  ;;  %v2825_v39 = vrot.slane %v2811_v11, %v2817_v57 }
 0x4ba   : > { %v2826_v13 = vcombine.low %v2818_v12, %v2825_v39 }
 0x4bc   : > { %v2833_v37 = vrot.slane %v2826_v13, %v2817_v57 }
 0x4be   : > { %v2835_v38 = vsub.f32 %v2801_v35, %v2833_v37 }
 0x4c0   : > { %v2860_v31 = vrot.slane %v2835_v38, %v4255_v46  ;;  %v2864_v54 = vrot.slane %v2835_v38, %v4264_v36  ;;  %v2868_v30 = vrot.slane %v2835_v38, %v4318_v55  ;;  %v2872_v32 = vrot.slane %v2835_v38, %v4323_v59 }
 0x4c2   : > { %v2880_v33 = vadd.f32 %v2872_v32, %v2855_v23  ;;  %v2877_v21 = vadd.f32 %v2860_v31, %v2852_v47  ;;  %v2878_v6 = vadd.f32 %v2864_v54, %v2853_v29  ;;  %v2879_v26 = vadd.f32 %v2868_v30, %v2854_v22 }
 0x4c4   : > { %v2884_v24 = vmax.f32 %v2880_v33, 0.0  ;;  %v2881_v44 = vmax.f32 %v2877_v21, 0.0  ;;  %v2882_v9 = vmax.f32 %v2878_v6, 0.0  ;;  %v2883_v25 = vmax.f32 %v2879_v26, 0.0 }
 0x4c6   : > { %2888 = vst [vmem:[%s359_s18 + $0x18] sm:$0xff] %v2884_v24  ;;  %2885 = vst [vmem:[%s359_s18] sm:$0xff] %v2881_v44 }
 0x4c7   : > { %2886 = vst [vmem:[%s359_s18 + $0x8] sm:$0xff] %v2882_v9  ;;  %2887 = vst [vmem:[%s359_s18 + $0x10] sm:$0xff] %v2883_v25 }
 0x4c8   : > { %3490 = shalt.err (!%p3487_p3)
}
 0x4c9   : > { %s3491_s22 = scalar_lea.hbm %s4413_s16, 512  ;;  %s3495_s1 = scalar_lea.hbm %s4463_s7, 1024 }
 0x4ca   : > { %p3492_p0 = scmp.ne.s32.totalorder %s4413_s16, %s3491_s22  ;;  %p3496_p5 = scmp.lt.s32.totalorder %s4413_s16, %s4463_s7 }
 0x4cb   : > { %p3497_p11 = scmp.lt.s32.totalorder %s3495_s1, %s3491_s22 }
 0x4cc   : > { %p3493_p6 = pnand %p3492_p0, %p4578_p13 }
 0x4cd   : > { %p3498_p10 = por %p3497_p11, %p3496_p5 }
 0x4ce   : > { %p3494_p2 = pneg %p3493_p6 }
 0x4d0   : > { %p3499_p12 = pnand %p3498_p10, %p3494_p2 }
 0x4d2   : > { %3502 = shalt.err (!%p3499_p12)
}
 0x4d3   : > { %3228 = dma.vmem_to_hbm [thread:$0]  (%p4578_p13), %s4415_s19, 512, %s4413_s16, %s2890_s30  }
 0x4d4 PF: > { %s2916_s28 = sand.u32 1, %s3541_s24   ;;  %p4579_p4 = scmp.ne.s32.totalorder %s4509_s10, 0 }
 0x4d5   : > { %p4580_p1 = scmp.ge.s32.totalorder %s3553_s27, 2  ;;  %s2917_s18 = scalar_lea.sflag [#allocation6], %s2916_s28 }
 0x4d7   : > { %p3251_p8 = pnand %p4580_p1, %p4579_p4 }
 0x4d9   : > { %p3252_p7 = pneg %p3251_p8 }
 0x4db   : > { %3536 = dma.done.wait (%p3252_p7), %s2917_s18, 512  }
 0x4dc   : > { %3538 = vsyncadd (%p3252_p7), %s2917_s18, 4294966784  ;;  %p23_p9 = scmp.ge.s32.totalorder %s3704_s11, 4   ;;  %s4581_s24 = smov %s3545_s25 }
 0x4dd   : > { %s4582_s25 = smov %s3549_s26  ;;  %s4583_s26 = smov %s3716_s23 }
 0x4de   : > { %s4584_s27 = smov %s3704_s11  ;;  %25 = sbr.rel (!%p23_p9) target bundleno = 11 (0xb), region = 115 }
 0x4e3   :  { %2922 = vsyncpa [#allocation5], 1 }
 0x4e4   :  { %2924 = vsyncpa [#allocation5 + $0x1], 1 }
 0x4e5   :  { %2925 = vsyncpa [#allocation8], 1 }
 0x4e6   :  { %2926 = vsyncpa [#allocation11], 1 }
 0x4e7   :  { %2927 = vsyncpa [#allocation14], 1 }
 0x4e8   :  { %2928 = vsyncpa [#allocation6], 1 }
 0x4e9   :  { %2930 = vsyncpa [#allocation6 + $0x1], 1 }

</bundles_post_ra>
